<compile_context>
chip_gen: v7x
topology: tpu7x:2x2x1
jax: 0.10.0
libtpu: 0.0.40
codegen_flags: <defaults>
</compile_context>

<pallas_src>
import functools

import jax
import jax.numpy as jnp
from jax import lax
from jax.experimental import pallas as pl
from jax.experimental.pallas import tpu as pltpu

LANE = 128


def _round_up(x, m):
    return (x + m - 1) // m * m


def _act(v, kind):
    """MobileNetV3 nolinear: ReLU or h-swish."""
    if kind == "hswish":
        return v * (jnp.clip(v + 3.0, 0.0, 6.0) * (1.0 / 6.0))
    return jnp.maximum(v, 0.0)


def _default_tap_dtype():
    """bf16 tap storage on v6e/v7x (native bf16 VPU); f32 on v5x and older."""
    try:
        kind = jax.devices()[0].device_kind.lower()
    except Exception:
        return jnp.float32
    if "tpu" not in kind:
        return jnp.float32
    for old in ("v2", "v3", "v4", "v5"):
        if old in kind:
            return jnp.float32
    return jnp.bfloat16


def block_kernel(*refs, K, stride, H, W, BT, use_se, sc_mode, activation,
                 cdt, tap_dt, pad_rows):
    """Fused MobileNetV3 Block.

    Ref order: x, w1, b1, w2, b2, w3, b3,
               [wse1, bse1, wse2, bse2]  (iff use_se),
               [wsc, bsc]                (iff sc_mode == 2),
               out, [fbuf]               (VMEM scratch iff stride == 1).
    BN scales are pre-folded into conv weights; b* are folded biases.
    Ce/Cout/Cse are lane-padded to multiples of 128 (padded entries are zero).
    sc_mode: 0 = no shortcut, 1 = identity shortcut, 2 = 1x1-conv shortcut.
    """
    it = iter(refs)
    x_ref = next(it)
    w1_ref, b1_ref = next(it), next(it)
    w2_ref, b2_ref = next(it), next(it)
    w3_ref, b3_ref = next(it), next(it)
    if use_se:
        wse1_ref, bse1_ref = next(it), next(it)
        wse2_ref, bse2_ref = next(it), next(it)
    if sc_mode == 2:
        wsc_ref, bsc_ref = next(it), next(it)
    out_ref = next(it)
    fbuf = next(it) if stride == 1 else None

    p = K // 2
    Ho = (H + 2 * p - K) // stride + 1
    Wo = (W + 2 * p - K) // stride + 1
    HW = H * W

    Cin = x_ref.shape[-1]
    Ce = w1_ref.shape[-1]                               # padded expand width
    x2d = x_ref[...].reshape(BT * HW, Cin)              # f32

    # ---- expand: 1x1 conv (BN folded) + bias + activation (MXU, bf16) ----
    t = jnp.dot(x2d.astype(cdt), w1_ref[...], preferred_element_type=jnp.float32)
    t = _act(t + b1_ref[...], activation)

    w2 = w2_ref[...]                                    # (K, K, Ce) f32

    if stride == 1:
        # Depthwise via a per-image-haloed VMEM scratch: write t once (tap
        # dtype), then per column-offset kj load ONE shifted super-slab
        # covering all row offsets, mask out-of-image source columns once,
        # and take the K row taps as W-aligned value slices.  (K-1) misaligned
        # loads per grid step instead of K*(K-1) misaligned copies.
        fb_dt = fbuf.dtype
        if pad_rows > 0:                                # zero halo rows (cheap,
            fbuf[:, :pad_rows, :] = jnp.zeros((BT, pad_rows, Ce), fb_dt)
            fbuf[:, pad_rows + HW:, :] = jnp.zeros((BT, pad_rows, Ce), fb_dt)
        fbuf[:, pad_rows:pad_rows + HW, :] = t.reshape(BT, HW, Ce).astype(fb_dt)

        HWg = HW + 2 * p * W                            # super-slab rows
        rcol = lax.broadcasted_iota(jnp.int32, (HWg, 1), 0) % W
        dw = jnp.zeros((BT, HW, Ce), jnp.float32)
        for kj in range(K):
            dj = kj - p
            goff = pad_rows - p * W + dj                # static, >= 0
            gf = fbuf[:, goff:goff + HWg, :].astype(jnp.float32)
            if dj != 0:                                 # source-column mask
                cmask = jnp.logical_and(rcol + dj >= 0, rcol + dj < W)
                gf = jnp.where(cmask, gf, 0.0)
            for ki in range(K):                         # W-aligned row taps
                tap = gf[:, ki * W:ki * W + HW, :]
                dw = dw + tap * w2[ki, kj]
        dw2d = dw.reshape(BT * HW, Ce)
    else:
        # stride > 1: in-value zero padding + strided taps; the W (sublane)
        # strided extract is hoisted to the outer loop (K instead of K*K).
        # (A space-to-depth reshape would avoid the sublane gather but places
        #  a size-`stride` dim in the sublane slot -> more vregs; keep this.)
        t4 = t.reshape(BT, H, W, Ce).astype(tap_dt)
        if p > 0:
            zh = jnp.zeros((BT, p, W, Ce), tap_dt)
            t4 = jnp.concatenate([zh, t4, zh], axis=1)
            zw = jnp.zeros((BT, H + 2 * p, p, Ce), tap_dt)
            t4 = jnp.concatenate([zw, t4, zw], axis=2)
        dw4 = jnp.zeros((BT, Ho, Wo, Ce), jnp.float32)
        for kj in range(K):
            cols = t4[:, :, kj:kj + (Wo - 1) * stride + 1:stride, :]
            cols = cols.astype(jnp.float32)
            for ki in range(K):
                rows = cols[:, ki:ki + (Ho - 1) * stride + 1:stride, :, :]
                dw4 = dw4 + rows * w2[ki, kj]
        dw2d = dw4.reshape(BT * Ho * Wo, Ce)

    dw2d = _act(dw2d + b2_ref[...], activation)

    # ---- project: 1x1 conv (BN folded) + bias (MXU, bf16) ----
    o = jnp.dot(dw2d.astype(cdt), w3_ref[...], preferred_element_type=jnp.float32)
    o = o + b3_ref[...]
    Cout = o.shape[-1]                                  # padded output width

    # ---- squeeze-excite: GAP -> fc+ReLU -> fc -> hsigmoid -> rescale ----
    if use_se:
        o3 = o.reshape(BT, Ho * Wo, Cout)
        s = jnp.mean(o3, axis=1)                        # (BT, Cout)
        s1 = jnp.dot(s.astype(cdt), wse1_ref[...],
                     preferred_element_type=jnp.float32)
        s1 = jnp.maximum(s1 + bse1_ref[...], 0.0)
        s2 = jnp.dot(s1.astype(cdt), wse2_ref[...],
                     preferred_element_type=jnp.float32)
        s2 = s2 + bse2_ref[...]
        gate = jnp.clip(s2 + 3.0, 0.0, 6.0) * (1.0 / 6.0)    # hsigmoid
        o = (o3 * gate[:, None, :]).reshape(BT * Ho * Wo, Cout)

    # ---- shortcut / residual (stride == 1 only) ----
    if sc_mode == 2:
        sc = jnp.dot(x2d.astype(cdt), wsc_ref[...],
                     preferred_element_type=jnp.float32)
        o = o + (sc + bsc_ref[...])
    elif sc_mode == 1:
        # Identity shortcut: x was zero-padded to the padded Cout host-side,
        # so this is a plain lane-dense f32 add.
        o = o + x2d

    out_ref[...] = o.reshape(BT, Ho * Wo, Cout).astype(out_ref.dtype)


def _full_spec(arr):
    """BlockSpec covering the whole (small) array at every grid step."""
    zeros = (0,) * arr.ndim
    return pl.BlockSpec(arr.shape, lambda n, _z=zeros: _z)


def mobilenetv3_block_slab(x_slab, P, *, H, W, kernel_size, stride, use_se,
                           activation="relu", batch_tile=1,
                           compute_dtype=jnp.bfloat16, tap_dtype=None):
    """Fused Block on a lane-dense (N, H*W, Cin) f32 activation slab.

    Returns an (N, Ho*Wo, Cout) f32 slab.  Keeping activations in this layout
    across a network avoids the NCHW<->NHWC HBM round trips per block.
    """
    N, HW, Cin = x_slab.shape
    assert HW == H * W
    K = kernel_size
    p = K // 2
    Ho = (H + 2 * p - K) // stride + 1
    Wo = (W + 2 * p - K) // stride + 1
    Ce = P['w1'].shape[1]
    Cout = P['w3'].shape[1]
    sc_mode = 0 if stride != 1 else (1 if Cin == Cout else 2)

    # Lane padding: Ce/Cout/Cse to multiples of 128 so every intermediate and
    # the output store is lane-dense; padded weights/biases are zero and the
    # padded output lanes are sliced off after the call.
    Ce_p = _round_up(Ce, LANE)
    Cout_p = _round_up(Cout, LANE)
    # Identity shortcut adds x directly to the (padded-Cout) result, so pad
    # the input channels to match in that case only.
    Cin_p = Cout_p if sc_mode == 1 else Cin

    BT = batch_tile
    assert N % BT == 0, "batch_tile must divide the batch size"
    cdt = compute_dtype
    if tap_dtype is None:
        tap_dtype = _default_tap_dtype()

    def pad2(w, rows, cols):
        return jnp.pad(w, ((0, rows - w.shape[0]), (0, cols - w.shape[1])))

    # Fold BN scales into conv weights host-side; MXU operands go to bf16.
    w1f = pad2(P['w1'] * P['bn1s'], Cin_p, Ce_p).astype(cdt)
    b1f = pad2(P['bn1b'], 1, Ce_p)
    w2f = jnp.pad(P['w2'] * P['bn2s'].reshape(1, 1, -1),
                  ((0, 0), (0, 0), (0, Ce_p - Ce))).astype(jnp.float32)
    b2f = pad2(P['bn2b'], 1, Ce_p)
    w3f = pad2(P['w3'] * P['bn3s'], Ce_p, Cout_p).astype(cdt)
    b3f = pad2(P['bn3b'], 1, Cout_p)

    x_in = x_slab.astype(jnp.float32)
    if Cin_p != Cin:
        x_in = jnp.pad(x_in, ((0, 0), (0, 0), (0, Cin_p - Cin)))

    args = [x_in, w1f, b1f, w2f, b2f, w3f, b3f]
    in_specs = [pl.BlockSpec((BT, HW, Cin_p), lambda n: (n, 0, 0))]
    in_specs += [_full_spec(a) for a in args[1:]]

    if use_se:
        Cse = P['wse1'].shape[1]
        Cse_p = _round_up(Cse, LANE)
        wse1f = pad2(P['wse1'] * P['bnse1s'], Cout_p, Cse_p).astype(cdt)
        bse1f = pad2(P['bnse1b'], 1, Cse_p)
        wse2f = pad2(P['wse2'] * P['bnse2s'], Cse_p, Cout_p).astype(cdt)
        bse2f = pad2(P['bnse2b'], 1, Cout_p)
        se_args = [wse1f, bse1f, wse2f, bse2f]
        args += se_args
        in_specs += [_full_spec(a) for a in se_args]
    if sc_mode == 2:
        wscf = pad2(P['wsc'] * P['bnscs'], Cin, Cout_p).astype(cdt)
        bscf = pad2(P['bnscb'], 1, Cout_p)
        sc_args = [wscf, bscf]
        args += sc_args
        in_specs += [_full_spec(a) for a in sc_args]

    out_spec = pl.BlockSpec((BT, Ho * Wo, Cout_p), lambda n: (n, 0, 0))

    pad_rows = _round_up(p * (W + 1), 8) if stride == 1 else 0
    scratch_shapes = []
    if stride == 1:
        scratch_shapes.append(
            pltpu.VMEM((BT, HW + 2 * pad_rows, Ce_p), tap_dtype))

    # Raise the scoped-VMEM limit only when the per-step estimate needs it
    # (matters for production shapes; no-op at these test sizes).
    tap_bytes = jnp.dtype(tap_dtype).itemsize
    weight_bytes = sum(int(a.size) * a.dtype.itemsize for a in args[1:])
    step_bytes = (2 * BT * HW * Cin_p * 4             # double-buffered input
                  + 2 * BT * Ho * Wo * Cout_p * 4     # double-buffered output
                  + 2 * weight_bytes                  # weight pipeline buffers
                  + (BT * (HW + 2 * pad_rows) * Ce_p * tap_bytes
                     if stride == 1 else 0)           # haloed tap scratch
                  + 6 * BT * HW * Ce_p * 4)           # live f32 intermediates
    vmem_limit = None
    if step_bytes > 24 * 1024 * 1024:
        vmem_limit = int(min(step_bytes + step_bytes // 4, 100 * 1024 * 1024))

    kern = functools.partial(block_kernel, K=K, stride=stride, H=H, W=W,
                             BT=BT, use_se=use_se, sc_mode=sc_mode,
                             activation=activation, cdt=cdt,
                             tap_dt=tap_dtype, pad_rows=pad_rows)

    out = pl.pallas_call(
        kern,
        out_shape=jax.ShapeDtypeStruct((N, Ho * Wo, Cout_p), jnp.float32),
        grid_spec=pltpu.PrefetchScalarGridSpec(
            num_scalar_prefetch=0,
            grid=(N // BT,),
            in_specs=in_specs,
            out_specs=out_spec,
            scratch_shapes=scratch_shapes,
        ),
        compiler_params=pltpu.CompilerParams(
            dimension_semantics=("parallel",),        # batch steps independent
            vmem_limit_bytes=vmem_limit),
    )(*args)

    return out[..., :Cout]                            # drop lane padding


def mobilenetv3_block(x_nchw, P, *, kernel_size, stride, use_se,
                      activation="relu", batch_tile=1,
                      compute_dtype=jnp.bfloat16, tap_dtype=None):
    """NCHW convenience wrapper matching the PyTorch module's interface.

    For stacked blocks prefer mobilenetv3_block_slab to keep activations in
    the lane-dense (N, H*W, C) layout and skip these HBM transposes.
    """
    N, Cin, H, W = x_nchw.shape
    x_slab = jnp.transpose(x_nchw, (0, 2, 3, 1)).reshape(N, H * W, Cin)
    out = mobilenetv3_block_slab(x_slab, P, H=H, W=W, kernel_size=kernel_size,
                                 stride=stride, use_se=use_se,
                                 activation=activation, batch_tile=batch_tile,
                                 compute_dtype=compute_dtype,
                                 tap_dtype=tap_dtype)
    p = kernel_size // 2
    Ho = (H + 2 * p - kernel_size) // stride + 1
    Wo = (W + 2 * p - kernel_size) // stride + 1
    Cout = out.shape[-1]
    return jnp.transpose(out.reshape(N, Ho, Wo, Cout), (0, 3, 1, 2))


# ----------------------------- parameters ---------------------------------
def make_params(key, Cin, Ce, Cout, K, reduction=4):
    Cse = max(Cout // reduction, 1)
    ks = list(jax.random.split(key, 16))

    def w(k, shape):
        return 0.1 * jax.random.normal(k, shape, jnp.float32)

    def bn(k, C):
        k1, k2, k3, k4 = jax.random.split(k, 4)
        gamma = 1.0 + 0.1 * jax.random.normal(k1, (C,), jnp.float32)
        beta = 0.1 * jax.random.normal(k2, (C,), jnp.float32)
        mean = 0.1 * jax.random.normal(k3, (C,), jnp.float32)
        var = jnp.abs(jax.random.normal(k4, (C,), jnp.float32)) + 0.5
        scale = gamma / jnp.sqrt(var + 1e-5)
        bias = beta - mean * scale
        return scale.reshape(1, C), bias.reshape(1, C)

    P = {}
    P['w1'] = w(ks[0], (Cin, Ce))          # conv1 1x1 (in -> expand)
    P['bn1s'], P['bn1b'] = bn(ks[1], Ce)
    P['w2'] = w(ks[2], (K, K, Ce))         # depthwise KxK
    P['bn2s'], P['bn2b'] = bn(ks[3], Ce)
    P['w3'] = w(ks[4], (Ce, Cout))         # conv3 1x1 (expand -> out)
    P['bn3s'], P['bn3b'] = bn(ks[5], Cout)
    P['wse1'] = w(ks[6], (Cout, Cse))      # SE squeeze 1x1
    P['bnse1s'], P['bnse1b'] = bn(ks[7], Cse)
    P['wse2'] = w(ks[8], (Cse, Cout))      # SE excite 1x1
    P['bnse2s'], P['bnse2b'] = bn(ks[9], Cout)
    P['wsc'] = w(ks[10], (Cin, Cout))      # shortcut 1x1 (used iff Cin != Cout)
    P['bnscs'], P['bnscb'] = bn(ks[11], Cout)
    return P


# --------------------------- pure-JAX reference ----------------------------
def ref_block(x_nhwc, P, *, K, stride, use_se, sc_mode, activation,
              compute_dtype, tap_dtype):
    cdt = compute_dtype
    p = K // 2
    N, H, W, Cin = x_nhwc.shape
    Ho = (H + 2 * p - K) // stride + 1
    Wo = (W + 2 * p - K) // stride + 1

    w1f = (P['w1'] * P['bn1s']).astype(cdt)
    t = jnp.einsum('nhwc,ce->nhwe', x_nhwc.astype(cdt), w1f,
                   preferred_element_type=jnp.float32) + P['bn1b']
    t = _act(t, activation)
    t = t.astype(tap_dtype).astype(jnp.float32)   # mirror kernel tap storage
    Ce = t.shape[-1]

    w2f = (P['w2'] * P['bn2s'].reshape(1, 1, -1)).astype(jnp.float32)
    tp = jnp.pad(t, ((0, 0), (p, p), (p, p), (0, 0)))
    dw = jnp.zeros((N, Ho, Wo, Ce), jnp.float32)
    for kj in range(K):
        for ki in range(K):
            sl = tp[:, ki:ki + (Ho - 1) * stride + 1:stride,
                    kj:kj + (Wo - 1) * stride + 1:stride, :]
            dw = dw + sl * w2f[ki, kj]
    dw = _act(dw + P['bn2b'], activation)

    w3f = (P['w3'] * P['bn3s']).astype(cdt)
    o = jnp.einsum('nhwc,co->nhwo', dw.astype(cdt), w3f,
                   preferred_element_type=jnp.float32) + P['bn3b']

    if use_se:
        wse1f = (P['wse1'] * P['bnse1s']).astype(cdt)
        wse2f = (P['wse2'] * P['bnse2s']).astype(cdt)
        s = jnp.mean(o, axis=(1, 2))                            # (N, Cout)
        s1 = jnp.dot(s.astype(cdt), wse1f,
                     preferred_element_type=jnp.float32)
        s1 = jnp.maximum(s1 + P['bnse1b'], 0.0)
        s2 = jnp.dot(s1.astype(cdt), wse2f,
                     preferred_element_type=jnp.float32) + P['bnse2b']
        gate = jnp.clip(s2 + 3.0, 0.0, 6.0) * (1.0 / 6.0)
        o = o * gate[:, None, None, :]

    if sc_mode == 2:
        wscf = (P['wsc'] * P['bnscs']).astype(cdt)
        sc = jnp.einsum('nhwc,co->nhwo', x_nhwc.astype(cdt), wscf,
                        preferred_element_type=jnp.float32) + P['bnscb']
        o = o + sc
    elif sc_mode == 1:
        o = o + x_nhwc
    return o


if __name__ == "__main__":
    key = jax.random.PRNGKey(0)
    cdt = jnp.bfloat16
    tap_dt = _default_tap_dtype()

    def run_case(name, *, N, Cin, H, W, Ce, Cout, K, stride, use_se,
                 activation, batch_tile, kx, kp):
        x_nchw = jax.random.normal(kx, (N, Cin, H, W), jnp.float32)
        P = make_params(kp, Cin, Ce, Cout, K)
        out = mobilenetv3_block(x_nchw, P, kernel_size=K, stride=stride,
                                use_se=use_se, activation=activation,
                                batch_tile=batch_tile, compute_dtype=cdt,
                                tap_dtype=tap_dt)
        out = jax.block_until_ready(out)
        sc_mode = 0 if stride != 1 else (1 if Cin == Cout else 2)
        ref = ref_block(jnp.transpose(x_nchw, (0, 2, 3, 1)), P, K=K,
                        stride=stride, use_se=use_se, sc_mode=sc_mode,
                        activation=activation, compute_dtype=cdt,
                        tap_dtype=tap_dt)
        ref_nchw = jnp.transpose(ref, (0, 3, 1, 2))
        p = K // 2
        Ho = (H + 2 * p - K) // stride + 1
        Wo = (W + 2 * p - K) // stride + 1
        assert out.shape == (N, Cout, Ho, Wo), (name, out.shape)
        err = float(jnp.max(jnp.abs(out - ref_nchw)))
        assert jnp.allclose(out, ref_nchw, rtol=2e-3, atol=2e-3), (name, err)

    k1, k2, k3, k4 = jax.random.split(key, 4)
    # Block(3, in=4, expand=8, out=8, ReLU, SE, stride=1) -> 1x1-conv shortcut.
    # batch_tile=1 keeps the "parallel" batch grid at >= 2 steps (v7x: 2 TCs).
    run_case("se_conv_shortcut", N=2, Cin=4, H=16, W=16, Ce=8, Cout=8, K=3,
             stride=1, use_se=True, activation="relu", batch_tile=1,
             kx=k1, kp=k2)
    # Block(3, in=8, expand=16, out=8, hswish, no SE, stride=1) -> identity
    # shortcut (exercises the padded-input identity path and conditional args).
    run_case("identity_shortcut", N=2, Cin=8, H=16, W=16, Ce=16, Cout=8, K=3,
             stride=1, use_se=False, activation="hswish", batch_tile=1,
             kx=k3, kp=k4)

    print("KERNEL_OK")
</pallas_src>

<mosaic_0001>
module attributes {stable_mosaic.version = 11 : i64} {
  func.func @block_kernel(%arg0: i32, %arg1: memref<1x256x4xf32, #tpu.memory_space<vmem>>, %arg2: memref<4x128xbf16, #tpu.memory_space<vmem>>, %arg3: memref<1x128xf32, #tpu.memory_space<vmem>>, %arg4: memref<3x3x128xf32, #tpu.memory_space<vmem>>, %arg5: memref<1x128xf32, #tpu.memory_space<vmem>>, %arg6: memref<128x128xbf16, #tpu.memory_space<vmem>>, %arg7: memref<1x128xf32, #tpu.memory_space<vmem>>, %arg8: memref<128x128xbf16, #tpu.memory_space<vmem>>, %arg9: memref<1x128xf32, #tpu.memory_space<vmem>>, %arg10: memref<128x128xbf16, #tpu.memory_space<vmem>>, %arg11: memref<1x128xf32, #tpu.memory_space<vmem>>, %arg12: memref<4x128xbf16, #tpu.memory_space<vmem>>, %arg13: memref<1x128xf32, #tpu.memory_space<vmem>>, %arg14: memref<1x256x128xf32, #tpu.memory_space<vmem>>, %arg15: memref<1x304x128xf32, #tpu.memory_space<vmem>>) attributes {dimension_semantics = [#tpu.dimension_semantics<parallel>], iteration_bounds = array<i64: 2>, scalar_prefetch = 0 : i64, scratch_operands = 1 : i64, tpu.core_type = #tpu.core_type<tc>, window_params = [{transform_indices = @transform_0, window_bounds = array<i64: 1, 256, 4>}, {pipeline_mode = #tpu.pipeline_mode<synchronous>, transform_indices = @transform_1, window_bounds = array<i64: 4, 128>}, {pipeline_mode = #tpu.pipeline_mode<synchronous>, transform_indices = @transform_2, window_bounds = array<i64: 1, 128>}, {pipeline_mode = #tpu.pipeline_mode<synchronous>, transform_indices = @transform_3, window_bounds = array<i64: 3, 3, 128>}, {pipeline_mode = #tpu.pipeline_mode<synchronous>, transform_indices = @transform_4, window_bounds = array<i64: 1, 128>}, {pipeline_mode = #tpu.pipeline_mode<synchronous>, transform_indices = @transform_5, window_bounds = array<i64: 128, 128>}, {pipeline_mode = #tpu.pipeline_mode<synchronous>, transform_indices = @transform_6, window_bounds = array<i64: 1, 128>}, {pipeline_mode = #tpu.pipeline_mode<synchronous>, transform_indices = @transform_7, window_bounds = array<i64: 128, 128>}, {pipeline_mode = #tpu.pipeline_mode<synchronous>, transform_indices = @transform_8, window_bounds = array<i64: 1, 128>}, {pipeline_mode = #tpu.pipeline_mode<synchronous>, transform_indices = @transform_9, window_bounds = array<i64: 128, 128>}, {pipeline_mode = #tpu.pipeline_mode<synchronous>, transform_indices = @transform_10, window_bounds = array<i64: 1, 128>}, {pipeline_mode = #tpu.pipeline_mode<synchronous>, transform_indices = @transform_11, window_bounds = array<i64: 4, 128>}, {pipeline_mode = #tpu.pipeline_mode<synchronous>, transform_indices = @transform_12, window_bounds = array<i64: 1, 128>}, {transform_indices = @transform_13, window_bounds = array<i64: 1, 256, 128>}]} {
    %c0 = arith.constant 0 : index
    %c0_0 = arith.constant 0 : index
    %c0_1 = arith.constant 0 : index
    %0 = vector.load %arg1[%c0, %c0_0, %c0_1] : memref<1x256x4xf32, #tpu.memory_space<vmem>>, vector<1x256x4xf32>
    %1 = vector.shape_cast %0 : vector<1x256x4xf32> to vector<256x4xf32>
    %2 = arith.truncf %1 : vector<256x4xf32> to vector<256x4xbf16>
    %c0_2 = arith.constant 0 : index
    %c0_3 = arith.constant 0 : index
    %3 = vector.load %arg2[%c0_2, %c0_3] : memref<4x128xbf16, #tpu.memory_space<vmem>>, vector<4x128xbf16>
    %cst = arith.constant dense<0.000000e+00> : vector<256x128xf32>
    %4 = tpu.matmul %2, %3, %cst {dimension_numbers = #tpu.dot_dimension_numbers<[1], [0], [0], [1], [0, 0, 1, 1], [], []>} : vector<256x4xbf16>, vector<4x128xbf16>, vector<256x128xf32> -> vector<256x128xf32>
    %c0_4 = arith.constant 0 : index
    %c0_5 = arith.constant 0 : index
    %5 = vector.load %arg3[%c0_4, %c0_5] : memref<1x128xf32, #tpu.memory_space<vmem>>, vector<1x128xf32>
    %6 = vector.broadcast %5 : vector<1x128xf32> to vector<256x128xf32>
    %7 = arith.addf %4, %6 : vector<256x128xf32>
    %cst_6 = arith.constant 0.000000e+00 : f32
    %8 = vector.broadcast %cst_6 : f32 to vector<256x128xf32>
    %9 = arith.maximumf %7, %8 : vector<256x128xf32>
    %c0_7 = arith.constant 0 : index
    %c0_8 = arith.constant 0 : index
    %c0_9 = arith.constant 0 : index
    %10 = vector.load %arg4[%c0_7, %c0_8, %c0_9] : memref<3x3x128xf32, #tpu.memory_space<vmem>>, vector<3x3x128xf32>
    %cst_10 = arith.constant 0.000000e+00 : f32
    %11 = vector.broadcast %cst_10 : f32 to vector<1x24x128xf32>
    %c0_11 = arith.constant 0 : index
    %c0_12 = arith.constant 0 : index
    %c0_13 = arith.constant 0 : index
    %12 = vector.load %arg15[%c0_11, %c0_12, %c0_13] : memref<1x304x128xf32, #tpu.memory_space<vmem>>, vector<1x24x128xf32>
    tpu.vector_store %arg15[%c0_11, %c0_12, %c0_13], %11 {strides = array<i32>} : memref<1x304x128xf32, #tpu.memory_space<vmem>>, vector<1x24x128xf32>,
    %cst_14 = arith.constant 0.000000e+00 : f32
    %13 = vector.broadcast %cst_14 : f32 to vector<1x24x128xf32>
    %c0_15 = arith.constant 0 : index
    %c280 = arith.constant 280 : index
    %c0_16 = arith.constant 0 : index
    %14 = vector.load %arg15[%c0_15, %c280, %c0_16] : memref<1x304x128xf32, #tpu.memory_space<vmem>>, vector<1x24x128xf32>
    tpu.vector_store %arg15[%c0_15, %c280, %c0_16], %13 {strides = array<i32>} : memref<1x304x128xf32, #tpu.memory_space<vmem>>, vector<1x24x128xf32>,
    %15 = vector.shape_cast %9 : vector<256x128xf32> to vector<1x256x128xf32>
    %c0_17 = arith.constant 0 : index
    %c24 = arith.constant 24 : index
    %c0_18 = arith.constant 0 : index
    %16 = vector.load %arg15[%c0_17, %c24, %c0_18] : memref<1x304x128xf32, #tpu.memory_space<vmem>>, vector<1x256x128xf32>
    tpu.vector_store %arg15[%c0_17, %c24, %c0_18], %15 {strides = array<i32>} : memref<1x304x128xf32, #tpu.memory_space<vmem>>, vector<1x256x128xf32>,
    %17 = tpu.iota {dimensions = array<i32: 0>} : vector<288x1xi32>
    %c16_i32 = arith.constant 16 : i32
    %c0_i32 = arith.constant 0 : i32
    %18 = arith.cmpi eq, %c16_i32, %c0_i32 : i32
    %c1_i32 = arith.constant 1 : i32
    %19 = arith.select %18, %c1_i32, %c16_i32 : i32
    %20 = vector.broadcast %19 : i32 to vector<288x1xi32>
    %21 = arith.remsi %17, %20 : vector<288x1xi32>
    %c0_i32_19 = arith.constant 0 : i32
    %22 = vector.broadcast %c0_i32_19 : i32 to vector<288x1xi32>
    %23 = arith.cmpi ne, %21, %22 : vector<288x1xi32>
    %c0_i32_20 = arith.constant 0 : i32
    %24 = vector.broadcast %c0_i32_20 : i32 to vector<288x1xi32>
    %25 = arith.cmpi slt, %21, %24 : vector<288x1xi32>
    %c0_i32_21 = arith.constant 0 : i32
    %26 = arith.cmpi slt, %19, %c0_i32_21 : i32
    %27 = vector.broadcast %26 : i1 to vector<288x1xi1>
    %28 = vector.broadcast %27 : vector<288x1xi1> to vector<288x1xi1>
    %29 = arith.xori %25, %28 : vector<288x1xi1>
    %30 = arith.andi %29, %23 : vector<288x1xi1>
    %31 = vector.broadcast %19 : i32 to vector<288x1xi32>
    %32 = arith.addi %21, %31 : vector<288x1xi32>
    %33 = arith.select %30, %32, %21 : vector<288x1xi1>, vector<288x1xi32>
    %cst_22 = arith.constant 0.000000e+00 : f32
    %34 = vector.broadcast %cst_22 : f32 to vector<1x256x128xf32>
    %c0_23 = arith.constant 0 : index
    %c7 = arith.constant 7 : index
    %c0_24 = arith.constant 0 : index
    %35 = vector.load %arg15[%c0_23, %c7, %c0_24] : memref<1x304x128xf32, #tpu.memory_space<vmem>>, vector<1x288x128xf32>
    %c-1_i32 = arith.constant -1 : i32
    %36 = vector.broadcast %c-1_i32 : i32 to vector<288x1xi32>
    %37 = arith.addi %33, %36 : vector<288x1xi32>
    %c0_i32_25 = arith.constant 0 : i32
    %38 = vector.broadcast %c0_i32_25 : i32 to vector<288x1xi32>
    %39 = arith.cmpi sge, %37, %38 : vector<288x1xi32>
    %c-1_i32_26 = arith.constant -1 : i32
    %40 = vector.broadcast %c-1_i32_26 : i32 to vector<288x1xi32>
    %41 = arith.addi %33, %40 : vector<288x1xi32>
    %c16_i32_27 = arith.constant 16 : i32
    %42 = vector.broadcast %c16_i32_27 : i32 to vector<288x1xi32>
    %43 = arith.cmpi slt, %41, %42 : vector<288x1xi32>
    %44 = arith.andi %39, %43 : vector<288x1xi1>
    %cst_28 = arith.constant 0.000000e+00 : f32
    %45 = vector.shape_cast %44 : vector<288x1xi1> to vector<1x288x1xi1>
    %46 = vector.broadcast %45 : vector<1x288x1xi1> to vector<1x288x128xi1>
    %47 = vector.broadcast %cst_28 : f32 to vector<1x288x128xf32>
    %48 = arith.select %46, %35, %47 : vector<1x288x128xi1>, vector<1x288x128xf32>
    %49 = vector.extract_strided_slice %48 {offsets = [0, 0, 0], sizes = [1, 256, 128], strides = [1, 1, 1]} : vector<1x288x128xf32> to vector<1x256x128xf32>
    %50 = vector.extract_strided_slice %10 {offsets = [0, 0, 0], sizes = [1, 1, 128], strides = [1, 1, 1]} : vector<3x3x128xf32> to vector<1x1x128xf32>
    %51 = vector.shape_cast %50 : vector<1x1x128xf32> to vector<128xf32>
    %52 = vector.shape_cast %51 : vector<128xf32> to vector<1x1x128xf32>
    %53 = vector.broadcast %52 : vector<1x1x128xf32> to vector<1x256x128xf32>
    %54 = arith.mulf %49, %53 : vector<1x256x128xf32>
    %55 = arith.addf %34, %54 : vector<1x256x128xf32>
    %56 = vector.extract_strided_slice %48 {offsets = [0, 16, 0], sizes = [1, 256, 128], strides = [1, 1, 1]} : vector<1x288x128xf32> to vector<1x256x128xf32>
    %57 = vector.extract_strided_slice %10 {offsets = [1, 0, 0], sizes = [1, 1, 128], strides = [1, 1, 1]} : vector<3x3x128xf32> to vector<1x1x128xf32>
    %58 = vector.shape_cast %57 : vector<1x1x128xf32> to vector<128xf32>
    %59 = vector.shape_cast %58 : vector<128xf32> to vector<1x1x128xf32>
    %60 = vector.broadcast %59 : vector<1x1x128xf32> to vector<1x256x128xf32>
    %61 = arith.mulf %56, %60 : vector<1x256x128xf32>
    %62 = arith.addf %55, %61 : vector<1x256x128xf32>
    %63 = vector.extract_strided_slice %48 {offsets = [0, 32, 0], sizes = [1, 256, 128], strides = [1, 1, 1]} : vector<1x288x128xf32> to vector<1x256x128xf32>
    %64 = vector.extract_strided_slice %10 {offsets = [2, 0, 0], sizes = [1, 1, 128], strides = [1, 1, 1]} : vector<3x3x128xf32> to vector<1x1x128xf32>
    %65 = vector.shape_cast %64 : vector<1x1x128xf32> to vector<128xf32>
    %66 = vector.shape_cast %65 : vector<128xf32> to vector<1x1x128xf32>
    %67 = vector.broadcast %66 : vector<1x1x128xf32> to vector<1x256x128xf32>
    %68 = arith.mulf %63, %67 : vector<1x256x128xf32>
    %69 = arith.addf %62, %68 : vector<1x256x128xf32>
    %c0_29 = arith.constant 0 : index
    %c8 = arith.constant 8 : index
    %c0_30 = arith.constant 0 : index
    %70 = vector.load %arg15[%c0_29, %c8, %c0_30] : memref<1x304x128xf32, #tpu.memory_space<vmem>>, vector<1x288x128xf32>
    %71 = vector.extract_strided_slice %70 {offsets = [0, 0, 0], sizes = [1, 256, 128], strides = [1, 1, 1]} : vector<1x288x128xf32> to vector<1x256x128xf32>
    %72 = vector.extract_strided_slice %10 {offsets = [0, 1, 0], sizes = [1, 1, 128], strides = [1, 1, 1]} : vector<3x3x128xf32> to vector<1x1x128xf32>
    %73 = vector.shape_cast %72 : vector<1x1x128xf32> to vector<128xf32>
    %74 = vector.shape_cast %73 : vector<128xf32> to vector<1x1x128xf32>
    %75 = vector.broadcast %74 : vector<1x1x128xf32> to vector<1x256x128xf32>
    %76 = arith.mulf %71, %75 : vector<1x256x128xf32>
    %77 = arith.addf %69, %76 : vector<1x256x128xf32>
    %78 = vector.extract_strided_slice %70 {offsets = [0, 16, 0], sizes = [1, 256, 128], strides = [1, 1, 1]} : vector<1x288x128xf32> to vector<1x256x128xf32>
    %79 = vector.extract_strided_slice %10 {offsets = [1, 1, 0], sizes = [1, 1, 128], strides = [1, 1, 1]} : vector<3x3x128xf32> to vector<1x1x128xf32>
    %80 = vector.shape_cast %79 : vector<1x1x128xf32> to vector<128xf32>
    %81 = vector.shape_cast %80 : vector<128xf32> to vector<1x1x128xf32>
    %82 = vector.broadcast %81 : vector<1x1x128xf32> to vector<1x256x128xf32>
    %83 = arith.mulf %78, %82 : vector<1x256x128xf32>
    %84 = arith.addf %77, %83 : vector<1x256x128xf32>
    %85 = vector.extract_strided_slice %70 {offsets = [0, 32, 0], sizes = [1, 256, 128], strides = [1, 1, 1]} : vector<1x288x128xf32> to vector<1x256x128xf32>
    %86 = vector.extract_strided_slice %10 {offsets = [2, 1, 0], sizes = [1, 1, 128], strides = [1, 1, 1]} : vector<3x3x128xf32> to vector<1x1x128xf32>
    %87 = vector.shape_cast %86 : vector<1x1x128xf32> to vector<128xf32>
    %88 = vector.shape_cast %87 : vector<128xf32> to vector<1x1x128xf32>
    %89 = vector.broadcast %88 : vector<1x1x128xf32> to vector<1x256x128xf32>
    %90 = arith.mulf %85, %89 : vector<1x256x128xf32>
    %91 = arith.addf %84, %90 : vector<1x256x128xf32>
    %c0_31 = arith.constant 0 : index
    %c9 = arith.constant 9 : index
    %c0_32 = arith.constant 0 : index
    %92 = vector.load %arg15[%c0_31, %c9, %c0_32] : memref<1x304x128xf32, #tpu.memory_space<vmem>>, vector<1x288x128xf32>
    %c1_i32_33 = arith.constant 1 : i32
    %93 = vector.broadcast %c1_i32_33 : i32 to vector<288x1xi32>
    %94 = arith.addi %33, %93 : vector<288x1xi32>
    %c0_i32_34 = arith.constant 0 : i32
    %95 = vector.broadcast %c0_i32_34 : i32 to vector<288x1xi32>
    %96 = arith.cmpi sge, %94, %95 : vector<288x1xi32>
    %c1_i32_35 = arith.constant 1 : i32
    %97 = vector.broadcast %c1_i32_35 : i32 to vector<288x1xi32>
    %98 = arith.addi %33, %97 : vector<288x1xi32>
    %c16_i32_36 = arith.constant 16 : i32
    %99 = vector.broadcast %c16_i32_36 : i32 to vector<288x1xi32>
    %100 = arith.cmpi slt, %98, %99 : vector<288x1xi32>
    %101 = arith.andi %96, %100 : vector<288x1xi1>
    %cst_37 = arith.constant 0.000000e+00 : f32
    %102 = vector.shape_cast %101 : vector<288x1xi1> to vector<1x288x1xi1>
    %103 = vector.broadcast %102 : vector<1x288x1xi1> to vector<1x288x128xi1>
    %104 = vector.broadcast %cst_37 : f32 to vector<1x288x128xf32>
    %105 = arith.select %103, %92, %104 : vector<1x288x128xi1>, vector<1x288x128xf32>
    %106 = vector.extract_strided_slice %105 {offsets = [0, 0, 0], sizes = [1, 256, 128], strides = [1, 1, 1]} : vector<1x288x128xf32> to vector<1x256x128xf32>
    %107 = vector.extract_strided_slice %10 {offsets = [0, 2, 0], sizes = [1, 1, 128], strides = [1, 1, 1]} : vector<3x3x128xf32> to vector<1x1x128xf32>
    %108 = vector.shape_cast %107 : vector<1x1x128xf32> to vector<128xf32>
    %109 = vector.shape_cast %108 : vector<128xf32> to vector<1x1x128xf32>
    %110 = vector.broadcast %109 : vector<1x1x128xf32> to vector<1x256x128xf32>
    %111 = arith.mulf %106, %110 : vector<1x256x128xf32>
    %112 = arith.addf %91, %111 : vector<1x256x128xf32>
    %113 = vector.extract_strided_slice %105 {offsets = [0, 16, 0], sizes = [1, 256, 128], strides = [1, 1, 1]} : vector<1x288x128xf32> to vector<1x256x128xf32>
    %114 = vector.extract_strided_slice %10 {offsets = [1, 2, 0], sizes = [1, 1, 128], strides = [1, 1, 1]} : vector<3x3x128xf32> to vector<1x1x128xf32>
    %115 = vector.shape_cast %114 : vector<1x1x128xf32> to vector<128xf32>
    %116 = vector.shape_cast %115 : vector<128xf32> to vector<1x1x128xf32>
    %117 = vector.broadcast %116 : vector<1x1x128xf32> to vector<1x256x128xf32>
    %118 = arith.mulf %113, %117 : vector<1x256x128xf32>
    %119 = arith.addf %112, %118 : vector<1x256x128xf32>
    %120 = vector.extract_strided_slice %105 {offsets = [0, 32, 0], sizes = [1, 256, 128], strides = [1, 1, 1]} : vector<1x288x128xf32> to vector<1x256x128xf32>
    %121 = vector.extract_strided_slice %10 {offsets = [2, 2, 0], sizes = [1, 1, 128], strides = [1, 1, 1]} : vector<3x3x128xf32> to vector<1x1x128xf32>
    %122 = vector.shape_cast %121 : vector<1x1x128xf32> to vector<128xf32>
    %123 = vector.shape_cast %122 : vector<128xf32> to vector<1x1x128xf32>
    %124 = vector.broadcast %123 : vector<1x1x128xf32> to vector<1x256x128xf32>
    %125 = arith.mulf %120, %124 : vector<1x256x128xf32>
    %126 = arith.addf %119, %125 : vector<1x256x128xf32>
    %127 = vector.shape_cast %126 : vector<1x256x128xf32> to vector<256x128xf32>
    %c0_38 = arith.constant 0 : index
    %c0_39 = arith.constant 0 : index
    %128 = vector.load %arg5[%c0_38, %c0_39] : memref<1x128xf32, #tpu.memory_space<vmem>>, vector<1x128xf32>
    %129 = vector.broadcast %128 : vector<1x128xf32> to vector<256x128xf32>
    %130 = arith.addf %127, %129 : vector<256x128xf32>
    %cst_40 = arith.constant 0.000000e+00 : f32
    %131 = vector.broadcast %cst_40 : f32 to vector<256x128xf32>
    %132 = arith.maximumf %130, %131 : vector<256x128xf32>
    %133 = arith.truncf %132 : vector<256x128xf32> to vector<256x128xbf16>
    %c0_41 = arith.constant 0 : index
    %c0_42 = arith.constant 0 : index
    %134 = vector.load %arg6[%c0_41, %c0_42] : memref<128x128xbf16, #tpu.memory_space<vmem>>, vector<128x128xbf16>
    %cst_43 = arith.constant dense<0.000000e+00> : vector<256x128xf32>
    %135 = tpu.matmul %133, %134, %cst_43 {dimension_numbers = #tpu.dot_dimension_numbers<[1], [0], [0], [1], [0, 0, 1, 1], [], []>} : vector<256x128xbf16>, vector<128x128xbf16>, vector<256x128xf32> -> vector<256x128xf32>
    %c0_44 = arith.constant 0 : index
    %c0_45 = arith.constant 0 : index
    %136 = vector.load %arg7[%c0_44, %c0_45] : memref<1x128xf32, #tpu.memory_space<vmem>>, vector<1x128xf32>
    %137 = vector.broadcast %136 : vector<1x128xf32> to vector<256x128xf32>
    %138 = arith.addf %135, %137 : vector<256x128xf32>
    %139 = vector.shape_cast %138 : vector<256x128xf32> to vector<1x256x128xf32>
    %cst_46 = arith.constant dense<0.000000e+00> : vector<1x128xf32>
    %140 = vector.multi_reduction <add>, %139, %cst_46 [1] : vector<1x256x128xf32> to vector<1x128xf32>
    %cst_47 = arith.constant 2.560000e+02 : f32
    %141 = vector.broadcast %cst_47 : f32 to vector<1x128xf32>
    %142 = arith.divf %140, %141 : vector<1x128xf32>
    %143 = arith.truncf %142 : vector<1x128xf32> to vector<1x128xbf16>
    %c0_48 = arith.constant 0 : index
    %c0_49 = arith.constant 0 : index
    %144 = vector.load %arg8[%c0_48, %c0_49] : memref<128x128xbf16, #tpu.memory_space<vmem>>, vector<128x128xbf16>
    %cst_50 = arith.constant dense<0.000000e+00> : vector<1x128xf32>
    %145 = tpu.matmul %143, %144, %cst_50 {dimension_numbers = #tpu.dot_dimension_numbers<[1], [0], [0], [1], [0, 0, 1, 1], [], []>} : vector<1x128xbf16>, vector<128x128xbf16>, vector<1x128xf32> -> vector<1x128xf32>
    %c0_51 = arith.constant 0 : index
    %c0_52 = arith.constant 0 : index
    %146 = vector.load %arg9[%c0_51, %c0_52] : memref<1x128xf32, #tpu.memory_space<vmem>>, vector<1x128xf32>
    %147 = arith.addf %145, %146 : vector<1x128xf32>
    %cst_53 = arith.constant 0.000000e+00 : f32
    %148 = vector.broadcast %cst_53 : f32 to vector<1x128xf32>
    %149 = arith.maximumf %147, %148 : vector<1x128xf32>
    %150 = arith.truncf %149 : vector<1x128xf32> to vector<1x128xbf16>
    %c0_54 = arith.constant 0 : index
    %c0_55 = arith.constant 0 : index
    %151 = vector.load %arg10[%c0_54, %c0_55] : memref<128x128xbf16, #tpu.memory_space<vmem>>, vector<128x128xbf16>
    %cst_56 = arith.constant dense<0.000000e+00> : vector<1x128xf32>
    %152 = tpu.matmul %150, %151, %cst_56 {dimension_numbers = #tpu.dot_dimension_numbers<[1], [0], [0], [1], [0, 0, 1, 1], [], []>} : vector<1x128xbf16>, vector<128x128xbf16>, vector<1x128xf32> -> vector<1x128xf32>
    %c0_57 = arith.constant 0 : index
    %c0_58 = arith.constant 0 : index
    %153 = vector.load %arg11[%c0_57, %c0_58] : memref<1x128xf32, #tpu.memory_space<vmem>>, vector<1x128xf32>
    %154 = arith.addf %152, %153 : vector<1x128xf32>
    %cst_59 = arith.constant 3.000000e+00 : f32
    %155 = vector.broadcast %cst_59 : f32 to vector<1x128xf32>
    %156 = arith.addf %154, %155 : vector<1x128xf32>
    %cst_60 = arith.constant 0.000000e+00 : f32
    %cst_61 = arith.constant 6.000000e+00 : f32
    %157 = vector.broadcast %cst_60 : f32 to vector<1x128xf32>
    %158 = arith.maximumf %157, %156 : vector<1x128xf32>
    %159 = vector.broadcast %cst_61 : f32 to vector<1x128xf32>
    %160 = arith.minimumf %159, %158 : vector<1x128xf32>
    %cst_62 = arith.constant 0.166666672 : f32
    %161 = vector.broadcast %cst_62 : f32 to vector<1x128xf32>
    %162 = arith.mulf %160, %161 : vector<1x128xf32>
    %163 = vector.shape_cast %162 : vector<1x128xf32> to vector<1x1x128xf32>
    %164 = vector.broadcast %163 : vector<1x1x128xf32> to vector<1x256x128xf32>
    %165 = arith.mulf %139, %164 : vector<1x256x128xf32>
    %166 = vector.shape_cast %165 : vector<1x256x128xf32> to vector<256x128xf32>
    %167 = arith.truncf %1 : vector<256x4xf32> to vector<256x4xbf16>
    %c0_63 = arith.constant 0 : index
    %c0_64 = arith.constant 0 : index
    %168 = vector.load %arg12[%c0_63, %c0_64] : memref<4x128xbf16, #tpu.memory_space<vmem>>, vector<4x128xbf16>
    %cst_65 = arith.constant dense<0.000000e+00> : vector<256x128xf32>
    %169 = tpu.matmul %167, %168, %cst_65 {dimension_numbers = #tpu.dot_dimension_numbers<[1], [0], [0], [1], [0, 0, 1, 1], [], []>} : vector<256x4xbf16>, vector<4x128xbf16>, vector<256x128xf32> -> vector<256x128xf32>
    %c0_66 = arith.constant 0 : index
    %c0_67 = arith.constant 0 : index
    %170 = vector.load %arg13[%c0_66, %c0_67] : memref<1x128xf32, #tpu.memory_space<vmem>>, vector<1x128xf32>
    %171 = vector.broadcast %170 : vector<1x128xf32> to vector<256x128xf32>
    %172 = arith.addf %169, %171 : vector<256x128xf32>
    %173 = arith.addf %166, %172 : vector<256x128xf32>
    %174 = vector.shape_cast %173 : vector<256x128xf32> to vector<1x256x128xf32>
    %c0_68 = arith.constant 0 : index
    %c0_69 = arith.constant 0 : index
    %c0_70 = arith.constant 0 : index
    %175 = vector.load %arg14[%c0_68, %c0_69, %c0_70] : memref<1x256x128xf32, #tpu.memory_space<vmem>>, vector<1x256x128xf32>
    tpu.vector_store %arg14[%c0_68, %c0_69, %c0_70], %174 {strides = array<i32>} : memref<1x256x128xf32, #tpu.memory_space<vmem>>, vector<1x256x128xf32>,
    return
  }
  func.func @transform_0(%arg0: i32) -> (i32, i32, i32) {
    %c0_i32 = arith.constant 0 : i32
    %c0_i32_0 = arith.constant 0 : i32
    %c0_i32_1 = arith.constant 0 : i32
    return %arg0, %c0_i32, %c0_i32_0 : i32, i32, i32
  }
  func.func @transform_1(%arg0: i32) -> (i32, i32) {
    %c0_i32 = arith.constant 0 : i32
    %c0_i32_0 = arith.constant 0 : i32
    %c0_i32_1 = arith.constant 0 : i32
    return %c0_i32, %c0_i32_0 : i32, i32
  }
  func.func @transform_2(%arg0: i32) -> (i32, i32) {
    %c0_i32 = arith.constant 0 : i32
    %c0_i32_0 = arith.constant 0 : i32
    %c0_i32_1 = arith.constant 0 : i32
    return %c0_i32, %c0_i32_0 : i32, i32
  }
  func.func @transform_3(%arg0: i32) -> (i32, i32, i32) {
    %c0_i32 = arith.constant 0 : i32
    %c0_i32_0 = arith.constant 0 : i32
    %c0_i32_1 = arith.constant 0 : i32
    %c0_i32_2 = arith.constant 0 : i32
    return %c0_i32, %c0_i32_0, %c0_i32_1 : i32, i32, i32
  }
  func.func @transform_4(%arg0: i32) -> (i32, i32) {
    %c0_i32 = arith.constant 0 : i32
    %c0_i32_0 = arith.constant 0 : i32
    %c0_i32_1 = arith.constant 0 : i32
    return %c0_i32, %c0_i32_0 : i32, i32
  }
  func.func @transform_5(%arg0: i32) -> (i32, i32) {
    %c0_i32 = arith.constant 0 : i32
    %c0_i32_0 = arith.constant 0 : i32
    %c0_i32_1 = arith.constant 0 : i32
    return %c0_i32, %c0_i32_0 : i32, i32
  }
  func.func @transform_6(%arg0: i32) -> (i32, i32) {
    %c0_i32 = arith.constant 0 : i32
    %c0_i32_0 = arith.constant 0 : i32
    %c0_i32_1 = arith.constant 0 : i32
    return %c0_i32, %c0_i32_0 : i32, i32
  }
  func.func @transform_7(%arg0: i32) -> (i32, i32) {
    %c0_i32 = arith.constant 0 : i32
    %c0_i32_0 = arith.constant 0 : i32
    %c0_i32_1 = arith.constant 0 : i32
    return %c0_i32, %c0_i32_0 : i32, i32
  }
  func.func @transform_8(%arg0: i32) -> (i32, i32) {
    %c0_i32 = arith.constant 0 : i32
    %c0_i32_0 = arith.constant 0 : i32
    %c0_i32_1 = arith.constant 0 : i32
    return %c0_i32, %c0_i32_0 : i32, i32
  }
  func.func @transform_9(%arg0: i32) -> (i32, i32) {
    %c0_i32 = arith.constant 0 : i32
    %c0_i32_0 = arith.constant 0 : i32
    %c0_i32_1 = arith.constant 0 : i32
    return %c0_i32, %c0_i32_0 : i32, i32
  }
  func.func @transform_10(%arg0: i32) -> (i32, i32) {
    %c0_i32 = arith.constant 0 : i32
    %c0_i32_0 = arith.constant 0 : i32
    %c0_i32_1 = arith.constant 0 : i32
    return %c0_i32, %c0_i32_0 : i32, i32
  }
  func.func @transform_11(%arg0: i32) -> (i32, i32) {
    %c0_i32 = arith.constant 0 : i32
    %c0_i32_0 = arith.constant 0 : i32
    %c0_i32_1 = arith.constant 0 : i32
    return %c0_i32, %c0_i32_0 : i32, i32
  }
  func.func @transform_12(%arg0: i32) -> (i32, i32) {
    %c0_i32 = arith.constant 0 : i32
    %c0_i32_0 = arith.constant 0 : i32
    %c0_i32_1 = arith.constant 0 : i32
    return %c0_i32, %c0_i32_0 : i32, i32
  }
  func.func @transform_13(%arg0: i32) -> (i32, i32, i32) {
    %c0_i32 = arith.constant 0 : i32
    %c0_i32_0 = arith.constant 0 : i32
    %c0_i32_1 = arith.constant 0 : i32
    return %arg0, %c0_i32, %c0_i32_0 : i32, i32, i32
  }
}

</mosaic_0001>

<bundles_post_ra>
// kernel: tpu_custom_call.1
= control target key start
LH: loop header
LB: loop body
LE: loop exit
PB: predicated region body
PF: predicated region fallthrough
CT: control target
= control target key end

     0   :  { %s5636_s0 = inlined_call_operand.vmem [shape: f32[2,256,4], index: 0, kind: input, shape index: {}]   ;;  %s5637_s1 = inlined_call_operand.vmem [shape: bf16[4,128], index: 1, kind: input, shape index: {}]   ;;  %s5638_s2 = inlined_call_operand.vmem [shape: f32[1,128], index: 2, kind: input, shape index: {}]   ;;  %s5639_s3 = inlined_call_operand.vmem [shape: f32[3,3,128], index: 3, kind: input, shape index: {}]   ;;  %s5640_s4 = inlined_call_operand.vmem [shape: f32[1,128], index: 4, kind: input, shape index: {}]   ;;  %s5641_s5 = inlined_call_operand.vmem [shape: bf16[128,128], index: 5, kind: input, shape index: {}]   ;;  %s5642_s6 = inlined_call_operand.vmem [shape: f32[1,128], index: 6, kind: input, shape index: {}]   ;;  %s5643_s7 = inlined_call_operand.vmem [shape: bf16[128,128], index: 7, kind: input, shape index: {}]   ;;  %s5644_s8 = inlined_call_operand.vmem [shape: f32[1,128], index: 8, kind: input, shape index: {}]   ;;  %s5645_s9 = inlined_call_operand.vmem [shape: bf16[128,128], index: 9, kind: input, shape index: {}]   ;;  %s5646_s10 = inlined_call_operand.vmem [shape: f32[1,128], index: 10, kind: input, shape index: {}]   ;;  %s5647_s11 = inlined_call_operand.vmem [shape: bf16[4,128], index: 11, kind: input, shape index: {}]   ;;  %s5648_s12 = inlined_call_operand.vmem [shape: f32[1,128], index: 12, kind: input, shape index: {}]   ;;  %s5649_s13 = inlined_call_operand.hbm [shape: f32[2,256,128], index: 13, kind: output, shape index: {}]  }
   0x1   :  { %5708 = sst [smem:[#allocation46_spill]] %s5636_s0 }
   0x2   :  { %5709 = sst [smem:[#allocation47_spill]] %s5637_s1 }
   0x3   :  { %18 = vsyncpa [#allocation4], 0 }
   0x4   :  { %20 = vsyncpa [#allocation4 + $0x1], 0  ;;  %s3918_s25 = smov 0   ;;  %s3920_s26 = smov 0  }
   0x5   :  { %s3922_s27 = smov 0   ;;  %s3924_s28 = smov 0  }
   0x6 LB: > { %s3939_s29 = sadd.s32 4294967295, %s3841_s28   ;;  %s3399_s30 = sadd.s32 4294967294, %s3841_s28   ;;  %s3841_s28 = sphi %s3924_s28, %s5852_s28   ;;  %s3837_s27 = sphi %s3922_s27, %s5851_s27   ;;  %s3833_s26 = sphi %s3920_s26, %s5850_s26   ;;  %s3829_s25 = sphi %s3918_s25, %s5849_s25  }
   0x7   : > { %s3943_s14 = sadd.s32 1, %s3841_s28   ;;  %s311_s15 = sadd.s32 1, %s3837_s27 }
   0x8   : > { %s308_s16 = ssub.s32 %s3841_s28, %s3943_s14  ;;  %p321_p0 = scmp.ne.s32.totalorder %s3837_s27, %s3833_s26 }
   0x9   : > { %p309_p1 = scmp.eq.s32.totalorder %s308_s16, 0  ;;  %p322_p2 = scmp.eq.s32.totalorder %s3939_s29, 1 }
   0xa   : > { %p327_p3 = scmp.ne.s32.totalorder %s3833_s26, %s3829_s25  ;;  %p328_p4 = scmp.eq.s32.totalorder %s3399_s30, 1 }
   0xb   : > { %s3954_s17 = scalar_select %p309_p1, %s3837_s27, %s311_s15  }
   0xc   : > { %p3956_p5 = por %p322_p2, %p321_p0  ;;  %p3960_p6 = por %p328_p4, %p327_p3 }
   0xd   : > { %p3402_p7 = scmp.ge.s32.totalorder %s3841_s28, 1  ;;  %p390_p8 = scmp.lt.s32.totalorder %s3841_s28, 3 }
   0xf   : > { %p391_p9 = pnand %p3402_p7, %p390_p8 }
  0x11   : > { %394 = sbr.rel (%p391_p9) target bundleno = 1177 (0x499), region = 72 }
  0x18   : > { %s5712_s1 = sld [smem:[#allocation47_spill]]  ;;  %vm545_vm0 = vcmask 1041408   ;;  %p434_p10 = scmp.lt.s32.totalorder %s3939_s29, 1  ;;  %vm496_vm1 = vcmask 31744   ;;  %v3843_v50 = vmov 0.0   ;;  %v3753_v51 = vld [vmem:[%s5641_s5] sm:$0xff]   ;;  %v783_v59 = vlaneseq }
  0x19   : > { %s5713_s0 = sld [smem:[#allocation46_spill]]  ;;  %745 = vst [vmem:[#allocation2] sm:$0xff] %v3843_v50  ;;  %746 = vst [vmem:[#allocation2 + $0x8] sm:$0xff] %v3843_v50  ;;  %v3754_v52 = vld [vmem:[%s5641_s5 + $0x8] sm:$0xff]   ;;  %v3755_v53 = vld [vmem:[%s5641_s5 + $0x10] sm:$0xff]   ;;  %s431_s30 = sand.u32 1, %s3833_s26  }
  0x1a   : > { %s435_s22 = scalar_select %p434_p10, %s3939_s29, 1  ;;  %747 = vst [vmem:[#allocation2 + $0x10] sm:$0xff] %v3843_v50  ;;  %748 = vst [vmem:[#allocation2 + $0x118] sm:$0xff] %v3843_v50  ;;  %v3756_v54 = vld [vmem:[%s5641_s5 + $0x18] sm:$0xff]   ;;  %v3757_v55 = vld [vmem:[%s5641_s5 + $0x20] sm:$0xff]   ;;  %v4099_v60 = vshrl.u32 %v783_v59, 7 }
  0x1b   : > { %749 = vst [vmem:[#allocation2 + $0x120] sm:$0xff] %v3843_v50  ;;  %750 = vst [vmem:[#allocation2 + $0x128] sm:$0xff] %v3843_v50  ;;  %v3758_v56 = vld [vmem:[%s5641_s5 + $0x28] sm:$0xff]   ;;  %v3759_v57 = vld [vmem:[%s5641_s5 + $0x30] sm:$0xff]   ;;  %s3472_s20 = sshll.u32 %s3939_s29, 12  ;;  %s5595_s24 = scalar_lea.sflag [#allocation4], %s431_s30 }
  0x1c   : > { %s3471_s23 = sshll.u32 %s435_s22, 8  ;;  %v3760_v58 = vld [vmem:[%s5641_s5 + $0x38] sm:$0xff]   ;;  %5730 = vst [vmem:[#allocation22_spill] sm:$0xff] %v4099_v60  ;;  %v824_v61 = vand.u32 15, %v4099_v60  ;;  %v786_v62 = vadd.s32 16, %v4099_v60 }
  0x1e   : > { %v488_v0 = vld [vmem:[%s5712_s1] sm:$0x3]  ;;  %v1288_v63 = vadd.s32 4294967295, %v824_v61 }
  0x1f   : > { %3707 = vmatprep.subr.msk.bf16.mxu0 %vm545_vm0, %v488_v0  ;;  %v547_v1 = vsel %vm545_vm0, %v488_v0, 0  ;;  %3708 = vmatprep.subr.msk.bf16.mxu1 %vm545_vm0, %v488_v0  ;;  %s3977_s15 = scalar_lea.vmem %s5713_s0, %s3471_s23  ;;  %v788_v0 = vadd.s32 32, %v4099_v60  ;;  %s5572_s23 = scalar_lea.hbm %s5649_s13, %s3472_s20 }
  0x20   : > { %3550 = vmatpush3.bf16.msra.mxu0 %v547_v1  ;;  %3706 = vmatpush3.bf16.msra.mxu1 %v547_v1  ;;  %v440_v2 = vld [vmem:[%s3977_s15] sm:$0xff]  ;;  %v441_v3 = vld [vmem:[%s3977_s15 + $0x8] sm:$0xff]  ;;  %v442_v4 = vld [vmem:[%s3977_s15 + $0x10] sm:$0xff]  ;;  %vm1324_vm2 = vcmp.ge.s32.totalorder %v1288_v63, 0  ;;  %v796_v63 = vadd.s32 96, %v4099_v60  ;;  %s3845_s20 = smov [#allocation3]  }
  0x21   : > { %v3982_v5 = vpack.c.bf16 %v441_v3, %v440_v2  ;;  %v443_v6 = vld [vmem:[%s3977_s15 + $0x18] sm:$0xff]  ;;  %v444_v7 = vld [vmem:[%s3977_s15 + $0x20] sm:$0xff]  ;;  %v445_v8 = vld [vmem:[%s3977_s15 + $0x28] sm:$0xff]  ;;  %3631 = vmatprep.subr.bf16.mxu0 %v3843_v50  ;;  %3583 = vmatprep.subr.bf16.mxu1 %v3753_v51  ;;  %v4108_v2 = vsub.s32 0, %v4099_v60  ;;  %v1782_v3 = vsub.s32 1, %v4099_v60  ;;  %s3783_s29 = sshll.u32 %s3845_s20, 4  ;;  %s3784_s29 = int_to_ptr.vmem [resolvable:$false] %s3783_s29 }
  0x22   : > { %v3987_v9 = vpack.c.bf16 %v443_v6, %v442_v4  ;;  %v3989_v10 = vpack.c.bf16 %v445_v8, %v444_v7  ;;  %v456_v11 = vld [vmem:[%s3977_s15 + $0x80] sm:$0xff]  ;;  %v457_v12 = vld [vmem:[%s3977_s15 + $0x88] sm:$0xff]  ;;  %v458_v13 = vld [vmem:[%s3977_s15 + $0x90] sm:$0xff]  ;;  %v785_v7 = vadd.s32 8, %v4099_v60  ;;  %v790_v8 = vadd.s32 48, %v4099_v60  ;;  %s3785_s22 = scalar_lea.vmem %s3784_s29, 8192 }
  0x23   : > { %5714 = vst [vmem:[#allocation6_spill] sm:$0xff] %v3982_v5  ;;  %3551 = vmatprep.mubr.msk.bf16.mxu0 %vm496_vm1, %v3982_v5  ;;  %v459_v14 = vld [vmem:[%s3977_s15 + $0x98] sm:$0xff]  ;;  %v446_v15 = vld [vmem:[%s3977_s15 + $0x30] sm:$0xff]  ;;  %v4000_v16 = vpack.c.bf16 %v457_v12, %v456_v11  ;;  %v460_v19 = vld [vmem:[%s3977_s15 + $0xa0] sm:$0xff]  ;;  %v787_v11 = vadd.s32 24, %v4099_v60  ;;  %v789_v12 = vadd.s32 40, %v4099_v60 }
  0x24   : > { %5715 = vst [vmem:[#allocation7_spill] sm:$0xff] %v3987_v9  ;;  %5716 = vst [vmem:[#allocation8_spill] sm:$0xff] %v3989_v10  ;;  %3552 = vmatmul.mubr.msk.bf16.vlgmr.msra.gmra.mrb[0].mxu0 %vm496_vm1, %v3987_v9  ;;  %v4002_v17 = vpack.c.bf16 %v459_v14, %v458_v13  ;;  %v447_v18 = vld [vmem:[%s3977_s15 + $0x38] sm:$0xff]  ;;  %v461_v20 = vld [vmem:[%s3977_s15 + $0xa8] sm:$0xff]  ;;  %v838_v13 = vand.u32 15, %v786_v62 }
  0x25   : > { %5717 = vst [vmem:[#allocation9_spill] sm:$0xff] %v4000_v16  ;;  %3555 = vmatprep.mubr.msk.bf16.mxu0 %vm496_vm1, %v3989_v10  ;;  %3567 = vmatprep.mubr.msk.bf16.mxu1 %vm496_vm1, %v4000_v16  ;;  %v448_v21 = vld [vmem:[%s3977_s15 + $0x40] sm:$0xff]  ;;  %v449_v22 = vld [vmem:[%s3977_s15 + $0x48] sm:$0xff]  ;;  %v4013_v23 = vpack.c.bf16 %v461_v20, %v460_v19  ;;  %v4017_v24 = vpack.c.bf16 %v447_v18, %v446_v15  ;;  %v462_v25 = vld [vmem:[%s3977_s15 + $0xb0] sm:$0xff]  ;;  %v852_v15 = vand.u32 15, %v788_v0 }
  0x26   : > { %5718 = vst [vmem:[#allocation10_spill] sm:$0xff] %v4002_v17  ;;  %3568 = vmatmul.mubr.msk.bf16.vlgmr.msra.gmra.mrb[0].mxu1 %vm496_vm1, %v4002_v17  ;;  %v463_v26 = vld [vmem:[%s3977_s15 + $0xb8] sm:$0xff]  ;;  %v4023_v27 = vpack.c.bf16 %v449_v22, %v448_v21  ;;  %v464_v28 = vld [vmem:[%s3977_s15 + $0xc0] sm:$0xff]  ;;  %v465_v29 = vld [vmem:[%s3977_s15 + $0xc8] sm:$0xff]  ;;  %v831_v22 = vand.u32 15, %v785_v7  ;;  %v797_v7 = vadd.s32 104, %v4099_v60 }
  0x27   : > { %5719 = vst [vmem:[#allocation11_spill] sm:$0xff] %v4013_v23  ;;  %5720 = vst [vmem:[#allocation12_spill] sm:$0xff] %v4017_v24  ;;  %3571 = vmatprep.mubr.msk.bf16.mxu1 %vm496_vm1, %v4013_v23  ;;  %v450_v30 = vld [vmem:[%s3977_s15 + $0x50] sm:$0xff]  ;;  %v451_v31 = vld [vmem:[%s3977_s15 + $0x58] sm:$0xff]  ;;  %v4029_v32 = vpack.c.bf16 %v463_v26, %v462_v25  ;;  %v4035_v35 = vpack.c.bf16 %v465_v29, %v464_v28  ;;  %3584 = vmatpush3.bf16.msra.mxu1 %v3753_v51  ;;  %v866_v25 = vand.u32 15, %v790_v8 }
  0x28   : > { %5721 = vst [vmem:[#allocation13_spill] sm:$0xff] %v4023_v27  ;;  %v452_v33 = vld [vmem:[%s3977_s15 + $0x60] sm:$0xff]  ;;  %v453_v34 = vld [vmem:[%s3977_s15 + $0x68] sm:$0xff]  ;;  %v466_v36 = vld [vmem:[%s3977_s15 + $0xd0] sm:$0xff]  ;;  %v4045_v40 = vpack.c.bf16 %v451_v31, %v450_v30  ;;  %3585 = vmatprep.subr.bf16.mxu1 %v3754_v52  ;;  %v791_v29 = vadd.s32 56, %v4099_v60  ;;  %v845_v30 = vand.u32 15, %v787_v11 }
  0x29   : > { %5722 = vst [vmem:[#allocation14_spill] sm:$0xff] %v4029_v32  ;;  %5723 = vst [vmem:[#allocation15_spill] sm:$0xff] %v4035_v35  ;;  %v467_v37 = vld [vmem:[%s3977_s15 + $0xd8] sm:$0xff]  ;;  %v468_v38 = vld [vmem:[%s3977_s15 + $0xe0] sm:$0xff]  ;;  %v4049_v41 = vpack.c.bf16 %v453_v34, %v452_v33  ;;  %v859_v31 = vand.u32 15, %v789_v12  ;;  %v4131_v33 = vadd.s32 4294967295, %v838_v13 }
  0x2a   : > { %v469_v39 = vld [vmem:[%s3977_s15 + $0xe8] sm:$0xff]  ;;  %5724 = vst [vmem:[#allocation16_spill] sm:$0xff] %v4045_v40  ;;  %v454_v42 = vld [vmem:[%s3977_s15 + $0x70] sm:$0xff]  ;;  %v455_v43 = vld [vmem:[%s3977_s15 + $0x78] sm:$0xff]  ;;  %v4053_v44 = vpack.c.bf16 %v467_v37, %v466_v36  ;;  %v792_v34 = vadd.s32 64, %v4099_v60  ;;  %v4134_v36 = vadd.s32 4294967295, %v852_v15 }
  0x2b   : > { %5725 = vst [vmem:[#allocation17_spill] sm:$0xff] %v4049_v41  ;;  %v4057_v45 = vpack.c.bf16 %v469_v39, %v468_v38  ;;  %v4063_v46 = vpack.c.bf16 %v455_v43, %v454_v42  ;;  %v470_v47 = vld [vmem:[%s3977_s15 + $0xf0] sm:$0xff]  ;;  %v471_v48 = vld [vmem:[%s3977_s15 + $0xf8] sm:$0xff]  ;;  %3586 = vmatpush3.bf16.msra.mxu1 %v3754_v52  ;;  %v742_v1 = vld [vmem:[%s5639_s3] sm:$0x7]  ;;  %v2274_v37 = vsub.s32 2, %v4099_v60 }
  0x2c   : > { %3556 = vmatmul.mubr.msk.bf16.gmra.mrb[4].mxu0 %vm496_vm1, %v4017_v24  ;;  %5726 = vst [vmem:[#allocation18_spill] sm:$0xff] %v4053_v44  ;;  %v4069_v49 = vpack.c.bf16 %v471_v48, %v470_v47  ;;  %3587 = vmatprep.subr.bf16.mxu1 %v3755_v53  ;;  %5731 = vst [vmem:[#allocation23_spill] sm:$0xff] %v4108_v2  ;;  %v743_v4 = vld [vmem:[%s5639_s3 + $0x4] sm:$0x7]  ;;  %v744_v6 = vld [vmem:[%s5639_s3 + $0x8] sm:$0x7]  ;;  %v4122_v18 = vrot.slane %v742_v1, %v4108_v2 }
  0x2d   : > { %3559 = vmatprep.mubr.msk.bf16.mxu0 %vm496_vm1, %v4023_v27  ;;  %5727 = vst [vmem:[#allocation19_spill] sm:$0xff] %v4057_v45  ;;  %5728 = vst [vmem:[#allocation20_spill] sm:$0xff] %v4063_v46  ;;  %v1252_v14 = vld [vmem:[#allocation2 + $0x7] sm:$0xff]  ;;  %v4124_v19 = vrot.slane %v742_v1, %v1782_v3  ;;  %v4126_v20 = vrot.slane %v743_v4, %v1782_v3  ;;  %v4128_v21 = vrot.slane %v744_v6, %v1782_v3  ;;  %v1253_v26 = vld [vmem:[#allocation2 + $0xf] sm:$0xff]  ;;  %s3403_s15 = sshll.u32 %s431_s30, 8 }
  0x2e   : > { %3572 = vmatmul.mubr.msk.bf16.gmra.mrb[4].mxu1 %vm496_vm1, %v4029_v32  ;;  %5729 = vst [vmem:[#allocation21_spill] sm:$0xff] %v4069_v49  ;;  %v1504_v28 = vsel %vm1324_vm2, %v1252_v14, 0.0  ;;  %v793_v38 = vadd.s32 72, %v4099_v60  ;;  %v794_v39 = vadd.s32 80, %v4099_v60  ;;  %v4143_v43 = vmul.f32 %v4122_v18, %v1253_v26  ;;  %s5525_s16 = scalar_lea.vmem [#allocation3], %s3403_s15 }
  0x2f   : > { %3575 = vmatprep.mubr.msk.bf16.mxu1 %vm496_vm1, %v4035_v35  ;;  %3588 = vmatpush3.bf16.msra.mxu1 %v3755_v53  ;;  %v4140_v42 = vmul.f32 %v4122_v18, %v1504_v28  ;;  %v4146_v47 = vrot.slane %v743_v4, %v4108_v2  ;;  %v4149_v48 = vrot.slane %v744_v6, %v4108_v2  ;;  %v4153_v51 = vadd.s32 1, %v831_v22  ;;  %s3337_s21 = sshll.u32 %s5525_s16, 4  ;;  %s5574_s21 = int_to_ptr.vmem [resolvable:$true] %s3337_s21 }
  0x30   : > { %3589 = vmatprep.subr.bf16.mxu1 %v3756_v54  ;;  %v873_v52 = vand.u32 15, %v791_v29  ;;  %v795_v53 = vadd.s32 88, %v4099_v60  ;;  %v4163_v59 = vrot.slane %v742_v1, %v2274_v37  ;;  %v887_v61 = vand.u32 15, %v793_v38  ;;  %s3779_s15 = scalar_lea.vmem %s5574_s21, 4096  ;;  %p3786_p0 = scmp.lt.s32.totalorder %s5574_s21, %s3784_s29 }
  0x31   : > { %v894_v62 = vand.u32 15, %v794_v39  ;;  %v4166_v0 = vrot.slane %v743_v4, %v2274_v37  ;;  %v4168_v3 = vrot.slane %v744_v6, %v2274_v37  ;;  %v798_v8 = vadd.s32 112, %v4099_v60  ;;  %p3780_p11 = scmp.ne.s32.totalorder %s5574_s21, %s3779_s15  ;;  %p3787_p1 = scmp.lt.s32.totalorder %s3785_s22, %s3779_s15 }
  0x32   : > { %v4175_v12 = vadd.s32 1, %v873_v52  ;;  %v901_v13 = vand.u32 15, %v795_v53  ;;  %v799_v1 = vadd.s32 120, %v4099_v60  ;;  %v800_v15 = vadd.s32 128, %v4099_v60 }
  0x33   : > { %3590 = vmatpush3.bf16.msra.mxu1 %v3756_v54  ;;  %v4157_v54 = vmul.f32 0.0, %v4124_v19  ;;  %v801_v4 = vadd.s32 136, %v4099_v60  ;;  %v804_v6 = vadd.s32 160, %v4099_v60  ;;  %v4183_v22 = vadd.s32 1, %v887_v61  ;;  %p3781_p12 = pnand %p3780_p11, %p3956_p5  ;;  %p3788_p2 = por %p3787_p1, %p3786_p0 }
  0x34   : > { %3560 = vmatmul.mubr.msk.bf16.gmra.mrb[8].mxu0 %vm496_vm1, %v4045_v40  ;;  %3591 = vmatprep.subr.bf16.mxu1 %v3757_v55  ;;  %v908_v26 = vand.u32 15, %v796_v63  ;;  %v802_v28 = vadd.s32 144, %v4099_v60  ;;  %v915_v29 = vand.u32 15, %v797_v7  ;;  %v4190_v37 = vadd.s32 1, %v901_v13  ;;  %v4202_v13 = vld [vmem:[%s5638_s2] ss:$0 sm:$0xff] }
  0x35   : > { %3563 = vmatprep.mubr.msk.bf16.mxu0 %vm496_vm1, %v4049_v41  ;;  %v929_v38 = vand.u32 15, %v799_v1  ;;  %v805_v39 = vadd.s32 168, %v4099_v60  ;;  %v808_v52 = vadd.s32 192, %v4099_v60  ;;  %v936_v53 = vand.u32 15, %v800_v15  ;;  %p3782_p13 = pneg %p3781_p12 }
  0x36   : > { %3576 = vmatmul.mubr.msk.bf16.gmra.mrb[8].mxu1 %vm496_vm1, %v4053_v44  ;;  %v807_v61 = vadd.s32 184, %v4099_v60  ;;  %v950_v63 = vand.u32 15, %v802_v28  ;;  %v809_v7 = vadd.s32 200, %v4099_v60  ;;  %v4204_v1 = vadd.s32 1, %v915_v29 }
  0x37   : > { %3579 = vmatprep.mubr.msk.bf16.mxu1 %vm496_vm1, %v4057_v45  ;;  %3592 = vmatpush3.bf16.msra.mxu1 %v3757_v55  ;;  %v1984_v55 = vld [vmem:[#allocation2 + $0x9] sm:$0xff]  ;;  %v812_v28 = vadd.s32 224, %v4099_v60  ;;  %v4211_v44 = vadd.s32 4294967295, %v936_v53  ;;  %vm1326_vm3 = vcmp.ge.s32.totalorder %v4131_v33, 0  ;;  %vm1328_vm4 = vcmp.ge.s32.totalorder %v4134_v36, 0  ;;  %p3789_p3 = pnand %p3788_p2, %p3782_p13 }
  0x38   : > { %3593 = vmatprep.subr.bf16.mxu1 %v3758_v56  ;;  %v4173_v11 = vmul.f32 %v4163_v59, %v1984_v55  ;;  %v943_v55 = vand.u32 15, %v801_v4  ;;  %5732 = vst [vmem:[#allocation24_spill] sm:$0xff] %v4204_v1  ;;  %v985_v23 = vand.u32 15, %v807_v61  ;;  %v4218_v17 = vadd.s32 4294967295, %v950_v63 }
  0x39   : > { %5735 = vst [vmem:[#allocation27_spill] sm:$0xff] %v4211_v44  ;;  %v1020_v53 = vand.u32 15, %v812_v28  ;;  %vm2093_vm6 = vcmp.lt.s32.totalorder %v4153_v51, 16  ;;  %vm2099_vm9 = vcmp.lt.s32.totalorder %v4175_v12, 16  ;;  %vm2101_vm11 = vcmp.lt.s32.totalorder %v4183_v22, 16 }
  0x3a   : > { %v4213_v35 = vadd.s32 1, %v943_v55  ;;  %5738 = vst [vmem:[#allocation30_spill] sm:$0xff] %v4218_v17  ;;  %vm2103_vm13 = vcmp.lt.s32.totalorder %v4190_v37, 16 }
  0x3b   : > { %3594 = vmatpush3.bf16.msra.mxu1 %v3758_v56  ;;  %v4159_v56 = vadd.s32 1, %v845_v30  ;;  %v922_v30 = vand.u32 15, %v798_v8  ;;  %v810_v8 = vadd.s32 208, %v4099_v60  ;;  %v4242_v40 = vadd.s32 4294967295, %v1020_v53 }
  0x3c   : > { %3564 = vmatmul.mubr.msk.bf16.gmra.mrb[12].mxu0 %vm496_vm1, %v4063_v46  ;;  %3595 = vmatprep.subr.bf16.mxu1 %v3759_v57  ;;  %5736 = vst [vmem:[#allocation28_spill] sm:$0xff] %v4213_v35 }
  0x3d   : > { %v4206_v2 = vadd.s32 4294967295, %v922_v30  ;;  %5746 = vst [vmem:[#allocation38_spill] sm:$0xff] %v4242_v40  ;;  %vm2095_vm7 = vcmp.lt.s32.totalorder %v4159_v56, 16 }
  0x3e   : > { %3580 = vmatmul.mubr.msk.bf16.gmra.mrb[12].mxu1 %vm496_vm1, %v4069_v49  ;;  %v992_v49 = vand.u32 15, %v808_v52 }
  0x3f   : > { %3596 = vmatpush3.bf16.msra.mxu1 %v3759_v57  ;;  %v4161_v57 = vadd.s32 1, %v859_v31  ;;  %v803_v31 = vadd.s32 152, %v4099_v60  ;;  %5733 = vst [vmem:[#allocation25_spill] sm:$0xff] %v4206_v2 }
  0x40   : > { %3597 = vmatprep.subr.bf16.mxu1 %v3760_v58  ;;  %v4229_v63 = vadd.s32 4294967295, %v992_v49 }
  0x41   : > { %v957_v15 = vand.u32 15, %v803_v31  ;;  %v999_v31 = vand.u32 15, %v809_v7  ;;  %vm2097_vm8 = vcmp.lt.s32.totalorder %v4161_v57, 16 }
  0x42   : > { %5742 = vst [vmem:[#allocation34_spill] sm:$0xff] %v4229_v63 }
  0x43   : > { %3598 = vmatpush3.bf16.msra.mxu1 %v3760_v58  ;;  %v880_v58 = vand.u32 15, %v792_v34  ;;  %v806_v34 = vadd.s32 176, %v4099_v60  ;;  %v4221_v52 = vadd.s32 1, %v957_v15  ;;  %v4237_v41 = vadd.s32 1, %v999_v31 }
  0x44   : > { %3651 = vmatprep.subr.bf16.mxu1 %v3843_v50  ;;  %v4151_v50 = vadd.s32 4294967295, %v866_v25  ;;  %v4185_v25 = vadd.s32 4294967295, %v894_v62  ;;  %v4195_v62 = vadd.s32 4294967295, %v908_v26  ;;  %v971_v26 = vand.u32 15, %v805_v39 }
  0x45   : > { %v4178_v14 = vadd.s32 4294967295, %v880_v58  ;;  %v964_v58 = vand.u32 15, %v804_v6  ;;  %v978_v4 = vand.u32 15, %v806_v34  ;;  %v4208_v6 = vadd.s32 1, %v929_v38  ;;  %5739 = vst [vmem:[#allocation31_spill] sm:$0xff] %v4221_v52  ;;  %5744 = vst [vmem:[#allocation36_spill] sm:$0xff] %v4237_v41 }
  0x46   : > { %v1006_v34 = vand.u32 15, %v810_v8  ;;  %vm1330_vm5 = vcmp.ge.s32.totalorder %v4151_v50, 0  ;;  %vm1334_vm12 = vcmp.ge.s32.totalorder %v4185_v25, 0  ;;  %vm1336_vm14 = vcmp.ge.s32.totalorder %v4195_v62, 0 }
  0x47   : > { %5734 = vst [vmem:[#allocation26_spill] sm:$0xff] %v4208_v6  ;;  %v4215_v32 = vadd.s32 4294967295, %v964_v58  ;;  %v4223_v16 = vadd.s32 4294967295, %v978_v4  ;;  %v4233_v4 = vadd.s32 1, %v985_v23  ;;  %vm1332_vm10 = vcmp.ge.s32.totalorder %v4178_v14, 0 }
  0x49   : > { %5737 = vst [vmem:[#allocation29_spill] sm:$0xff] %v4215_v32  ;;  %5740 = vst [vmem:[#allocation32_spill] sm:$0xff] %v4223_v16 }
  0x4a   : > { %5743 = vst [vmem:[#allocation35_spill] sm:$0xff] %v4233_v4 }
  0xf7   : > { %v3553_v45 = vpop.f32.mrb[0].mxu0 }
  0xf8   : > { %v592_v29 = vadd.f32 %v3553_v45, %v4202_v13  ;;  %v583_v30 = vpop.f32.mrb[1].mxu0  ;;  %v4227_v45 = vadd.s32 1, %v971_v26  ;;  %v4239_v26 = vadd.s32 4294967295, %v1006_v34 }
  0xf9   : > { %v584_v38 = vadd.f32 %v4202_v13, %v583_v30  ;;  %v3554_v39 = vpop.f32.mrb[2].mxu0  ;;  %v3569_v61 = vpop.f32.mrb[0].mxu1 }
  0xfa   : > { %v712_v55 = vmax.f32 %v592_v29, 0.0  ;;  %v595_v58 = vadd.f32 %v3554_v39, %v4202_v13  ;;  %v586_v46 = vpop.f32.mrb[3].mxu0  ;;  %5741 = vst [vmem:[#allocation33_spill] sm:$0xff] %v4227_v45  ;;  %v656_v15 = vadd.f32 %v3569_v61, %v4202_v13  ;;  %v647_v30 = vpop.f32.mrb[1].mxu1  ;;  %5745 = vst [vmem:[#allocation37_spill] sm:$0xff] %v4239_v26 }
  0xfb   : > { %v710_v7 = vmax.f32 %v584_v38, 0.0  ;;  %v587_v8 = vadd.f32 %v4202_v13, %v586_v46  ;;  %v648_v29 = vadd.f32 %v4202_v13, %v647_v30  ;;  %v3570_v39 = vpop.f32.mrb[2].mxu1 }
  0xfc   : > { %753 = vst [vmem:[#allocation2 + $0x28] sm:$0xff] %v712_v55  ;;  %v713_v28 = vmax.f32 %v595_v58, 0.0  ;;  %v728_v38 = vmax.f32 %v656_v15, 0.0  ;;  %v659_v46 = vadd.f32 %v3570_v39, %v4202_v13  ;;  %v650_v61 = vpop.f32.mrb[3].mxu1  ;;  %v4246_v30 = vmul.f32 %v4126_v20, %v712_v55 }
  0xfd   : > { %751 = vst [vmem:[#allocation2 + $0x18] sm:$0xff] %v710_v7  ;;  %v711_v49 = vmax.f32 %v587_v8, 0.0  ;;  %v726_v23 = vmax.f32 %v648_v29, 0.0  ;;  %v651_v58 = vadd.f32 %v4202_v13, %v650_v61  ;;  %v4249_v31 = vmul.f32 %v4128_v21, %v712_v55 }
  0xfe   : > { %754 = vst [vmem:[#allocation2 + $0x30] sm:$0xff] %v713_v28  ;;  %769 = vst [vmem:[#allocation2 + $0xa8] sm:$0xff] %v728_v38  ;;  %v729_v8 = vmax.f32 %v659_v46, 0.0  ;;  %v4252_v15 = vmul.f32 %v4124_v19, %v710_v7  ;;  %v4255_v53 = vmul.f32 %v4126_v20, %v710_v7  ;;  %v4258_v29 = vmul.f32 %v4126_v20, %v713_v28 }
  0xff   : > { %752 = vst [vmem:[#allocation2 + $0x20] sm:$0xff] %v711_v49  ;;  %v3557_v34 = vpop.f32.mrb[4].mxu0  ;;  %767 = vst [vmem:[#allocation2 + $0x98] sm:$0xff] %v726_v23  ;;  %v727_v27 = vmax.f32 %v651_v58, 0.0  ;;  %v4262_v24 = vmul.f32 %v4124_v19, %v711_v49  ;;  %v4265_v38 = vmul.f32 %v4126_v20, %v711_v49  ;;  %v4269_v7 = vmul.f32 %v4128_v21, %v713_v28 }
 0x100   : > { %v608_v39 = vadd.f32 %v3557_v34, %v4202_v13  ;;  %v599_v61 = vpop.f32.mrb[5].mxu0  ;;  %770 = vst [vmem:[#allocation2 + $0xb0] sm:$0xff] %v729_v8  ;;  %v4272_v9 = vmul.f32 %v4124_v19, %v712_v55  ;;  %v4275_v34 = vadd.s32 216, %v4099_v60  ;;  %v4282_v8 = vmul.f32 %v4124_v19, %v713_v28 }
 0x101   : > { %v600_v46 = vadd.f32 %v4202_v13, %v599_v61  ;;  %v3558_v10 = vpop.f32.mrb[6].mxu0  ;;  %768 = vst [vmem:[#allocation2 + $0xa0] sm:$0xff] %v727_v27  ;;  %v3573_v49 = vpop.f32.mrb[4].mxu1  ;;  %v4285_v61 = vadd.s32 232, %v4099_v60 }
 0x102   : > { %5747 = vst [vmem:[#allocation39_spill] sm:$0xff] %v4275_v34  ;;  %v4277_v23 = vmax.f32 %v608_v39, 0.0  ;;  %v611_v58 = vadd.f32 %v3558_v10, %v4202_v13  ;;  %v602_v5 = vpop.f32.mrb[7].mxu0  ;;  %v672_v39 = vadd.f32 %v3573_v49, %v4202_v13  ;;  %v663_v26 = vpop.f32.mrb[5].mxu1 }
 0x103   : > { %5749 = vst [vmem:[#allocation41_spill] sm:$0xff] %v4285_v61  ;;  %v4287_v55 = vmax.f32 %v600_v46, 0.0  ;;  %v603_v40 = vadd.f32 %v4202_v13, %v602_v5  ;;  %v664_v41 = vadd.f32 %v4202_v13, %v663_v26  ;;  %v3574_v28 = vpop.f32.mrb[6].mxu1 }
 0x104   : > { %5748 = vst [vmem:[#allocation40_spill] sm:$0xff] %v4277_v23  ;;  %757 = vst [vmem:[#allocation2 + $0x48] sm:$0xff] %v4277_v23  ;;  %v4293_v27 = vmax.f32 %v611_v58, 0.0  ;;  %v1254_v63 = vld [vmem:[#allocation2 + $0x17] sm:$0xff]  ;;  %v4298_v60 = vmul.f32 %v4128_v21, %v4277_v23  ;;  %v4302_v5 = vmul.f32 %v4126_v20, %v4277_v23  ;;  %v732_v49 = vmax.f32 %v672_v39, 0.0  ;;  %v666_v10 = vpop.f32.mrb[7].mxu1 }
 0x105   : > { %755 = vst [vmem:[#allocation2 + $0x38] sm:$0xff] %v4287_v55  ;;  %v4305_v46 = vmax.f32 %v603_v40, 0.0  ;;  %v675_v58 = vadd.f32 %v3574_v28, %v4202_v13  ;;  %v4308_v61 = vld [vmem:[#allocation2 + $0x2f] sm:$0xff]  ;;  %v1506_v26 = vsel %vm1326_vm3, %v1254_v63, 0.0  ;;  %v730_v34 = vmax.f32 %v664_v41, 0.0 }
 0x106   : > { %5750 = vst [vmem:[#allocation42_spill] sm:$0xff] %v4302_v5  ;;  %758 = vst [vmem:[#allocation2 + $0x50] sm:$0xff] %v4293_v27  ;;  %v667_v4 = vadd.f32 %v4202_v13, %v666_v10  ;;  %v1255_v16 = vld [vmem:[#allocation2 + $0x1f] sm:$0xff]  ;;  %v1256_v45 = vld [vmem:[#allocation2 + $0x27] sm:$0xff]  ;;  %v1546_v32 = vmul.f32 %v4122_v18, %v1506_v26  ;;  %v1612_v40 = vmul.f32 %v4146_v47, %v1506_v26 }
 0x107   : > { %756 = vst [vmem:[#allocation2 + $0x40] sm:$0xff] %v4305_v46  ;;  %v3561_v39 = vpop.f32.mrb[8].mxu0  ;;  %773 = vst [vmem:[#allocation2 + $0xc8] sm:$0xff] %v732_v49  ;;  %v733_v28 = vmax.f32 %v675_v58, 0.0  ;;  %v4320_v33 = vsel %vm1328_vm4, %v1256_v45, 0.0  ;;  %v1547_v41 = vmul.f32 %v4122_v18, %v1255_v16  ;;  %v1613_v63 = vmul.f32 %v4146_v47, %v1255_v16 }
 0x108   : > { %v624_v10 = vadd.f32 %v3561_v39, %v4202_v13  ;;  %v615_v52 = vpop.f32.mrb[9].mxu0  ;;  %771 = vst [vmem:[#allocation2 + $0xb8] sm:$0xff] %v730_v34  ;;  %v731_v26 = vmax.f32 %v667_v4, 0.0  ;;  %v1614_v17 = vmul.f32 %v4146_v47, %v4320_v33  ;;  %v1615_v49 = vmul.f32 %v4146_v47, %v4308_v61 }
 0x109   : > { %v616_v58 = vadd.f32 %v4202_v13, %v615_v52  ;;  %v3562_v36 = vpop.f32.mrb[10].mxu0  ;;  %774 = vst [vmem:[#allocation2 + $0xd0] sm:$0xff] %v733_v28  ;;  %v1644_v45 = vadd.f32 %v1612_v40, %v4140_v42  ;;  %v1645_v35 = vadd.f32 %v1613_v63, %v4143_v43  ;;  %v1680_v16 = vmul.f32 %v4149_v48, %v4320_v33  ;;  %v3577_v44 = vpop.f32.mrb[8].mxu1 }
 0x10a   : > { %v4334_v39 = vmax.f32 %v624_v10, 0.0  ;;  %v627_v4 = vadd.f32 %v3562_v36, %v4202_v13  ;;  %v618_v34 = vpop.f32.mrb[11].mxu0  ;;  %772 = vst [vmem:[#allocation2 + $0xc0] sm:$0xff] %v731_v26  ;;  %v1646_v6 = vadd.f32 %v1614_v17, %v1546_v32  ;;  %v1647_v23 = vadd.f32 %v1615_v49, %v1547_v41  ;;  %v679_v40 = vpop.f32.mrb[9].mxu1 }
 0x10b   : > { %v4337_v2 = vmax.f32 %v616_v58, 0.0  ;;  %v619_v52 = vadd.f32 %v4202_v13, %v618_v34  ;;  %v688_v42 = vadd.f32 %v3577_v44, %v4202_v13  ;;  %v1681_v43 = vmul.f32 %v4149_v48, %v4308_v61  ;;  %v3578_v10 = vpop.f32.mrb[10].mxu1 }
 0x10c   : > { %5751 = vst [vmem:[#allocation43_spill] sm:$0xff] %v4334_v39  ;;  %761 = vst [vmem:[#allocation2 + $0x68] sm:$0xff] %v4334_v39  ;;  %v4344_v28 = vmax.f32 %v627_v4, 0.0  ;;  %v680_v63 = vadd.f32 %v4202_v13, %v679_v40  ;;  %v1258_v26 = vld [vmem:[#allocation2 + $0x37] sm:$0xff]  ;;  %v1712_v17 = vadd.f32 %v1680_v16, %v1644_v45  ;;  %v4349_v32 = vmul.f32 %v4128_v21, %v4287_v55  ;;  %v682_v58 = vpop.f32.mrb[11].mxu1 }
 0x10d   : > { %759 = vst [vmem:[#allocation2 + $0x58] sm:$0xff] %v4337_v2  ;;  %v4354_v44 = vmax.f32 %v619_v52, 0.0  ;;  %v736_v41 = vmax.f32 %v688_v42, 0.0  ;;  %v691_v49 = vadd.f32 %v3578_v10, %v4202_v13  ;;  %v4359_v36 = vsel %vm1330_vm5, %v1258_v26, 0.0  ;;  %v1985_v40 = vld [vmem:[#allocation2 + $0x11] sm:$0xff] }
 0x10e   : > { %5752 = vst [vmem:[#allocation44_spill] sm:$0xff] %v4344_v28  ;;  %762 = vst [vmem:[#allocation2 + $0x70] sm:$0xff] %v4344_v28  ;;  %v734_v45 = vmax.f32 %v680_v63, 0.0  ;;  %v683_v16 = vadd.f32 %v4202_v13, %v682_v58  ;;  %v4363_v4 = vld [vmem:[#allocation2 + $0x3f] sm:$0xff]  ;;  %v1682_v34 = vmul.f32 %v4149_v48, %v4359_v36  ;;  %v1713_v52 = vadd.f32 %v1681_v43, %v1645_v35  ;;  %v4446_v12 = vld [vmem:[#allocation2 + $0x4f] sm:$0xff] }
 0x10f   : > { %5753 = vst [vmem:[#allocation45_spill] sm:$0xff] %v4354_v44  ;;  %760 = vst [vmem:[#allocation2 + $0x60] sm:$0xff] %v4354_v44  ;;  %v3565_v42 = vpop.f32.mrb[12].mxu0  ;;  %v737_v10 = vmax.f32 %v691_v49, 0.0  ;;  %v1683_v50 = vmul.f32 %v4149_v48, %v4363_v4  ;;  %v1816_v26 = vadd.f32 %v4157_v54, %v1712_v17  ;;  %v1923_v63 = vmul.f32 %v4128_v21, %v4305_v46 }
 0x110   : > { %777 = vst [vmem:[#allocation2 + $0xe8] sm:$0xff] %v736_v41  ;;  %v640_v58 = vadd.f32 %v3565_v42, %v4202_v13  ;;  %v631_v28 = vpop.f32.mrb[13].mxu0  ;;  %775 = vst [vmem:[#allocation2 + $0xd8] sm:$0xff] %v734_v45  ;;  %v735_v39 = vmax.f32 %v683_v16, 0.0  ;;  %v1714_v35 = vadd.f32 %v1682_v34, %v1646_v6  ;;  %v1817_v43 = vadd.f32 %v4157_v54, %v1713_v52 }
 0x111   : > { %v632_v41 = vadd.f32 %v4202_v13, %v631_v28  ;;  %v3566_v49 = vpop.f32.mrb[14].mxu0  ;;  %778 = vst [vmem:[#allocation2 + $0xf0] sm:$0xff] %v737_v10  ;;  %v1715_v5 = vadd.f32 %v1683_v50, %v1647_v23  ;;  %v1884_v17 = vadd.f32 %v4255_v53, %v1816_v26  ;;  %v2237_v1 = vsel %vm2093_vm6, %v1985_v40, 0.0  ;;  %v3581_v6 = vpop.f32.mrb[12].mxu1  ;;  %v1987_v10 = vld [vmem:[#allocation2 + $0x21] sm:$0xff]  ;;  %v1989_v50 = vld [vmem:[#allocation2 + $0x31] sm:$0xff] }
 0x112   : > { %v4380_v44 = vmax.f32 %v640_v58, 0.0  ;;  %v643_v45 = vadd.f32 %v3566_v49, %v4202_v13  ;;  %v634_v16 = vpop.f32.mrb[15].mxu0  ;;  %776 = vst [vmem:[#allocation2 + $0xe0] sm:$0xff] %v735_v39  ;;  %v1818_v54 = vadd.f32 %v4252_v15, %v1714_v35  ;;  %v1885_v34 = vadd.f32 %v4265_v38, %v1817_v43  ;;  %v695_v23 = vpop.f32.mrb[13].mxu1  ;;  %v1986_v43 = vld [vmem:[#allocation2 + $0x19] sm:$0xff] }
 0x113   : > { %v4386_v28 = vmax.f32 %v632_v41, 0.0  ;;  %v635_v53 = vadd.f32 %v4202_v13, %v634_v16  ;;  %v704_v51 = vadd.f32 %v3581_v6, %v4202_v13  ;;  %v1819_v52 = vadd.f32 %v4262_v24, %v1715_v5  ;;  %v3582_v15 = vpop.f32.mrb[14].mxu1 }
 0x114   : > { %765 = vst [vmem:[#allocation2 + $0x88] sm:$0xff] %v4380_v44  ;;  %v4392_v40 = vmax.f32 %v643_v45, 0.0  ;;  %v696_v39 = vadd.f32 %v4202_v13, %v695_v23  ;;  %v1886_v38 = vadd.f32 %v4246_v30, %v1818_v54  ;;  %v1952_v42 = vadd.f32 %v4249_v31, %v1884_v17  ;;  %v698_v5 = vpop.f32.mrb[15].mxu1  ;;  %v4406_v17 = vld [vmem:[#allocation2 + $0x29] sm:$0xff] }
 0x115   : > { %763 = vst [vmem:[#allocation2 + $0x78] sm:$0xff] %v4386_v28  ;;  %v4398_v26 = vmax.f32 %v635_v53, 0.0  ;;  %v740_v58 = vmax.f32 %v704_v51, 0.0  ;;  %v707_v24 = vadd.f32 %v3582_v15, %v4202_v13  ;;  %v1887_v35 = vadd.f32 %v4258_v29, %v1819_v52  ;;  %v4424_v51 = vld [vmem:[#allocation2 + $0x39] sm:$0xff]  ;;  %v1260_v15 = vld [vmem:[#allocation2 + $0x47] sm:$0xff] }
 0x116   : > { %766 = vst [vmem:[#allocation2 + $0x90] sm:$0xff] %v4392_v40  ;;  %v738_v41 = vmax.f32 %v696_v39, 0.0  ;;  %v699_v30 = vadd.f32 %v4202_v13, %v698_v5  ;;  %v1953_v31 = vadd.f32 %v4269_v7, %v1885_v34  ;;  %v1954_v49 = vadd.f32 %v4349_v32, %v1886_v38  ;;  %v1991_v34 = vld [vmem:[#allocation2 + $0x41] sm:$0xff]  ;;  %v4440_v5 = vld [vmem:[%s5640_s4] ss:$0 sm:$0xff] }
 0x117   : > { %764 = vst [vmem:[#allocation2 + $0x80] sm:$0xff] %v4398_v26  ;;  %781 = vst [vmem:[#allocation2 + $0x108] sm:$0xff] %v740_v58  ;;  %v741_v45 = vmax.f32 %v707_v24, 0.0  ;;  %v1955_v16 = vadd.f32 %v1923_v63, %v1887_v35  ;;  %v2239_v29 = vsel %vm2095_vm7, %v1987_v10, 0.0  ;;  %v4413_v6 = vsel %vm2097_vm8, %v1989_v50, 0.0 }
 0x118   : > { %779 = vst [vmem:[#allocation2 + $0xf8] sm:$0xff] %v738_v41  ;;  %v739_v13 = vmax.f32 %v699_v30, 0.0  ;;  %v2277_v7 = vmul.f32 %v4163_v59, %v2237_v1  ;;  %v2278_v32 = vmul.f32 %v4163_v59, %v1986_v43  ;;  %v2279_v54 = vmul.f32 %v4163_v59, %v2239_v29 }
 0x119   : > { %782 = vst [vmem:[#allocation2 + $0x110] sm:$0xff] %v741_v45  ;;  %v2308_v63 = vadd.f32 %v4173_v11, %v1952_v42  ;;  %v2344_v56 = vmul.f32 %v4166_v0, %v1986_v43  ;;  %v2345_v57 = vmul.f32 %v4166_v0, %v2239_v29  ;;  %v2346_v53 = vmul.f32 %v4166_v0, %v4406_v17 }
 0x11a   : > { %780 = vst [vmem:[#allocation2 + $0x100] sm:$0xff] %v739_v13  ;;  %v2309_v1 = vadd.f32 %v2277_v7, %v1953_v31  ;;  %v2310_v23 = vadd.f32 %v2278_v32, %v1954_v49  ;;  %v2311_v52 = vadd.f32 %v2279_v54, %v1955_v16  ;;  %v2347_v39 = vmul.f32 %v4166_v0, %v4413_v6 }
 0x11b   : > { %v2376_v38 = vadd.f32 %v2344_v56, %v2308_v63  ;;  %v2412_v11 = vmul.f32 %v4168_v3, %v4406_v17  ;;  %v2413_v42 = vmul.f32 %v4168_v3, %v4413_v6  ;;  %v4434_v10 = vsel %vm2099_vm9, %v1991_v34, 0.0  ;;  %v1993_v63 = vld [vmem:[#allocation2 + $0x51] sm:$0xff] }
 0x11c   : > { %v2377_v50 = vadd.f32 %v2345_v57, %v2309_v1  ;;  %v2378_v58 = vadd.f32 %v2346_v53, %v2310_v23  ;;  %v2379_v24 = vadd.f32 %v2347_v39, %v2311_v52  ;;  %v2414_v35 = vmul.f32 %v4168_v3, %v4424_v51 }
 0x11d   : > { %v2444_v43 = vadd.f32 %v2412_v11, %v2376_v38  ;;  %v2415_v41 = vmul.f32 %v4168_v3, %v4434_v10  ;;  %v4450_v30 = vsel %vm1332_vm10, %v1260_v15, 0.0  ;;  %v1548_v31 = vmul.f32 %v4122_v18, %v4320_v33 }
 0x11e   : > { %v2445_v49 = vadd.f32 %v2413_v42, %v2377_v50  ;;  %v2446_v45 = vadd.f32 %v2414_v35, %v2378_v58  ;;  %v1549_v16 = vmul.f32 %v4122_v18, %v4308_v61  ;;  %v1616_v29 = vmul.f32 %v4146_v47, %v4359_v36  ;;  %v4475_v50 = vld [vmem:[#allocation2 + $0x49] sm:$0xff] }
 0x11f   : > { %v2483_v13 = vadd.f32 %v4440_v5, %v2444_v43  ;;  %v2447_v7 = vadd.f32 %v2415_v41, %v2379_v24  ;;  %v1617_v32 = vmul.f32 %v4146_v47, %v4363_v4  ;;  %v1684_v14 = vmul.f32 %v4149_v48, %v4450_v30  ;;  %v1262_v24 = vld [vmem:[#allocation2 + $0x57] sm:$0xff] }
 0x120   : > { %v2484_v54 = vadd.f32 %v4440_v5, %v2445_v49  ;;  %v2485_v33 = vadd.f32 %v4440_v5, %v2446_v45  ;;  %v1648_v34 = vadd.f32 %v1616_v29, %v1548_v31  ;;  %v1685_v61 = vmul.f32 %v4149_v48, %v4446_v12  ;;  %v4492_v29 = vld [vmem:[#allocation2 + $0x5f] sm:$0xff] }
 0x121   : > { %v2515_v56 = vmax.f32 %v2483_v13, 0.0  ;;  %v2486_v57 = vadd.f32 %v4440_v5, %v2447_v7  ;;  %v1649_v53 = vadd.f32 %v1617_v32, %v1549_v16  ;;  %v1856_v1 = vmul.f32 %v4126_v20, %v4287_v55 }
 0x122   : > { %v2516_v23 = vmax.f32 %v2484_v54, 0.0  ;;  %v2517_v52 = vmax.f32 %v2485_v33, 0.0  ;;  %v1716_v39 = vadd.f32 %v1684_v14, %v1648_v34  ;;  %v1857_v15 = vmul.f32 %v4126_v20, %v4305_v46 }
 0x123   : > { %v2518_v38 = vmax.f32 %v2486_v57, 0.0  ;;  %v1717_v11 = vadd.f32 %v1685_v61, %v1649_v53  ;;  %v1925_v42 = vmul.f32 %v4128_v21, %v4293_v27  ;;  %v4479_v58 = vsel %vm2101_vm11, %v1993_v63, 0.0  ;;  %v1995_v61 = vld [vmem:[#allocation2 + $0x61] sm:$0xff] }
 0x124   : > { %v2547_v35 = vpack.c.bf16 %v2516_v23, %v2515_v56  ;;  %v1820_v43 = vadd.f32 %v4272_v9, %v1716_v39  ;;  %v2280_v41 = vmul.f32 %v4163_v59, %v4406_v17  ;;  %v2281_v31 = vmul.f32 %v4163_v59, %v4413_v6  ;;  %v5754_v39 = vld [vmem:[#allocation45_spill] sm:$0xff] }
 0x125   : > { %v2548_v49 = vpack.c.bf16 %v2518_v38, %v2517_v52  ;;  %v1821_v45 = vadd.f32 %v4282_v8, %v1717_v11  ;;  %v2348_v22 = vmul.f32 %v4166_v0, %v4424_v51  ;;  %v2349_v16 = vmul.f32 %v4166_v0, %v4434_v10  ;;  %v4525_v38 = vld [vmem:[#allocation2 + $0x59] sm:$0xff] }
 0x126   : > { %3599 = vmatprep.mubr.bf16.mxu1 %v2547_v35  ;;  %v1888_v9 = vadd.f32 %v1856_v1, %v1820_v43  ;;  %v2416_v17 = vmul.f32 %v4168_v3, %v4475_v50  ;;  %v2417_v6 = vmul.f32 %v4168_v3, %v4479_v58  ;;  %v4500_v13 = vsel %vm1334_vm12, %v1262_v24, 0.0  ;;  %v1264_v35 = vld [vmem:[#allocation2 + $0x67] sm:$0xff] }
 0x127   : > { %3600 = vmatmul.mubr.bf16.vlgmr.msra.gmra.mrb[16].mxu1 %v2548_v49  ;;  %v1889_v8 = vadd.f32 %v1857_v15, %v1821_v45  ;;  %v1550_v7 = vmul.f32 %v4122_v18, %v4359_v36  ;;  %v1551_v32 = vmul.f32 %v4122_v18, %v4363_v4  ;;  %v1618_v14 = vmul.f32 %v4146_v47, %v4450_v30  ;;  %v5755_v43 = vld [vmem:[#allocation24_spill] sm:$0xff] }
 0x128   : > { %v1956_v54 = vadd.f32 %v4298_v60, %v1888_v9  ;;  %v1619_v33 = vmul.f32 %v4146_v47, %v4446_v12  ;;  %v1686_v25 = vmul.f32 %v4149_v48, %v4500_v13  ;;  %v1687_v34 = vmul.f32 %v4149_v48, %v4492_v29 }
 0x129   : > { %v1957_v63 = vadd.f32 %v1925_v42, %v1889_v8  ;;  %v1650_v36 = vadd.f32 %v1618_v14, %v1550_v7  ;;  %v1790_v4 = vmul.f32 %v4124_v19, %v4287_v55  ;;  %v1791_v56 = vmul.f32 %v4124_v19, %v4305_v46  ;;  %v5756_v8 = vld [vmem:[#allocation42_spill] sm:$0xff] }
 0x12a   : > { %v2312_v57 = vadd.f32 %v2280_v41, %v1956_v54  ;;  %v1651_v60 = vadd.f32 %v1619_v33, %v1551_v32  ;;  %v1859_v53 = vmul.f32 %v4126_v20, %v4293_v27  ;;  %v1926_v1 = vmul.f32 %v4128_v21, %v4337_v2  ;;  %v4545_v32 = vld [vmem:[#allocation2 + $0x6f] sm:$0xff] }
 0x12b   : > { %v2313_v23 = vadd.f32 %v2281_v31, %v1957_v63  ;;  %v1718_v52 = vadd.f32 %v1686_v25, %v1650_v36  ;;  %v1927_v15 = vmul.f32 %v4128_v21, %v5754_v39  ;;  %v4529_v55 = vsel %vm2103_vm13, %v1995_v61, 0.0 }
 0x12c   : > { %v2380_v46 = vadd.f32 %v2348_v22, %v2312_v57  ;;  %v1719_v11 = vadd.f32 %v1687_v34, %v1651_v60  ;;  %v2282_v42 = vmul.f32 %v4163_v59, %v4424_v51  ;;  %v2283_v24 = vmul.f32 %v4163_v59, %v4434_v10 }
 0x12d   : > { %vm2105_vm15 = vcmp.lt.s32.totalorder %v5755_v43, 16  ;;  %v2381_v41 = vadd.f32 %v2349_v16, %v2313_v23  ;;  %v1822_v31 = vadd.f32 %v1790_v4, %v1718_v52  ;;  %v2350_v49 = vmul.f32 %v4166_v0, %v4475_v50 }
 0x12e   : > { %v2351_v37 = vmul.f32 %v4166_v0, %v4479_v58  ;;  %v2448_v45 = vadd.f32 %v2416_v17, %v2380_v46  ;;  %v1823_v22 = vadd.f32 %v1791_v56, %v1719_v11  ;;  %v2418_v9 = vmul.f32 %v4168_v3, %v4525_v38  ;;  %v5757_v17 = vld [vmem:[#allocation25_spill] sm:$0xff] }
 0x12f   : > { %v2419_v51 = vmul.f32 %v4168_v3, %v4529_v55  ;;  %v2449_v10 = vadd.f32 %v2417_v6, %v2381_v41  ;;  %v1890_v7 = vadd.f32 %v5756_v8, %v1822_v31  ;;  %v4549_v16 = vsel %vm1336_vm14, %v1264_v35, 0.0  ;;  %v1997_v35 = vld [vmem:[#allocation2 + $0x71] sm:$0xff] }
 0x130   : > { %v1552_v14 = vmul.f32 %v4122_v18, %v4450_v30  ;;  %vm1338_vm2 = vcmp.ge.s32.totalorder %v5757_v17, 0  ;;  %v2487_v54 = vadd.f32 %v4440_v5, %v2448_v45  ;;  %v1891_v33 = vadd.f32 %v1859_v53, %v1823_v22  ;;  %v5758_v53 = vld [vmem:[#allocation40_spill] sm:$0xff] }
 0x131   : > { %v1553_v25 = vmul.f32 %v4122_v18, %v4446_v12  ;;  %v1620_v6 = vmul.f32 %v4146_v47, %v4500_v13  ;;  %v2488_v34 = vadd.f32 %v4440_v5, %v2449_v10  ;;  %v1958_v61 = vadd.f32 %v1926_v1, %v1890_v7  ;;  %v5759_v10 = vld [vmem:[#allocation43_spill] sm:$0xff] }
 0x132   : > { %v1621_v62 = vmul.f32 %v4146_v47, %v4492_v29  ;;  %v1688_v30 = vmul.f32 %v4149_v48, %v4549_v16  ;;  %v2519_v63 = vmax.f32 %v2487_v54, 0.0  ;;  %v1959_v36 = vadd.f32 %v1927_v15, %v1891_v33 }
 0x133   : > { %v1652_v4 = vadd.f32 %v1620_v6, %v1552_v14  ;;  %v1689_v56 = vmul.f32 %v4149_v48, %v4545_v32  ;;  %v2520_v57 = vmax.f32 %v2488_v34, 0.0  ;;  %v2314_v12 = vadd.f32 %v2282_v42, %v1958_v61  ;;  %v4578_v14 = vld [vmem:[#allocation2 + $0x69] sm:$0xff] }
 0x134   : > { %v1653_v60 = vadd.f32 %v1621_v62, %v1553_v25  ;;  %v1792_v23 = vmul.f32 %v4124_v19, %v5758_v53  ;;  %v2315_v52 = vadd.f32 %v2283_v24, %v1959_v36  ;;  %v1793_v46 = vmul.f32 %v4124_v19, %v4293_v27  ;;  %v5760_v24 = vld [vmem:[#allocation44_spill] sm:$0xff]  ;;  %v5761_v27 = vld [vmem:[#allocation26_spill] sm:$0xff] }
 0x135   : > { %v1720_v1 = vadd.f32 %v1688_v30, %v1652_v4  ;;  %v1860_v11 = vmul.f32 %v4126_v20, %v4337_v2  ;;  %v2549_v15 = vpack.c.bf16 %v2520_v57, %v2519_v63  ;;  %v2382_v41 = vadd.f32 %v2350_v49, %v2314_v12  ;;  %v1266_v25 = vld [vmem:[#allocation2 + $0x77] sm:$0xff]  ;;  %v4599_v4 = vld [vmem:[#allocation2 + $0x7f] sm:$0xff] }
 0x136   : > { %v1721_v31 = vadd.f32 %v1689_v56, %v1653_v60  ;;  %v1861_v45 = vmul.f32 %v4126_v20, %v5754_v39  ;;  %v2383_v42 = vadd.f32 %v2351_v37, %v2315_v52  ;;  %v1928_v8 = vmul.f32 %v4128_v21, %v5759_v10  ;;  %v5762_v56 = vld [vmem:[#allocation27_spill] sm:$0xff] }
 0x137   : > { %v1824_v22 = vadd.f32 %v1792_v23, %v1720_v1  ;;  %v1929_v7 = vmul.f32 %v4128_v21, %v5760_v24  ;;  %vm2107_vm3 = vcmp.lt.s32.totalorder %v5761_v27, 16  ;;  %3603 = vmatprep.mubr.bf16.mxu1 %v2549_v15  ;;  %v2450_v54 = vadd.f32 %v2418_v9, %v2382_v41 }
 0x138   : > { %v1825_v33 = vadd.f32 %v1793_v46, %v1721_v31  ;;  %v4583_v49 = vsel %vm2105_vm15, %v1997_v35, 0.0  ;;  %v2284_v37 = vmul.f32 %v4163_v59, %v4475_v50  ;;  %v2451_v6 = vadd.f32 %v2419_v51, %v2383_v42 }
 0x139   : > { %v1892_v34 = vadd.f32 %v1860_v11, %v1824_v22  ;;  %v2285_v61 = vmul.f32 %v4163_v59, %v4479_v58  ;;  %v2352_v62 = vmul.f32 %v4166_v0, %v4525_v38  ;;  %v2489_v30 = vadd.f32 %v4440_v5, %v2450_v54 }
 0x13a   : > { %v1893_v9 = vadd.f32 %v1861_v45, %v1825_v33  ;;  %v2353_v43 = vmul.f32 %v4166_v0, %v4529_v55  ;;  %v2420_v63 = vmul.f32 %v4168_v3, %v4578_v14  ;;  %v2490_v50 = vadd.f32 %v4440_v5, %v2451_v6  ;;  %v1999_v45 = vld [vmem:[#allocation2 + $0x81] sm:$0xff] }
 0x13b   : > { %v1960_v36 = vadd.f32 %v1928_v8, %v1892_v34  ;;  %v2421_v51 = vmul.f32 %v4168_v3, %v4583_v49  ;;  %v4603_v58 = vsel %vm1338_vm2, %v1266_v25, 0.0  ;;  %vm1340_vm4 = vcmp.ge.s32.totalorder %v5762_v56, 0  ;;  %v4628_v25 = vld [vmem:[#allocation2 + $0x79] sm:$0xff] }
 0x13c   : > { %v2521_v57 = vmax.f32 %v2489_v30, 0.0  ;;  %v1961_v12 = vadd.f32 %v1929_v7, %v1893_v9  ;;  %v1554_v60 = vmul.f32 %v4122_v18, %v4500_v13  ;;  %v1555_v53 = vmul.f32 %v4122_v18, %v4492_v29  ;;  %v5763_v6 = vld [vmem:[#allocation28_spill] sm:$0xff] }
 0x13d   : > { %v2522_v23 = vmax.f32 %v2490_v50, 0.0  ;;  %v2316_v52 = vadd.f32 %v2284_v37, %v1960_v36  ;;  %v1622_v1 = vmul.f32 %v4146_v47, %v4549_v16  ;;  %v1623_v17 = vmul.f32 %v4146_v47, %v4545_v32  ;;  %v1268_v50 = vld [vmem:[#allocation2 + $0x87] sm:$0xff] }
 0x13e   : > { %v2317_v46 = vadd.f32 %v2285_v61, %v1961_v12  ;;  %v1690_v11 = vmul.f32 %v4149_v48, %v4603_v58  ;;  %v1691_v35 = vmul.f32 %v4149_v48, %v4599_v4  ;;  %v1794_v13 = vmul.f32 %v4124_v19, %v4337_v2 }
 0x13f   : > { %v2550_v15 = vpack.c.bf16 %v2522_v23, %v2521_v57  ;;  %v2384_v29 = vadd.f32 %v2352_v62, %v2316_v52  ;;  %v1654_v41 = vadd.f32 %v1622_v1, %v1554_v60  ;;  %v1655_v31 = vadd.f32 %v1623_v17, %v1555_v53  ;;  %v4651_v23 = vld [vmem:[#allocation2 + $0x8f] sm:$0xff] }
 0x140   : > { %v2385_v42 = vadd.f32 %v2353_v43, %v2317_v46  ;;  %v1795_v22 = vmul.f32 %v4124_v19, %v5754_v39  ;;  %v1862_v8 = vmul.f32 %v4126_v20, %v5759_v10  ;;  %v1863_v7 = vmul.f32 %v4126_v20, %v5760_v24 }
 0x141   : > { %3604 = vmatmul.mubr.bf16.gmra.mrb[20].mxu1 %v2550_v15  ;;  %v2452_v54 = vadd.f32 %v2420_v63, %v2384_v29  ;;  %v1722_v33 = vadd.f32 %v1690_v11, %v1654_v41  ;;  %v1723_v37 = vadd.f32 %v1691_v35, %v1655_v31  ;;  %v1930_v2 = vmul.f32 %v4128_v21, %v4386_v28 }
 0x142   : > { %vm2109_vm5 = vcmp.lt.s32.totalorder %v5763_v6, 16  ;;  %v2453_v34 = vadd.f32 %v2421_v51, %v2385_v42  ;;  %v1931_v39 = vmul.f32 %v4128_v21, %v4398_v26  ;;  %v4635_v61 = vsel %vm2107_vm3, %v1999_v45, 0.0 }
 0x143   : > { %v2286_v62 = vmul.f32 %v4163_v59, %v4525_v38  ;;  %v2491_v30 = vadd.f32 %v4440_v5, %v2452_v54  ;;  %v1826_v9 = vadd.f32 %v1794_v13, %v1722_v33  ;;  %v1827_v43 = vadd.f32 %v1795_v22, %v1723_v37  ;;  %v2001_v22 = vld [vmem:[#allocation2 + $0x91] sm:$0xff] }
 0x144   : > { %v2287_v63 = vmul.f32 %v4163_v59, %v4529_v55  ;;  %v2492_v36 = vadd.f32 %v4440_v5, %v2453_v34  ;;  %v2354_v51 = vmul.f32 %v4166_v0, %v4578_v14  ;;  %v2355_v27 = vmul.f32 %v4166_v0, %v4583_v49  ;;  %v5764_v55 = vld [vmem:[#allocation30_spill] sm:$0xff] }
 0x145   : > { %v2422_v57 = vmul.f32 %v4168_v3, %v4628_v25  ;;  %v2523_v38 = vmax.f32 %v2491_v30, 0.0  ;;  %v1894_v12 = vadd.f32 %v1862_v8, %v1826_v9  ;;  %v1895_v60 = vadd.f32 %v1863_v7, %v1827_v43 }
 0x146   : > { %v2423_v53 = vmul.f32 %v4168_v3, %v4635_v61  ;;  %vm1342_vm6 = vcmp.ge.s32.totalorder %v5764_v55, 0  ;;  %v2524_v52 = vmax.f32 %v2492_v36, 0.0  ;;  %v4656_v1 = vsel %vm1340_vm4, %v1268_v50, 0.0 }
 0x147   : > { %v1556_v17 = vmul.f32 %v4122_v18, %v4549_v16  ;;  %v1557_v46 = vmul.f32 %v4122_v18, %v4545_v32  ;;  %v1962_v11 = vadd.f32 %v1930_v2, %v1894_v12  ;;  %v1963_v35 = vadd.f32 %v1931_v39, %v1895_v60  ;;  %v4680_v39 = vld [vmem:[#allocation2 + $0x89] sm:$0xff] }
 0x148   : > { %v1624_v13 = vmul.f32 %v4146_v47, %v4603_v58  ;;  %v1625_v15 = vmul.f32 %v4146_v47, %v4599_v4  ;;  %v2551_v29 = vpack.c.bf16 %v2524_v52, %v2523_v38  ;;  %v1692_v56 = vmul.f32 %v4149_v48, %v4656_v1  ;;  %v5766_v52 = vld [vmem:[#allocation29_spill] sm:$0xff] }
 0x149   : > { %v1693_v41 = vmul.f32 %v4149_v48, %v4651_v23  ;;  %v1796_v16 = vmul.f32 %v4124_v19, %v5759_v10  ;;  %v2318_v31 = vadd.f32 %v2286_v62, %v1962_v11  ;;  %v2319_v32 = vadd.f32 %v2287_v63, %v1963_v35  ;;  %v5765_v62 = vld [vmem:[#allocation31_spill] sm:$0xff] }
 0x14a   : > { %v1656_v45 = vadd.f32 %v1624_v13, %v1556_v17  ;;  %v1657_v42 = vadd.f32 %v1625_v15, %v1557_v46  ;;  %3607 = vmatprep.mubr.bf16.mxu1 %v2551_v29  ;;  %v1797_v8 = vmul.f32 %v4124_v19, %v5760_v24  ;;  %v1864_v7 = vmul.f32 %v4126_v20, %v4386_v28 }
 0x14b   : > { %v1865_v54 = vmul.f32 %v4126_v20, %v4398_v26  ;;  %v1932_v33 = vmul.f32 %v4128_v21, %v4380_v44  ;;  %v2386_v37 = vadd.f32 %v2354_v51, %v2318_v31  ;;  %v2387_v10 = vadd.f32 %v2355_v27, %v2319_v32  ;;  %v1270_v27 = vld [vmem:[#allocation2 + $0x97] sm:$0xff] }
 0x14c   : > { %v1724_v2 = vadd.f32 %v1692_v56, %v1656_v45  ;;  %v1725_v34 = vadd.f32 %v1693_v41, %v1657_v42  ;;  %vm2111_vm7 = vcmp.lt.s32.totalorder %v5765_v62, 16  ;;  %v1933_v24 = vmul.f32 %v4128_v21, %v4392_v40  ;;  %v4714_v41 = vld [vmem:[#allocation2 + $0x9f] sm:$0xff] }
 0x14d   : > { %v4687_v30 = vsel %vm2109_vm5, %v2001_v22, 0.0  ;;  %v2288_v9 = vmul.f32 %v4163_v59, %v4578_v14  ;;  %v2289_v43 = vmul.f32 %v4163_v59, %v4583_v49  ;;  %v2454_v63 = vadd.f32 %v2422_v57, %v2386_v37 }
 0x14e   : > { %v2455_v50 = vadd.f32 %v2423_v53, %v2387_v10  ;;  %v1828_v36 = vadd.f32 %v1796_v16, %v1724_v2  ;;  %v1829_v51 = vadd.f32 %v1797_v8, %v1725_v34  ;;  %v2356_v38 = vmul.f32 %v4166_v0, %v4628_v25  ;;  %v2003_v8 = vld [vmem:[#allocation2 + $0xa1] sm:$0xff] }
 0x14f   : > { %v2357_v12 = vmul.f32 %v4166_v0, %v4635_v61  ;;  %v2424_v6 = vmul.f32 %v4168_v3, %v4680_v39  ;;  %v2425_v14 = vmul.f32 %v4168_v3, %v4687_v30  ;;  %v2493_v60 = vadd.f32 %v4440_v5, %v2454_v63  ;;  %v4730_v34 = vld [vmem:[#allocation2 + $0xa0] sm:$0xff] }
 0x150   : > { %v2494_v49 = vadd.f32 %v4440_v5, %v2455_v50  ;;  %v1896_v57 = vadd.f32 %v1864_v7, %v1828_v36  ;;  %v1897_v53 = vadd.f32 %v1865_v54, %v1829_v51  ;;  %vm1344_vm8 = vcmp.ge.s32.totalorder %v5766_v52, 0  ;;  %v5767_v36 = vld [vmem:[#allocation33_spill] sm:$0xff] }
 0x151   : > { %v4706_v17 = vsel %vm1342_vm6, %v1270_v27, 0.0  ;;  %v1558_v46 = vmul.f32 %v4122_v18, %v4603_v58  ;;  %v1559_v11 = vmul.f32 %v4122_v18, %v4599_v4  ;;  %v1626_v35 = vmul.f32 %v4146_v47, %v4656_v1  ;;  %v4722_v4 = vld [vmem:[#allocation2 + $0x98] sm:$0xff] }
 0x152   : > { %v2525_v13 = vmax.f32 %v2493_v60, 0.0  ;;  %v2526_v15 = vmax.f32 %v2494_v49, 0.0  ;;  %v1964_v29 = vadd.f32 %v1932_v33, %v1896_v57  ;;  %v1965_v56 = vadd.f32 %v1933_v24, %v1897_v53  ;;  %v1272_v60 = vld [vmem:[#allocation2 + $0xa7] sm:$0xff] }
 0x153   : > { %v1627_v55 = vmul.f32 %v4146_v47, %v4651_v23  ;;  %v1658_v16 = vadd.f32 %v1626_v35, %v1558_v46  ;;  %v1694_v31 = vmul.f32 %v4149_v48, %v4706_v17  ;;  %v1695_v58 = vmul.f32 %v4149_v48, %v4714_v41 }
 0x154   : > { %v2552_v32 = vpack.c.bf16 %v2526_v15, %v2525_v13  ;;  %v2320_v45 = vadd.f32 %v2288_v9, %v1964_v29  ;;  %v2321_v42 = vadd.f32 %v2289_v43, %v1965_v56  ;;  %v1798_v22 = vmul.f32 %v4124_v19, %v4386_v28 }
 0x155   : > { %v1659_v7 = vadd.f32 %v1627_v55, %v1559_v11  ;;  %v1726_v54 = vadd.f32 %v1694_v31, %v1658_v16  ;;  %v1799_v33 = vmul.f32 %v4124_v19, %v4398_v26  ;;  %v1866_v37 = vmul.f32 %v4126_v20, %v4380_v44  ;;  %v4738_v26 = vld [vmem:[#allocation2 + $0x99] sm:$0xff] }
 0x156   : > { %3608 = vmatmul.mubr.bf16.gmra.mrb[24].mxu1 %v2552_v32  ;;  %v2388_v10 = vadd.f32 %v2356_v38, %v2320_v45  ;;  %v2389_v2 = vadd.f32 %v2357_v12, %v2321_v42  ;;  %v1867_v24 = vmul.f32 %v4126_v20, %v4392_v40  ;;  %v1934_v28 = vmul.f32 %v4128_v21, %v4722_v4  ;;  %v4770_v32 = vld [vmem:[#allocation2 + $0xaf] sm:$0xff] }
 0x157   : > { %v1727_v9 = vadd.f32 %v1695_v58, %v1659_v7  ;;  %v1830_v43 = vadd.f32 %v1798_v22, %v1726_v54  ;;  %v1935_v63 = vmul.f32 %v4128_v21, %v4730_v34  ;;  %v4742_v50 = vsel %vm2111_vm7, %v2003_v8, 0.0 }
 0x158   : > { %vm2113_vm9 = vcmp.lt.s32.totalorder %v5767_v36, 16  ;;  %v2456_v51 = vadd.f32 %v2424_v6, %v2388_v10  ;;  %v2457_v27 = vadd.f32 %v2425_v14, %v2389_v2  ;;  %v2290_v38 = vmul.f32 %v4163_v59, %v4628_v25  ;;  %v2005_v10 = vld [vmem:[#allocation2 + $0xb1] sm:$0xff] }
 0x159   : > { %v2291_v12 = vmul.f32 %v4163_v59, %v4635_v61  ;;  %v1831_v49 = vadd.f32 %v1799_v33, %v1727_v9  ;;  %v1898_v57 = vadd.f32 %v1866_v37, %v1830_v43  ;;  %v2358_v53 = vmul.f32 %v4166_v0, %v4680_v39  ;;  %v5768_v61 = vld [vmem:[#allocation32_spill] sm:$0xff]  ;;  %v4780_v33 = vld [vmem:[#allocation2 + $0xa8] sm:$0xff] }
 0x15a   : > { %v2359_v62 = vmul.f32 %v4166_v0, %v4687_v30  ;;  %v2495_v46 = vadd.f32 %v4440_v5, %v2456_v51  ;;  %v2496_v6 = vadd.f32 %v4440_v5, %v2457_v27  ;;  %v2426_v14 = vmul.f32 %v4168_v3, %v4738_v26  ;;  %v4794_v27 = vld [vmem:[#allocation2 + $0xa9] sm:$0xff] }
 0x15b   : > { %v2427_v25 = vmul.f32 %v4168_v3, %v4742_v50  ;;  %vm1346_vm10 = vcmp.ge.s32.totalorder %v5768_v61, 0  ;;  %v1899_v11 = vadd.f32 %v1867_v24, %v1831_v49  ;;  %v1966_v35 = vadd.f32 %v1934_v28, %v1898_v57  ;;  %v4784_v24 = vld [vmem:[#allocation2 + $0xb0] sm:$0xff] }
 0x15c   : > { %v4762_v13 = vsel %vm1344_vm8, %v1272_v60, 0.0  ;;  %v1560_v15 = vmul.f32 %v4122_v18, %v4656_v1  ;;  %v2527_v29 = vmax.f32 %v2495_v46, 0.0  ;;  %v2528_v56 = vmax.f32 %v2496_v6, 0.0 }
 0x15d   : > { %v1561_v55 = vmul.f32 %v4122_v18, %v4651_v23  ;;  %v1628_v16 = vmul.f32 %v4146_v47, %v4706_v17  ;;  %v1967_v31 = vadd.f32 %v1935_v63, %v1899_v11  ;;  %v2322_v58 = vadd.f32 %v2290_v38, %v1966_v35  ;;  %v5769_v38 = vld [vmem:[#allocation35_spill] sm:$0xff] }
 0x15e   : > { %v1629_v52 = vmul.f32 %v4146_v47, %v4714_v41  ;;  %v1696_v45 = vmul.f32 %v4149_v48, %v4762_v13  ;;  %v2553_v42 = vpack.c.bf16 %v2528_v56, %v2527_v29  ;;  %v1697_v22 = vmul.f32 %v4149_v48, %v4770_v32  ;;  %v4816_v56 = vld [vmem:[#allocation2 + $0xbf] sm:$0xff] }
 0x15f   : > { %v1660_v1 = vadd.f32 %v1628_v16, %v1560_v15  ;;  %v1800_v23 = vmul.f32 %v4124_v19, %v4380_v44  ;;  %v2323_v8 = vadd.f32 %v2291_v12, %v1967_v31  ;;  %v2390_v7 = vadd.f32 %v2358_v53, %v2322_v58  ;;  %v1274_v53 = vld [vmem:[#allocation2 + $0xb7] sm:$0xff] }
 0x160   : > { %v1661_v54 = vadd.f32 %v1629_v52, %v1561_v55  ;;  %v1801_v37 = vmul.f32 %v4124_v19, %v4392_v40  ;;  %3611 = vmatprep.mubr.bf16.mxu1 %v2553_v42  ;;  %v1868_v28 = vmul.f32 %v4126_v20, %v4722_v4  ;;  %v1869_v9 = vmul.f32 %v4126_v20, %v4730_v34  ;;  %v5770_v15 = vld [vmem:[#allocation34_spill] sm:$0xff] }
 0x161   : > { %v1728_v2 = vadd.f32 %v1696_v45, %v1660_v1  ;;  %v1936_v44 = vmul.f32 %v4128_v21, %v4780_v33  ;;  %v2391_v43 = vadd.f32 %v2359_v62, %v2323_v8  ;;  %v2458_v63 = vadd.f32 %v2426_v14, %v2390_v7 }
 0x162   : > { %v1729_v51 = vadd.f32 %v1697_v22, %v1661_v54  ;;  %v1937_v40 = vmul.f32 %v4128_v21, %v4784_v24  ;;  %vm2115_vm11 = vcmp.lt.s32.totalorder %v5769_v38, 16  ;;  %v4799_v60 = vsel %vm2113_vm9, %v2005_v10, 0.0 }
 0x163   : > { %v1832_v12 = vadd.f32 %v1800_v23, %v1728_v2  ;;  %v2292_v49 = vmul.f32 %v4163_v59, %v4680_v39  ;;  %v2293_v57 = vmul.f32 %v4163_v59, %v4687_v30  ;;  %v2459_v62 = vadd.f32 %v2427_v25, %v2391_v43  ;;  %v2007_v2 = vld [vmem:[#allocation2 + $0xc1] sm:$0xff] }
 0x164   : > { %v2497_v46 = vadd.f32 %v4440_v5, %v2458_v63  ;;  %v1833_v6 = vadd.f32 %v1801_v37, %v1729_v51  ;;  %v2360_v14 = vmul.f32 %v4166_v0, %v4738_v26  ;;  %v2361_v36 = vmul.f32 %v4166_v0, %v4742_v50 }
 0x165   : > { %v1900_v11 = vadd.f32 %v1868_v28, %v1832_v12  ;;  %v2428_v35 = vmul.f32 %v4168_v3, %v4794_v27  ;;  %v2429_v39 = vmul.f32 %v4168_v3, %v4799_v60  ;;  %vm1348_vm12 = vcmp.ge.s32.totalorder %v5770_v15, 0  ;;  %v5771_v12 = vld [vmem:[#allocation36_spill] sm:$0xff] }
 0x166   : > { %v2498_v30 = vadd.f32 %v4440_v5, %v2459_v62  ;;  %v2529_v25 = vmax.f32 %v2497_v46, 0.0  ;;  %v1901_v29 = vadd.f32 %v1869_v9, %v1833_v6  ;;  %v4820_v55 = vsel %vm1346_vm10, %v1274_v53, 0.0  ;;  %v1276_v46 = vld [vmem:[#allocation2 + $0xc7] sm:$0xff] }
 0x167   : > { %v1968_v16 = vadd.f32 %v1936_v44, %v1900_v11  ;;  %v1562_v31 = vmul.f32 %v4122_v18, %v4706_v17  ;;  %v1563_v58 = vmul.f32 %v4122_v18, %v4714_v41  ;;  %v1630_v52 = vmul.f32 %v4146_v47, %v4762_v13  ;;  %v4834_v17 = vld [vmem:[#allocation2 + $0xc0] sm:$0xff]  ;;  %v4840_v44 = vld [vmem:[#allocation2 + $0xb8] sm:$0xff] }
 0x168   : > { %v2530_v45 = vmax.f32 %v2498_v30, 0.0  ;;  %v1969_v42 = vadd.f32 %v1937_v40, %v1901_v29  ;;  %v1631_v1 = vmul.f32 %v4146_v47, %v4770_v32  ;;  %v1698_v61 = vmul.f32 %v4149_v48, %v4820_v55  ;;  %v4857_v11 = vld [vmem:[#allocation2 + $0xb9] sm:$0xff] }
 0x169   : > { %v2324_v22 = vadd.f32 %v2292_v49, %v1968_v16  ;;  %v1662_v23 = vadd.f32 %v1630_v52, %v1562_v31  ;;  %v1699_v8 = vmul.f32 %v4149_v48, %v4816_v56  ;;  %v1802_v41 = vmul.f32 %v4124_v19, %v4722_v4  ;;  %v4871_v31 = vld [vmem:[#allocation2 + $0xcf] sm:$0xff] }
 0x16a   : > { %v2554_v7 = vpack.c.bf16 %v2530_v45, %v2529_v25  ;;  %v2325_v54 = vadd.f32 %v2293_v57, %v1969_v42  ;;  %v1663_v37 = vadd.f32 %v1631_v1, %v1563_v58  ;;  %v1803_v10 = vmul.f32 %v4124_v19, %v4730_v34  ;;  %v5772_v58 = vld [vmem:[#allocation37_spill] sm:$0xff] }
 0x16b   : > { %v2392_v28 = vadd.f32 %v2360_v14, %v2324_v22  ;;  %v1730_v9 = vadd.f32 %v1698_v61, %v1662_v23  ;;  %v1870_v43 = vmul.f32 %v4126_v20, %v4780_v33  ;;  %v1871_v63 = vmul.f32 %v4126_v20, %v4784_v24 }
 0x16c   : > { %3612 = vmatmul.mubr.bf16.gmra.mrb[28].mxu1 %v2554_v7  ;;  %v2393_v51 = vadd.f32 %v2361_v36, %v2325_v54  ;;  %v1731_v4 = vadd.f32 %v1699_v8, %v1663_v37  ;;  %v1938_v40 = vmul.f32 %v4128_v21, %v4840_v44  ;;  %v1939_v34 = vmul.f32 %v4128_v21, %v4834_v17  ;;  %v4890_v54 = vld [vmem:[#allocation2 + $0xc8] sm:$0xff] }
 0x16d   : > { %vm2117_vm13 = vcmp.lt.s32.totalorder %v5771_v12, 16  ;;  %v2460_v49 = vadd.f32 %v2428_v35, %v2392_v28  ;;  %v1834_v57 = vadd.f32 %v1802_v41, %v1730_v9  ;;  %v4853_v53 = vsel %vm2115_vm11, %v2007_v2, 0.0  ;;  %v4894_v28 = vld [vmem:[#allocation2 + $0xd0] sm:$0xff] }
 0x16e   : > { %v2294_v62 = vmul.f32 %v4163_v59, %v4738_v26  ;;  %v2461_v6 = vadd.f32 %v2429_v39, %v2393_v51  ;;  %v1835_v14 = vadd.f32 %v1803_v10, %v1731_v4  ;;  %v2295_v36 = vmul.f32 %v4163_v59, %v4742_v50  ;;  %v2009_v9 = vld [vmem:[#allocation2 + $0xd1] sm:$0xff] }
 0x16f   : > { %v2362_v30 = vmul.f32 %v4166_v0, %v4794_v27  ;;  %v2499_v35 = vadd.f32 %v4440_v5, %v2460_v49  ;;  %v1902_v25 = vadd.f32 %v1870_v43, %v1834_v57  ;;  %v2363_v38 = vmul.f32 %v4166_v0, %v4799_v60  ;;  %v4904_v57 = vld [vmem:[#allocation2 + $0xc9] sm:$0xff] }
 0x170   : > { %v2430_v26 = vmul.f32 %v4168_v3, %v4857_v11  ;;  %v2500_v39 = vadd.f32 %v4440_v5, %v2461_v6  ;;  %v1903_v29 = vadd.f32 %v1871_v63, %v1835_v14  ;;  %v2431_v16 = vmul.f32 %v4168_v3, %v4853_v53 }
 0x171   : > { %v4875_v50 = vsel %vm1348_vm12, %v1276_v46, 0.0  ;;  %vm1350_vm14 = vcmp.ge.s32.totalorder %v5772_v58, 0  ;;  %v2531_v52 = vmax.f32 %v2499_v35, 0.0  ;;  %v1970_v45 = vadd.f32 %v1938_v40, %v1902_v25  ;;  %v1278_v25 = vld [vmem:[#allocation2 + $0xd7] sm:$0xff] }
 0x172   : > { %v1564_v42 = vmul.f32 %v4122_v18, %v4762_v13  ;;  %v1565_v1 = vmul.f32 %v4122_v18, %v4770_v32  ;;  %v2532_v61 = vmax.f32 %v2500_v39, 0.0  ;;  %v1971_v22 = vadd.f32 %v1939_v34, %v1903_v29 }
 0x173   : > { %v1632_v23 = vmul.f32 %v4146_v47, %v4820_v55  ;;  %v1633_v15 = vmul.f32 %v4146_v47, %v4816_v56  ;;  %v2326_v8 = vadd.f32 %v2294_v62, %v1970_v45  ;;  %v1700_v41 = vmul.f32 %v4149_v48, %v4875_v50 }
 0x174   : > { %v1701_v7 = vmul.f32 %v4149_v48, %v4871_v31  ;;  %v1804_v13 = vmul.f32 %v4124_v19, %v4780_v33  ;;  %v2555_v32 = vpack.c.bf16 %v2532_v61, %v2531_v52  ;;  %v2327_v37 = vadd.f32 %v2295_v36, %v1971_v22  ;;  %v5773_v22 = vld [vmem:[#allocation38_spill] sm:$0xff] }
 0x175   : > { %v1664_v10 = vadd.f32 %v1632_v23, %v1564_v42  ;;  %v1665_v2 = vadd.f32 %v1633_v15, %v1565_v1  ;;  %v2394_v43 = vadd.f32 %v2362_v30, %v2326_v8  ;;  %v1805_v63 = vmul.f32 %v4124_v19, %v4784_v24 }
 0x176   : > { %v1872_v51 = vmul.f32 %v4126_v20, %v4840_v44  ;;  %v1873_v4 = vmul.f32 %v4126_v20, %v4834_v17  ;;  %3615 = vmatprep.mubr.bf16.mxu1 %v2555_v32  ;;  %v2395_v40 = vadd.f32 %v2363_v38, %v2327_v37  ;;  %v1940_v49 = vmul.f32 %v4128_v21, %v4890_v54 }
 0x177   : > { %v1732_v33 = vadd.f32 %v1700_v41, %v1664_v10  ;;  %v1733_v34 = vadd.f32 %v1701_v7, %v1665_v2  ;;  %v2462_v62 = vadd.f32 %v2430_v26, %v2394_v43  ;;  %v1941_v46 = vmul.f32 %v4128_v21, %v4894_v28 }
 0x178   : > { %v4910_v24 = vsel %vm2117_vm13, %v2009_v9, 0.0  ;;  %v2296_v6 = vmul.f32 %v4163_v59, %v4794_v27  ;;  %v2463_v14 = vadd.f32 %v2431_v16, %v2395_v40  ;;  %v2297_v35 = vmul.f32 %v4163_v59, %v4799_v60  ;;  %v4926_v60 = vld [vmem:[#allocation2 + $0xdf] sm:$0xff] }
 0x179   : > { %v1836_v36 = vadd.f32 %v1804_v13, %v1732_v33  ;;  %v1837_v30 = vadd.f32 %v1805_v63, %v1733_v34  ;;  %v2501_v38 = vadd.f32 %v4440_v5, %v2462_v62  ;;  %v2364_v26 = vmul.f32 %v4166_v0, %v4857_v11  ;;  %v4945_v13 = vld [vmem:[#allocation2 + $0xd8] sm:$0xff]  ;;  %v4949_v9 = vld [vmem:[#allocation2 + $0xe0] sm:$0xff] }
 0x17a   : > { %v2365_v12 = vmul.f32 %v4166_v0, %v4853_v53  ;;  %v2432_v39 = vmul.f32 %v4168_v3, %v4904_v57  ;;  %v2502_v27 = vadd.f32 %v4440_v5, %v2463_v14  ;;  %v2433_v52 = vmul.f32 %v4168_v3, %v4910_v24 }
 0x17b   : > { %v1904_v29 = vadd.f32 %v1872_v51, %v1836_v36  ;;  %v1905_v16 = vadd.f32 %v1873_v4, %v1837_v30  ;;  %v2533_v45 = vmax.f32 %v2501_v38, 0.0  ;;  %v4930_v42 = vsel %vm1350_vm14, %v1278_v25, 0.0  ;;  %v4965_v38 = vld [vmem:[#allocation2 + $0xd9] sm:$0xff] }
 0x17c   : > { %v1566_v1 = vmul.f32 %v4122_v18, %v4820_v55  ;;  %v1567_v61 = vmul.f32 %v4122_v18, %v4816_v56  ;;  %vm1352_vm15 = vcmp.ge.s32.totalorder %v5773_v22, 0  ;;  %v2534_v23 = vmax.f32 %v2502_v27, 0.0 }
 0x17d   : > { %v1972_v15 = vadd.f32 %v1940_v49, %v1904_v29  ;;  %v1973_v8 = vadd.f32 %v1941_v46, %v1905_v16  ;;  %v1634_v41 = vmul.f32 %v4146_v47, %v4875_v50  ;;  %v1635_v7 = vmul.f32 %v4146_v47, %v4871_v31  ;;  %v2011_v46 = vld [vmem:[#allocation2 + $0xe1] sm:$0xff] }
 0x17e   : > { %v1702_v58 = vmul.f32 %v4149_v48, %v4930_v42  ;;  %v1703_v55 = vmul.f32 %v4149_v48, %v4926_v60  ;;  %v1806_v56 = vmul.f32 %v4124_v19, %v4840_v44  ;;  %v2556_v32 = vpack.c.bf16 %v2534_v23, %v2533_v45  ;;  %v1280_v16 = vld [vmem:[#allocation2 + $0xe7] sm:$0xff] }
 0x17f   : > { %v2328_v37 = vadd.f32 %v2296_v6, %v1972_v15  ;;  %v2329_v10 = vadd.f32 %v2297_v35, %v1973_v8  ;;  %v1666_v2 = vadd.f32 %v1634_v41, %v1566_v1  ;;  %v1667_v43 = vadd.f32 %v1635_v7, %v1567_v61  ;;  %v5774_v6 = vld [vmem:[#allocation39_spill] sm:$0xff]  ;;  %v5776_v23 = vld [vmem:[#allocation41_spill] sm:$0xff] }
 0x180   : > { %v1807_v63 = vmul.f32 %v4124_v19, %v4834_v17  ;;  %v1874_v51 = vmul.f32 %v4126_v20, %v4890_v54  ;;  %v1875_v4 = vmul.f32 %v4126_v20, %v4894_v28  ;;  %3616 = vmatmul.mubr.bf16.gmra.mrb[32].mxu1 %v2556_v32  ;;  %v1942_v34 = vmul.f32 %v4128_v21, %v4945_v13 }
 0x181   : > { %v2396_v40 = vadd.f32 %v2364_v26, %v2328_v37  ;;  %v2397_v33 = vadd.f32 %v2365_v12, %v2329_v10  ;;  %v1734_v44 = vadd.f32 %v1702_v58, %v1666_v2  ;;  %v1735_v49 = vadd.f32 %v1703_v55, %v1667_v43  ;;  %v4982_v58 = vld [vmem:[#allocation2 + $0xef] sm:$0xff] }
 0x182   : > { %v1943_v62 = vmul.f32 %v4128_v21, %v4949_v9  ;;  %v5775_v17 = vand.u32 15, %v5774_v6  ;;  %v2298_v36 = vmul.f32 %v4163_v59, %v4857_v11  ;;  %v2299_v26 = vmul.f32 %v4163_v59, %v4853_v53 }
 0x183   : > { %v2464_v30 = vadd.f32 %v2432_v39, %v2396_v40  ;;  %v2465_v35 = vadd.f32 %v2433_v52, %v2397_v33  ;;  %v1838_v25 = vadd.f32 %v1806_v56, %v1734_v44  ;;  %v1839_v12 = vadd.f32 %v1807_v63, %v1735_v49  ;;  %v5004_v44 = vld [vmem:[#allocation2 + $0xf0] sm:$0xff] }
 0x184   : > { %v2047_v14 = vadd.s32 1, %v5775_v17  ;;  %v2366_v27 = vmul.f32 %v4166_v0, %v4904_v57  ;;  %v2367_v29 = vmul.f32 %v4166_v0, %v4910_v24  ;;  %v2434_v53 = vmul.f32 %v4168_v3, %v4965_v38 }
 0x185   : > { %v2503_v45 = vadd.f32 %v4440_v5, %v2464_v30  ;;  %v2504_v11 = vadd.f32 %v4440_v5, %v2465_v35  ;;  %v1906_v39 = vadd.f32 %v1874_v51, %v1838_v25  ;;  %v1907_v1 = vadd.f32 %v1875_v4, %v1839_v12 }
 0x186   : > { %vm2119_vm2 = vcmp.lt.s32.totalorder %v2047_v14, 16  ;;  %v1027_v15 = vand.u32 15, %v5776_v23  ;;  %v4986_v5 = vsel %vm1352_vm15, %v1280_v16, 0.0  ;;  %v1568_v56 = vmul.f32 %v4122_v18, %v4875_v50  ;;  %v5000_v50 = vld [vmem:[#allocation2 + $0xe8] sm:$0xff] }
 0x187   : > { %v4975_v52 = vsel %vm2119_vm2, %v2011_v46, 0.0  ;;  %v2535_v8 = vmax.f32 %v2503_v45, 0.0  ;;  %v2536_v41 = vmax.f32 %v2504_v11, 0.0  ;;  %v1974_v7 = vadd.f32 %v1942_v34, %v1906_v39 }
 0x188   : > { %v2435_v61 = vmul.f32 %v4168_v3, %v4975_v52  ;;  %v1975_v55 = vadd.f32 %v1943_v62, %v1907_v1  ;;  %v1569_v32 = vmul.f32 %v4122_v18, %v4871_v31  ;;  %v1636_v37 = vmul.f32 %v4146_v47, %v4930_v42 }
 0x189   : > { %v2557_v10 = vpack.c.bf16 %v2536_v41, %v2535_v8  ;;  %v2330_v2 = vadd.f32 %v2298_v36, %v1974_v7  ;;  %v1637_v43 = vmul.f32 %v4146_v47, %v4926_v60  ;;  %v1704_v22 = vmul.f32 %v4149_v48, %v4986_v5  ;;  %v2013_v36 = vld [vmem:[#allocation2 + $0xf1] sm:$0xff] }
 0x18a   : > { %v2331_v63 = vadd.f32 %v2299_v26, %v1975_v55  ;;  %v1668_v51 = vadd.f32 %v1636_v37, %v1568_v56  ;;  %v1705_v4 = vmul.f32 %v4149_v48, %v4982_v58  ;;  %v1808_v31 = vmul.f32 %v4124_v19, %v4890_v54  ;;  %v5016_v26 = vld [vmem:[#allocation2 + $0xe9] sm:$0xff]  ;;  %v5039_v56 = vld [vmem:[#allocation2 + $0xff] sm:$0xff] }
 0x18b   : > { %3619 = vmatprep.mubr.bf16.mxu1 %v2557_v10  ;;  %v2398_v40 = vadd.f32 %v2366_v27, %v2330_v2  ;;  %v1669_v33 = vadd.f32 %v1637_v43, %v1569_v32  ;;  %v1809_v34 = vmul.f32 %v4124_v19, %v4894_v28  ;;  %v1876_v46 = vmul.f32 %v4126_v20, %v4945_v13  ;;  %v5023_v27 = vld [vmem:[%s5640_s4] ss:$0 sm:$0xff]  ;;  %v5777_v7 = vld [vmem:[#allocation22_spill] sm:$0xff] }
 0x18c   : > { %v2399_v49 = vadd.f32 %v2367_v29, %v2331_v63  ;;  %v1736_v62 = vadd.f32 %v1704_v22, %v1668_v51  ;;  %v1877_v6 = vmul.f32 %v4126_v20, %v4949_v9  ;;  %v1944_v54 = vmul.f32 %v4128_v21, %v5000_v50 }
 0x18d   : > { %v2466_v17 = vadd.f32 %v2434_v53, %v2398_v40  ;;  %v1737_v14 = vadd.f32 %v1705_v4, %v1669_v33  ;;  %v2049_v30 = vadd.s32 1, %v1027_v15  ;;  %v1945_v28 = vmul.f32 %v4128_v21, %v5004_v44 }
 0x18e   : > { %v2467_v35 = vadd.f32 %v2435_v61, %v2399_v49  ;;  %v1840_v25 = vadd.f32 %v1808_v31, %v1736_v62  ;;  %v2300_v12 = vmul.f32 %v4163_v59, %v4904_v57  ;;  %v2301_v45 = vmul.f32 %v4163_v59, %v4910_v24 }
 0x18f   : > { %v2505_v29 = vadd.f32 %v5023_v27, %v2466_v17  ;;  %v1841_v16 = vadd.f32 %v1809_v34, %v1737_v14  ;;  %vm2121_vm3 = vcmp.lt.s32.totalorder %v2049_v30, 16  ;;  %v2368_v57 = vmul.f32 %v4166_v0, %v4965_v38  ;;  %v5055_v17 = vld [vmem:[#allocation2 + $0x100] sm:$0xff] }
 0x190   : > { %v2506_v11 = vadd.f32 %v5023_v27, %v2467_v35  ;;  %v1908_v39 = vadd.f32 %v1876_v46, %v1840_v25  ;;  %v5029_v1 = vsel %vm2121_vm3, %v2013_v36, 0.0  ;;  %v2369_v23 = vmul.f32 %v4166_v0, %v4975_v52 }
 0x191   : > { %v2537_v53 = vmax.f32 %v2505_v29, 0.0  ;;  %v1909_v61 = vadd.f32 %v1877_v6, %v1841_v16  ;;  %v2436_v15 = vmul.f32 %v4168_v3, %v5016_v26  ;;  %v814_v24 = vadd.s32 240, %v5777_v7  ;;  %v5053_v6 = vld [vmem:[#allocation2 + $0xf8] sm:$0xff] }
 0x192   : > { %v2538_v8 = vmax.f32 %v2506_v11, 0.0  ;;  %v1976_v41 = vadd.f32 %v1944_v54, %v1908_v39  ;;  %v815_v55 = vadd.s32 248, %v5777_v7  ;;  %v1570_v37 = vmul.f32 %v4122_v18, %v4930_v42  ;;  %v2015_v11 = vld [vmem:[#allocation2 + $0x101] sm:$0xff] }
 0x193   : > { %v1977_v32 = vadd.f32 %v1945_v28, %v1909_v61  ;;  %v1571_v10 = vmul.f32 %v4122_v18, %v4926_v60  ;;  %v1638_v2 = vmul.f32 %v4146_v47, %v4986_v5  ;;  %v2437_v63 = vmul.f32 %v4168_v3, %v5029_v1  ;;  %v1282_v60 = vld [vmem:[#allocation2 + $0xf7] sm:$0xff] }
 0x194   : > { %v2558_v43 = vpack.c.bf16 %v2538_v8, %v2537_v53  ;;  %v2332_v22 = vadd.f32 %v2300_v12, %v1976_v41  ;;  %v1034_v51 = vand.u32 15, %v814_v24  ;;  %v1041_v31 = vand.u32 15, %v815_v55  ;;  %v5081_v55 = vld [vmem:[#allocation2 + $0xf9] sm:$0xff] }
 0x195   : > { %v2333_v4 = vadd.f32 %v2301_v45, %v1977_v32  ;;  %v1639_v40 = vmul.f32 %v4146_v47, %v4982_v58  ;;  %v1707_v42 = vmul.f32 %v4149_v48, %v5039_v56  ;;  %v1670_v49 = vadd.f32 %v1638_v2, %v1570_v37 }
 0x196   : > { %3620 = vmatmul.mubr.bf16.gmra.mrb[36].mxu1 %v2558_v43  ;;  %v2400_v33 = vadd.f32 %v2368_v57, %v2332_v22  ;;  %v1318_v34 = vadd.s32 4294967295, %v1034_v51  ;;  %v1810_v14 = vmul.f32 %v4124_v19, %v4945_v13  ;;  %v1811_v54 = vmul.f32 %v4124_v19, %v4949_v9  ;;  %v5089_v43 = vld [vmem:[#allocation2 + $0x10f] sm:$0xff] }
 0x197   : > { %v2401_v62 = vadd.f32 %v2369_v23, %v2333_v4  ;;  %v1671_v46 = vadd.f32 %v1639_v40, %v1571_v10  ;;  %v1878_v30 = vmul.f32 %v4126_v20, %v5000_v50  ;;  %v1879_v35 = vmul.f32 %v4126_v20, %v5004_v44 }
 0x198   : > { %v2468_v36 = vadd.f32 %v2436_v15, %v2400_v33  ;;  %vm1354_vm4 = vcmp.ge.s32.totalorder %v1318_v34, 0  ;;  %v2051_v29 = vadd.s32 1, %v1041_v31  ;;  %v1946_v9 = vmul.f32 %v4128_v21, %v5053_v6 }
 0x199   : > { %v2469_v25 = vadd.f32 %v2437_v63, %v2401_v62  ;;  %v5065_v28 = vsel %vm1354_vm4, %v1282_v60, 0.0  ;;  %v1739_v12 = vadd.f32 %v1707_v42, %v1671_v46  ;;  %v1947_v45 = vmul.f32 %v4128_v21, %v5055_v17  ;;  %v1284_v62 = vld [vmem:[#allocation2 + $0x107] sm:$0xff] }
 0x19a   : > { %v2507_v16 = vadd.f32 %v5023_v27, %v2468_v36  ;;  %v1706_v13 = vmul.f32 %v4149_v48, %v5065_v28  ;;  %vm2123_vm5 = vcmp.lt.s32.totalorder %v2051_v29, 16  ;;  %v2302_v53 = vmul.f32 %v4163_v59, %v4965_v38 }
 0x19b   : > { %v2508_v39 = vadd.f32 %v5023_v27, %v2469_v25  ;;  %v1843_v57 = vadd.f32 %v1811_v54, %v1739_v12  ;;  %v2303_v15 = vmul.f32 %v4163_v59, %v4975_v52  ;;  %v2370_v8 = vmul.f32 %v4166_v0, %v5016_v26  ;;  %v5105_v54 = vld [vmem:[#allocation2 + $0x108] sm:$0xff]  ;;  %v1777_v25 = vld [vmem:[#allocation2 + $0x110] sm:$0xff] }
 0x19c   : > { %v2539_v61 = vmax.f32 %v2507_v16, 0.0  ;;  %v1738_v23 = vadd.f32 %v1706_v13, %v1670_v49  ;;  %v5083_v32 = vsel %vm2123_vm5, %v2015_v11, 0.0  ;;  %v2371_v37 = vmul.f32 %v4166_v0, %v5029_v1 }
 0x19d   : > { %v2540_v41 = vmax.f32 %v2508_v39, 0.0  ;;  %v1911_v24 = vadd.f32 %v1879_v35, %v1843_v57  ;;  %v816_v38 = vadd.s32 256, %v5777_v7  ;;  %v817_v2 = vadd.s32 264, %v5777_v7 }
 0x19e   : > { %v1842_v10 = vadd.f32 %v1810_v14, %v1738_v23  ;;  %v1572_v52 = vmul.f32 %v4122_v18, %v4986_v5  ;;  %v1573_v51 = vmul.f32 %v4122_v18, %v4982_v58  ;;  %v1640_v4 = vmul.f32 %v4146_v47, %v5065_v28 }
 0x19f   : > { %v2559_v22 = vpack.c.bf16 %v2540_v41, %v2539_v61  ;;  %v1979_v63 = vadd.f32 %v1947_v45, %v1911_v24  ;;  %v2438_v40 = vmul.f32 %v4168_v3, %v5081_v55  ;;  %v1048_v42 = vand.u32 15, %v816_v38 }
 0x1a0   : > { %v1910_v31 = vadd.f32 %v1878_v30, %v1842_v10  ;;  %v1641_v33 = vmul.f32 %v4146_v47, %v5039_v56  ;;  %v2439_v5 = vmul.f32 %v4168_v3, %v5083_v32  ;;  %v1055_v34 = vand.u32 15, %v817_v2 }
 0x1a1   : > { %3623 = vmatprep.mubr.bf16.mxu1 %v2559_v22  ;;  %v2335_v60 = vadd.f32 %v2303_v15, %v1979_v63  ;;  %v1709_v58 = vmul.f32 %v4149_v48, %v5089_v43  ;;  %v1320_v46 = vadd.s32 4294967295, %v1048_v42  ;;  %v1813_v36 = vmul.f32 %v4124_v19, %v5004_v44  ;;  %v2017_v15 = vld [vmem:[#allocation2 + $0x111] sm:$0xff] }
 0x1a2   : > { %v1978_v49 = vadd.f32 %v1946_v9, %v1910_v31  ;;  %v1673_v14 = vadd.f32 %v1641_v33, %v1573_v51  ;;  %v1672_v35 = vadd.f32 %v1640_v4, %v1572_v52  ;;  %v1812_v12 = vmul.f32 %v4124_v19, %v5000_v50 }
 0x1a3   : > { %v2403_v30 = vadd.f32 %v2371_v37, %v2335_v60  ;;  %v1880_v29 = vmul.f32 %v4126_v20, %v5053_v6  ;;  %vm1356_vm6 = vcmp.ge.s32.totalorder %v1320_v46, 0  ;;  %v1881_v9 = vmul.f32 %v4126_v20, %v5055_v17 }
 0x1a4   : > { %v2334_v16 = vadd.f32 %v2302_v53, %v1978_v49  ;;  %v1741_v13 = vadd.f32 %v1709_v58, %v1673_v14  ;;  %v1536_v11 = vsel %vm1356_vm6, %v1284_v62, 0.0  ;;  %v1948_v44 = vmul.f32 %v4128_v21, %v5105_v54  ;;  %v1286_v14 = vld [vmem:[#allocation2 + $0x117] sm:$0xff] }
 0x1a5   : > { %v2471_v45 = vadd.f32 %v2439_v5, %v2403_v30  ;;  %v2053_v39 = vadd.s32 1, %v1055_v34  ;;  %v1708_v61 = vmul.f32 %v4149_v48, %v1536_v11  ;;  %v1949_v50 = vmul.f32 %v4128_v21, %v1777_v25 }
 0x1a6   : > { %v2402_v57 = vadd.f32 %v2370_v8, %v2334_v16  ;;  %v1845_v23 = vadd.f32 %v1813_v36, %v1741_v13  ;;  %v2304_v41 = vmul.f32 %v4163_v59, %v5016_v26  ;;  %v2305_v24 = vmul.f32 %v4163_v59, %v5029_v1  ;;  %v1287_v1 = vld [vmem:[#allocation2 + $0x11f] sm:$0xff] }
 0x1a7   : > { %v2510_v53 = vadd.f32 %v5023_v27, %v2471_v45  ;;  %vm2125_vm7 = vcmp.lt.s32.totalorder %v2053_v39, 16  ;;  %v1740_v10 = vadd.f32 %v1708_v61, %v1672_v35  ;;  %v2372_v8 = vmul.f32 %v4166_v0, %v5081_v55 }
 0x1a8   : > { %v2470_v37 = vadd.f32 %v2438_v40, %v2402_v57  ;;  %v1913_v38 = vadd.f32 %v1881_v9, %v1845_v23  ;;  %v2269_v52 = vsel %vm2125_vm7, %v2017_v15, 0.0  ;;  %v2373_v22 = vmul.f32 %v4166_v0, %v5083_v32  ;;  %v2016_v40 = vld [vmem:[#allocation2 + $0x109] sm:$0xff]  ;;  %v5150_v15 = vld [vmem:[#allocation2] sm:$0xff] }
 0x1a9   : > { %v2542_v2 = vmax.f32 %v2510_v53, 0.0  ;;  %v818_v63 = vadd.s32 272, %v5777_v7  ;;  %v1844_v4 = vadd.f32 %v1812_v12, %v1740_v10  ;;  %v819_v31 = vadd.s32 280, %v5777_v7 }
 0x1aa   : > { %v2509_v51 = vadd.f32 %v5023_v27, %v2470_v37  ;;  %v1981_v26 = vadd.f32 %v1949_v50, %v1913_v38  ;;  %v1574_v33 = vmul.f32 %v4122_v18, %v5065_v28  ;;  %v1575_v60 = vmul.f32 %v4122_v18, %v5039_v56 }
 0x1ab   : > { %v1062_v42 = vand.u32 15, %v818_v63  ;;  %v1642_v5 = vmul.f32 %v4146_v47, %v1536_v11  ;;  %v1912_v58 = vadd.f32 %v1880_v29, %v1844_v4  ;;  %v2441_v62 = vmul.f32 %v4168_v3, %v2269_v52 }
 0x1ac   : > { %v2541_v34 = vmax.f32 %v2509_v51, 0.0  ;;  %v2337_v49 = vadd.f32 %v2305_v24, %v1981_v26  ;;  %v1069_v46 = vand.u32 15, %v819_v31  ;;  %v1643_v7 = vmul.f32 %v4146_v47, %v5089_v43 }
 0x1ad   : > { %v1322_v36 = vadd.s32 4294967295, %v1062_v42  ;;  %v1711_v30 = vmul.f32 %v4149_v48, %v1287_v1  ;;  %v1980_v28 = vadd.f32 %v1948_v44, %v1912_v58  ;;  %v2440_v18 = vmul.f32 %v4168_v3, %v2016_v40 }
 0x1ae   : > { %v2560_v35 = vpack.c.bf16 %v2542_v2, %v2541_v34  ;;  %v2405_v12 = vadd.f32 %v2373_v22, %v2337_v49  ;;  %v1674_v56 = vadd.f32 %v1642_v5, %v1574_v33  ;;  %v1675_v16 = vadd.f32 %v1643_v7, %v1575_v60  ;;  %v2018_v2 = vld [vmem:[#allocation2 + $0x119] sm:$0xff] }
 0x1af   : > { %vm1358_vm8 = vcmp.ge.s32.totalorder %v1322_v36, 0  ;;  %v1815_v29 = vmul.f32 %v4124_v19, %v5055_v17  ;;  %v2336_v13 = vadd.f32 %v2304_v41, %v1980_v28  ;;  %v1814_v47 = vmul.f32 %v4124_v19, %v5053_v6  ;;  %v2019_v19 = vld [vmem:[#allocation2 + $0x121] sm:$0xff] }
 0x1b0   : > { %3624 = vmatmul.mubr.bf16.gmra.mrb[40].mxu1 %v2560_v35  ;;  %v2473_v9 = vadd.f32 %v2441_v62, %v2405_v12  ;;  %v1538_v45 = vsel %vm1358_vm8, %v1286_v14, 0.0  ;;  %v1743_v11 = vadd.f32 %v1711_v30, %v1675_v16  ;;  %v1883_v44 = vmul.f32 %v4126_v20, %v1777_v25  ;;  %v5178_v35 = vld [vmem:[%s5642_s6] ss:$0 sm:$0xff]  ;;  %v3763_v16 = vld [vmem:[%s5643_s7 + $0x10] sm:$0xff]  }
 0x1b1   : > { %v1710_v43 = vmul.f32 %v4149_v48, %v1538_v45  ;;  %v2055_v39 = vadd.s32 1, %v1069_v46  ;;  %v2404_v57 = vadd.f32 %v2372_v8, %v2336_v13  ;;  %v1882_v23 = vmul.f32 %v4126_v20, %v5105_v54  ;;  %v3764_v13 = vld [vmem:[%s5643_s7 + $0x18] sm:$0xff]  }
 0x1b2   : > { %v2512_v61 = vadd.f32 %v5023_v27, %v2473_v9  ;;  %v1847_v50 = vadd.f32 %v1815_v29, %v1743_v11  ;;  %v1950_v53 = vmul.f32 %v5150_v15, %v4128_v21  ;;  %v2307_v25 = vmul.f32 %v4163_v59, %v5083_v32 }
 0x1b3   : > { %v1742_v17 = vadd.f32 %v1710_v43, %v1674_v56  ;;  %vm2127_vm9 = vcmp.lt.s32.totalorder %v2055_v39, 16  ;;  %v2472_v48 = vadd.f32 %v2440_v18, %v2404_v57  ;;  %v2306_v38 = vmul.f32 %v4163_v59, %v5081_v55  ;;  %v3769_v43 = vld [vmem:[%s5645_s9] sm:$0xff]  }
 0x1b4   : > { %v1915_v41 = vadd.f32 %v1883_v44, %v1847_v50  ;;  %v2544_v37 = vmax.f32 %v2512_v61, 0.0  ;;  %v2271_v10 = vsel %vm2127_vm9, %v2019_v19, 0.0  ;;  %v2375_v8 = vmul.f32 %v4166_v0, %v2269_v52  ;;  %3652 = vmatpush3.bf16.msra.mxu1 %v3769_v43  ;;  %v3770_v44 = vld [vmem:[%s5645_s9 + $0x8] sm:$0xff]   ;;  %v3767_v50 = vld [vmem:[%s5643_s7 + $0x30] sm:$0xff]  }
 0x1b5   : > { %v1846_v6 = vadd.f32 %v1814_v47, %v1742_v17  ;;  %v2511_v24 = vadd.f32 %v5023_v27, %v2472_v48  ;;  %v2374_v51 = vmul.f32 %v4166_v0, %v2016_v40  ;;  %v2443_v4 = vmul.f32 %v4168_v3, %v2271_v10  ;;  %v3765_v47 = vld [vmem:[%s5643_s7 + $0x20] sm:$0xff]   ;;  %3653 = vmatprep.subr.bf16.mxu1 %v5150_v15  ;;  %v3766_v61 = vld [vmem:[%s5643_s7 + $0x28] sm:$0xff]  }
 0x1b6   : > { %v1983_v54 = vadd.f32 %v1950_v53, %v1915_v41  ;;  %v2442_v1 = vmul.f32 %v4168_v3, %v2018_v2  ;;  %v3761_v3 = vld [vmem:[%s5643_s7] sm:$0xff]   ;;  %vm3844_vm10 = vmmov 0  }
 0x1b7   : > { %v1914_v20 = vadd.f32 %v1882_v23, %v1846_v6  ;;  %v2543_v21 = vmax.f32 %v2511_v24, 0.0  ;;  %3632 = vmatpush3.bf16.msra.mxu0 %v3761_v3  ;;  %3647 = vmatprep.mubr.msk.bf16.mxu0 %vm3844_vm10, %v5150_v15  ;;  %v5249_v10 = vld [vmem:[%s5647_s11] sm:$0x3] }
 0x1b8   : > { %v2339_v63 = vadd.f32 %v2307_v25, %v1983_v54  ;;  %3633 = vmatprep.subr.bf16.mxu0 %v5150_v15  ;;  %3654 = vmatpush3.bf16.msra.mxu1 %v3770_v44  ;;  %v3768_v25 = vld [vmem:[%s5643_s7 + $0x38] sm:$0xff]  }
 0x1b9   : > { %v1982_v22 = vadd.f32 %v1950_v53, %v1914_v20  ;;  %v2561_v32 = vpack.c.bf16 %v2544_v37, %v2543_v21  ;;  %3655 = vmatprep.subr.bf16.mxu1 %v5150_v15  ;;  %v3771_v53 = vld [vmem:[%s5645_s9 + $0x10] sm:$0xff]   ;;  %v3772_v54 = vld [vmem:[%s5645_s9 + $0x18] sm:$0xff]  }
 0x1ba   : > { %v2407_v31 = vadd.f32 %v2375_v8, %v2339_v63  ;;  %v3773_v63 = vld [vmem:[%s5645_s9 + $0x20] sm:$0xff]  }
 0x1bb   : > { %v2338_v26 = vadd.f32 %v2306_v38, %v1982_v22  ;;  %3627 = vmatprep.mubr.bf16.mxu1 %v2561_v32 }
 0x1bc   : > { %v2475_v33 = vadd.f32 %v2443_v4, %v2407_v31  ;;  %3656 = vmatpush3.bf16.msra.mxu1 %v3771_v53 }
 0x1bd   : > { %v2406_v42 = vadd.f32 %v2374_v51, %v2338_v26  ;;  %3657 = vmatprep.subr.bf16.mxu1 %v5150_v15 }
 0x1be   : > { %v2514_v59 = vadd.f32 %v5023_v27, %v2475_v33 }
 0x1bf   : > { %v2474_v60 = vadd.f32 %v2442_v1, %v2406_v42  ;;  %v3774_v42 = vld [vmem:[%s5645_s9 + $0x28] sm:$0xff]  }
 0x1c0   : > { %v2546_v52 = vmax.f32 %v2514_v59, 0.0  ;;  %3658 = vmatpush3.bf16.msra.mxu1 %v3772_v54 }
 0x1c1   : > { %v2513_v55 = vadd.f32 %v5023_v27, %v2474_v60  ;;  %v3762_v27 = vld [vmem:[%s5643_s7 + $0x8] sm:$0xff]   ;;  %3659 = vmatprep.subr.bf16.mxu1 %v5150_v15 }
 0x1c2   : > { %3634 = vmatpush3.bf16.msra.mxu0 %v3762_v27 }
 0x1c3   : > { %v2545_v5 = vmax.f32 %v2513_v55, 0.0  ;;  %3635 = vmatprep.subr.bf16.mxu0 %v5150_v15 }
 0x1c4   : > { %3660 = vmatpush3.bf16.msra.mxu1 %v3773_v63 }
 0x1c5   : > { %v2562_v34 = vpack.c.bf16 %v2546_v52, %v2545_v5  ;;  %3661 = vmatprep.subr.bf16.mxu1 %v5150_v15 }
 0x1c6   : > { %3636 = vmatpush3.bf16.msra.mxu0 %v3763_v16 }
 0x1c7   : > { %3628 = vmatmul.mubr.bf16.gmra.mrb[44].mxu1 %v2562_v34  ;;  %3637 = vmatprep.subr.bf16.mxu0 %v5150_v15  ;;  %v3775_v34 = vld [vmem:[%s5645_s9 + $0x30] sm:$0xff]  }
 0x1c8   : > { %3667 = vmatprep.mubr.msk.bf16.mxu1 %vm3844_vm10, %v5150_v15  ;;  %3662 = vmatpush3.bf16.msra.mxu1 %v3774_v42 }
 0x1c9   : > { %3663 = vmatprep.subr.bf16.mxu1 %v5150_v15 }
 0x1ca   : > { %3638 = vmatpush3.bf16.msra.mxu0 %v3764_v13 }
 0x1cb   : > { %3639 = vmatprep.subr.bf16.mxu0 %v5150_v15 }
 0x1cc   : > { %3664 = vmatpush3.bf16.msra.mxu1 %v3775_v34 }
 0x1cd   : > { %3665 = vmatprep.subr.bf16.mxu1 %v5150_v15 }
 0x1ce   : > { %3640 = vmatpush3.bf16.msra.mxu0 %v3765_v47 }
 0x1cf   : > { %3641 = vmatprep.subr.bf16.mxu0 %v5150_v15 }
 0x1d2   : > { %3642 = vmatpush3.bf16.msra.mxu0 %v3766_v61 }
 0x1d3   : > { %3643 = vmatprep.subr.bf16.mxu0 %v5150_v15 }
 0x1d6   : > { %3644 = vmatpush3.bf16.msra.mxu0 %v3767_v50 }
 0x1d7   : > { %3645 = vmatprep.subr.bf16.mxu0 %v5150_v15 }
 0x1da   : > { %3646 = vmatpush3.bf16.msra.mxu0 %v3768_v25 }
 0x1db   : > { %3709 = vmatprep.subr.msk.bf16.mxu0 %vm545_vm0, %v5249_v10 }
 0x1fa   : > { %v3601_v0 = vpop.f32.mrb[16].mxu1 }
 0x1fb   : > { %v2668_v40 = vpop.f32.mrb[17].mxu1  ;;  %v5200_v9 = vadd.f32 %v3601_v0, %v5178_v35 }
 0x1fc   : > { %v3602_v58 = vpop.f32.mrb[18].mxu1  ;;  %v5186_v56 = vadd.f32 %v5178_v35, %v2668_v40 }
 0x1fd   : > { %v2671_v49 = vpop.f32.mrb[19].mxu1  ;;  %v5211_v11 = vadd.f32 %v3602_v58, %v5178_v35 }
 0x1fe   : > { %v5183_v12 = vadd.f32 %v5178_v35, %v2671_v49  ;;  %v3776_v49 = vld [vmem:[%s5645_s9 + $0x38] sm:$0xff]  }
 0x1ff   : > { %3666 = vmatpush3.bf16.msra.mxu1 %v3776_v49 }
 0x200   : > { %v2795_v29 = vadd.f32 %v5183_v12, %v5186_v56 }
 0x202   : > { %v2796_v45 = vadd.f32 %v2795_v29, %v5200_v9 }
 0x204   : > { %v2797_v57 = vadd.f32 %v2796_v45, %v5211_v11 }
 0x214   : > { %v3605_v62 = vpop.f32.mrb[20].mxu1 }
 0x215   : > { %v2684_v46 = vpop.f32.mrb[21].mxu1  ;;  %v5244_v37 = vadd.f32 %v3605_v62, %v5178_v35 }
 0x216   : > { %v3606_v14 = vpop.f32.mrb[22].mxu1  ;;  %v5218_v39 = vadd.f32 %v5178_v35, %v2684_v46 }
 0x217   : > { %v2687_v36 = vpop.f32.mrb[23].mxu1  ;;  %v5258_v38 = vadd.f32 %v3606_v14, %v5178_v35 }
 0x218   : > { %v2798_v23 = vadd.f32 %v2797_v57, %v5218_v39  ;;  %v5228_v17 = vadd.f32 %v5178_v35, %v2687_v36 }
 0x21a   : > { %v2799_v6 = vadd.f32 %v2798_v23, %v5228_v17 }
 0x21c   : > { %v2800_v20 = vadd.f32 %v2799_v6, %v5244_v37 }
 0x21e   : > { %v2801_v21 = vadd.f32 %v2800_v20, %v5258_v38 }
 0x229   : > { %v5173_v7 = vpop.f32.mrb[24].mxu1 }
 0x22a   : > { %v2700_v30 = vpop.f32.mrb[25].mxu1  ;;  %v5276_v4 = vadd.f32 %v5173_v7, %v5178_v35 }
 0x22b   : > { %v5180_v28 = vpop.f32.mrb[26].mxu1  ;;  %v5262_v8 = vadd.f32 %v5178_v35, %v2700_v30 }
 0x22c   : > { %v2703_v18 = vpop.f32.mrb[27].mxu1  ;;  %v5284_v60 = vadd.f32 %v5180_v28, %v5178_v35 }
 0x22d   : > { %v2802_v2 = vadd.f32 %v2801_v21, %v5262_v8  ;;  %v5267_v22 = vadd.f32 %v5178_v35, %v2703_v18 }
 0x22f   : > { %v2803_v51 = vadd.f32 %v2802_v2, %v5267_v22 }
 0x231   : > { %v2804_v31 = vadd.f32 %v2803_v51, %v5276_v4 }
 0x233   : > { %v2805_v55 = vadd.f32 %v2804_v31, %v5284_v60 }
 0x23f   : > { %v3613_v19 = vpop.f32.mrb[28].mxu1 }
 0x240   : > { %v2716_v48 = vpop.f32.mrb[29].mxu1  ;;  %v5301_v40 = vadd.f32 %v3613_v19, %v5178_v35 }
 0x241   : > { %v3614_v41 = vpop.f32.mrb[30].mxu1  ;;  %v5288_v59 = vadd.f32 %v5178_v35, %v2716_v48 }
 0x242   : > { %v2719_v24 = vpop.f32.mrb[31].mxu1  ;;  %v5308_v3 = vadd.f32 %v3614_v41, %v5178_v35 }
 0x243   : > { %v2806_v52 = vadd.f32 %v2805_v55, %v5288_v59  ;;  %v5293_v5 = vadd.f32 %v5178_v35, %v2719_v24 }
 0x245   : > { %v2807_v0 = vadd.f32 %v2806_v52, %v5293_v5 }
 0x247   : > { %v2808_v58 = vadd.f32 %v2807_v0, %v5301_v40 }
 0x249   : > { %v2809_v15 = vadd.f32 %v2808_v58, %v5308_v3 }
 0x253   : > { %v3617_v32 = vpop.f32.mrb[32].mxu1 }
 0x254   : > { %v2732_v26 = vpop.f32.mrb[33].mxu1  ;;  %v5320_v18 = vadd.f32 %v3617_v32, %v5178_v35 }
 0x255   : > { %v3618_v1 = vpop.f32.mrb[34].mxu1  ;;  %v5311_v46 = vadd.f32 %v5178_v35, %v2732_v26 }
 0x256   : > { %v2735_v33 = vpop.f32.mrb[35].mxu1  ;;  %5780 = vst [vmem:[#allocation42_spill] sm:$0xff] %v5320_v18  ;;  %v5324_v29 = vadd.f32 %v3618_v1, %v5178_v35 }
 0x257   : > { %5778 = vst [vmem:[#allocation45_spill] sm:$0xff] %v5311_v46  ;;  %v2810_v7 = vadd.f32 %v2809_v15, %v5311_v46  ;;  %v5316_v30 = vadd.f32 %v5178_v35, %v2735_v33 }
 0x258   : > { %5781 = vst [vmem:[#allocation25_spill] sm:$0xff] %v5324_v29 }
 0x259   : > { %5779 = vst [vmem:[#allocation24_spill] sm:$0xff] %v5316_v30  ;;  %v2811_v28 = vadd.f32 %v2810_v7, %v5316_v30 }
 0x25b   : > { %v2812_v16 = vadd.f32 %v2811_v28, %v5320_v18 }
 0x25d   : > { %v2813_v45 = vadd.f32 %v2812_v16, %v5324_v29  ;;  %v3096_v16 = vsel %vm545_vm0, %v5249_v10, 0  ;;  %v5800_v10 = vld [vmem:[#allocation17_spill] sm:$0xff] }
 0x269   : > { %v3621_v62 = vpop.f32.mrb[36].mxu1 }
 0x26a   : > { %v2748_v14 = vpop.f32.mrb[37].mxu1  ;;  %v5336_v61 = vadd.f32 %v3621_v62, %v5178_v35 }
 0x26b   : > { %v3622_v36 = vpop.f32.mrb[38].mxu1  ;;  %v5327_v13 = vadd.f32 %v5178_v35, %v2748_v14 }
 0x26c   : > { %v2751_v27 = vpop.f32.mrb[39].mxu1  ;;  %5784 = vst [vmem:[#allocation44_spill] sm:$0xff] %v5336_v61  ;;  %v5340_v48 = vadd.f32 %v3622_v36, %v5178_v35 }
 0x26d   : > { %5782 = vst [vmem:[#allocation40_spill] sm:$0xff] %v5327_v13  ;;  %v2814_v47 = vadd.f32 %v2813_v45, %v5327_v13  ;;  %v5332_v43 = vadd.f32 %v5178_v35, %v2751_v27  ;;  %v5794_v45 = vld [vmem:[#allocation6_spill] sm:$0xff] }
 0x26e   : > { %5785 = vst [vmem:[#allocation26_spill] sm:$0xff] %v5340_v48 }
 0x26f   : > { %5783 = vst [vmem:[#allocation43_spill] sm:$0xff] %v5332_v43  ;;  %v2815_v44 = vadd.f32 %v2814_v47, %v5332_v43  ;;  %v5796_v47 = vld [vmem:[#allocation8_spill] sm:$0xff] }
 0x271   : > { %v2816_v53 = vadd.f32 %v2815_v44, %v5336_v61  ;;  %v5797_v44 = vld [vmem:[#allocation12_spill] sm:$0xff] }
 0x273   : > { %v2817_v41 = vadd.f32 %v2816_v53, %v5340_v48  ;;  %v5802_v53 = vld [vmem:[#allocation9_spill] sm:$0xff] }
 0x283   : > { %v3625_v57 = vpop.f32.mrb[40].mxu1 }
 0x284   : > { %v2764_v23 = vpop.f32.mrb[41].mxu1  ;;  %v5352_v54 = vadd.f32 %v3625_v57, %v5178_v35  ;;  %v5798_v57 = vld [vmem:[#allocation13_spill] sm:$0xff] }
 0x285   : > { %v3626_v50 = vpop.f32.mrb[42].mxu1  ;;  %v5343_v6 = vadd.f32 %v5178_v35, %v2764_v23  ;;  %v5799_v23 = vld [vmem:[#allocation16_spill] sm:$0xff] }
 0x286   : > { %v2767_v19 = vpop.f32.mrb[43].mxu1  ;;  %5788 = vst [vmem:[#allocation30_spill] sm:$0xff] %v5352_v54  ;;  %v5356_v2 = vadd.f32 %v3626_v50, %v5178_v35  ;;  %v5801_v50 = vld [vmem:[#allocation20_spill] sm:$0xff] }
 0x287   : > { %5786 = vst [vmem:[#allocation27_spill] sm:$0xff] %v5343_v6  ;;  %v2818_v25 = vadd.f32 %v2817_v41, %v5343_v6  ;;  %v5348_v24 = vadd.f32 %v5178_v35, %v2767_v19  ;;  %v5803_v19 = vld [vmem:[#allocation10_spill] sm:$0xff]  ;;  %v5804_v41 = vld [vmem:[#allocation11_spill] sm:$0xff] }
 0x288   : > { %5789 = vst [vmem:[#allocation31_spill] sm:$0xff] %v5356_v2 }
 0x289   : > { %5787 = vst [vmem:[#allocation28_spill] sm:$0xff] %v5348_v24  ;;  %v2819_v20 = vadd.f32 %v2818_v25, %v5348_v24  ;;  %v5805_v25 = vld [vmem:[#allocation14_spill] sm:$0xff] }
 0x28b   : > { %v2820_v21 = vadd.f32 %v2819_v20, %v5352_v54  ;;  %v5806_v20 = vld [vmem:[#allocation15_spill] sm:$0xff] }
 0x28d   : > { %v2821_v51 = vadd.f32 %v2820_v21, %v5356_v2  ;;  %v5807_v21 = vld [vmem:[#allocation18_spill] sm:$0xff] }
 0x29a   : > { %v3629_v63 = vpop.f32.mrb[44].mxu1 }
 0x29b   : > { %v2780_v32 = vpop.f32.mrb[45].mxu1  ;;  %v5367_v55 = vadd.f32 %v3629_v63, %v5178_v35  ;;  %v5808_v63 = vld [vmem:[#allocation19_spill] sm:$0xff] }
 0x29c   : > { %v5360_v26 = vadd.f32 %v5178_v35, %v2780_v32  ;;  %v3630_v31 = vpop.f32.mrb[46].mxu1  ;;  %v2851_v32 = vld [vmem:[%s5644_s8] sm:$0x1] }
 0x29d   : > { %v2783_v1 = vpop.f32.mrb[47].mxu1  ;;  %5792 = vst [vmem:[#allocation32_spill] sm:$0xff] %v5367_v55  ;;  %v5371_v34 = vadd.f32 %v3630_v31, %v5178_v35 }
 0x29e   : > { %5790 = vst [vmem:[#allocation29_spill] sm:$0xff] %v5360_v26  ;;  %v2822_v42 = vadd.f32 %v2821_v51, %v5360_v26  ;;  %v5364_v33 = vadd.f32 %v5178_v35, %v2783_v1  ;;  %v5795_v35 = vld [vmem:[#allocation7_spill] sm:$0xff]  ;;  %v5809_v51 = vld [vmem:[#allocation21_spill] sm:$0xff] }
 0x29f   : > { %5793 = vst [vmem:[#allocation35_spill] sm:$0xff] %v5371_v34 }
 0x2a0   : > { %5791 = vst [vmem:[#allocation33_spill] sm:$0xff] %v5364_v33  ;;  %v2823_v52 = vadd.f32 %v2822_v42, %v5364_v33  ;;  %v3449_v33 = vld [vmem:[%s5648_s12] ss:$0 sm:$0xff] }
 0x2a2   : > { %v2824_v0 = vadd.f32 %v2823_v52, %v5367_v55 }
 0x2a4   : > { %v2825_v58 = vadd.f32 %v2824_v0, %v5371_v34  ;;  %v2958_v34 = vld [vmem:[%s5646_s10] sm:$0x1] }
 0x2a6   : > { %v2826_v49 = vrot.slane %v2825_v58, 4 }
 0x2a8   : > { %v2827_v62 = vadd.f32 %v2826_v49, %v2825_v58 }
 0x2aa   : > { %v2828_v15 = vrot.slane %v2827_v62, 2 }
 0x2ac   : > { %v2829_v14 = vadd.f32 %v2828_v15, %v2827_v62 }
 0x2ae   : > { %v2830_v36 = vrot.slane %v2829_v14, 1 }
 0x2b0   : > { %v2831_v27 = vadd.f32 %v2830_v36, %v2829_v14 }
 0x2b2   : > { %v2833_v7 = vmul.f32 0.00390625, %v2831_v27 }
 0x2b4   : > { %v2834_v28 = vpack.c.bf16 %v2833_v7, %v2833_v7 }
 0x2b6   : > { %3648 = vmatmul.mubr.bf16.vlgmr.msra.gmra.mrb[16].mxu0 %v2834_v28 }
 0x2b7   : > { %3672 = vmatpush3.bf16.msra.mxu0 %v3096_v16  ;;  %3673 = vmatprep.mubr.msk.bf16.mxu0 %vm496_vm1, %v5794_v45 }
 0x2be   : > { %3674 = vmatmul.mubr.msk.bf16.vlgmr.msra.gmra.mrb[20].mxu0 %vm496_vm1, %v5795_v35 }
 0x2bf   : > { %3677 = vmatprep.mubr.msk.bf16.mxu0 %vm496_vm1, %v5796_v47 }
 0x2c6   : > { %3678 = vmatmul.mubr.msk.bf16.gmra.mrb[24].mxu0 %vm496_vm1, %v5797_v44 }
 0x2c7   : > { %3681 = vmatprep.mubr.msk.bf16.mxu0 %vm496_vm1, %v5798_v57 }
 0x2ce   : > { %3682 = vmatmul.mubr.msk.bf16.gmra.mrb[28].mxu0 %vm496_vm1, %v5799_v23 }
 0x2cf   : > { %3685 = vmatprep.mubr.msk.bf16.mxu0 %vm496_vm1, %v5800_v10 }
 0x2d6   : > { %3686 = vmatmul.mubr.msk.bf16.gmra.mrb[32].mxu0 %vm496_vm1, %v5801_v50 }
 0x2d7   : > { %3689 = vmatprep.mubr.msk.bf16.mxu0 %vm496_vm1, %v5802_v53 }
 0x2de   : > { %3690 = vmatmul.mubr.msk.bf16.gmra.mrb[36].mxu0 %vm496_vm1, %v5803_v19 }
 0x2df   : > { %3693 = vmatprep.mubr.msk.bf16.mxu0 %vm496_vm1, %v5804_v41 }
 0x2e6   : > { %3694 = vmatmul.mubr.msk.bf16.gmra.mrb[40].mxu0 %vm496_vm1, %v5805_v25 }
 0x2e7   : > { %3697 = vmatprep.mubr.msk.bf16.mxu0 %vm496_vm1, %v5806_v20 }
 0x2ee   : > { %3698 = vmatmul.mubr.msk.bf16.gmra.mrb[44].mxu0 %vm496_vm1, %v5807_v21 }
 0x2ef   : > { %3701 = vmatprep.mubr.msk.bf16.mxu0 %vm496_vm1, %v5808_v63 }
 0x2f6   : > { %3702 = vmatmul.mubr.msk.bf16.gmra.mrb[48].mxu0 %vm496_vm1, %v5809_v51 }
 0x389   : > { %v2934_v31 = vpop.f32.mrb[16].mxu0 }
 0x38a   : > { %v2935_v1 = vadd.f32 %v2934_v31, %v2851_v32  ;;  %v3649_v42 = vpop.f32.mrb[17].mxu0 }
 0x38b   : > { %v2937_v52 = vpop.f32.mrb[18].mxu0 }
 0x38c   : > { %v2940_v0 = vmax.f32 %v2935_v1, 0.0  ;;  %v3650_v58 = vpop.f32.mrb[19].mxu0 }
 0x38e   : > { %v2941_v49 = vpack.c.bf16 %v2940_v0, %v2940_v0 }
 0x390   : > { %3668 = vmatmul.mubr.bf16.vlgmr.msra.gmra.mrb[48].mxu1 %v2941_v49 }
 0x391   : > { %v3675_v62 = vpop.f32.mrb[20].mxu0 }
 0x392   : > { %v3132_v15 = vpop.f32.mrb[21].mxu0  ;;  %v5418_v48 = vadd.f32 %v3675_v62, %v3449_v33 }
 0x393   : > { %v3676_v14 = vpop.f32.mrb[22].mxu0  ;;  %v5420_v61 = vadd.f32 %v3449_v33, %v3132_v15 }
 0x394   : > { %v3135_v36 = vpop.f32.mrb[23].mxu0  ;;  %v5422_v43 = vadd.f32 %v3676_v14, %v3449_v33 }
 0x395   : > { %v5424_v13 = vadd.f32 %v3449_v33, %v3135_v36 }
 0x399   : > { %v3679_v27 = vpop.f32.mrb[24].mxu0 }
 0x39a   : > { %v3148_v7 = vpop.f32.mrb[25].mxu0  ;;  %v5426_v29 = vadd.f32 %v3679_v27, %v3449_v33 }
 0x39b   : > { %v3680_v28 = vpop.f32.mrb[26].mxu0  ;;  %v5428_v18 = vadd.f32 %v3449_v33, %v3148_v7 }
 0x39c   : > { %v3151_v16 = vpop.f32.mrb[27].mxu0  ;;  %v5430_v30 = vadd.f32 %v3680_v28, %v3449_v33 }
 0x3a1   : > { %v3683_v45 = vpop.f32.mrb[28].mxu0 }
 0x3a2   : > { %v3164_v35 = vpop.f32.mrb[29].mxu0 }
 0x3a3   : > { %v3684_v47 = vpop.f32.mrb[30].mxu0 }
 0x3a4   : > { %v3167_v44 = vpop.f32.mrb[31].mxu0 }
 0x3a9   : > { %v3687_v57 = vpop.f32.mrb[32].mxu0 }
 0x3aa   : > { %v3180_v23 = vpop.f32.mrb[33].mxu0 }
 0x3ab   : > { %v3688_v10 = vpop.f32.mrb[34].mxu0  ;;  %v5444_v62 = vadd.f32 %v3449_v33, %v3180_v23  ;;  %v5816_v23 = vld [vmem:[#allocation23_spill] sm:$0xff] }
 0x3ac   : > { %v3183_v50 = vpop.f32.mrb[35].mxu0  ;;  %v5446_v14 = vadd.f32 %v3688_v10, %v3449_v33 }
 0x3ad   : > { %v5448_v36 = vadd.f32 %v3449_v33, %v3183_v50 }
 0x3b1   : > { %v3691_v53 = vpop.f32.mrb[36].mxu0 }
 0x3b2   : > { %v3196_v19 = vpop.f32.mrb[37].mxu0 }
 0x3b3   : > { %v3692_v41 = vpop.f32.mrb[38].mxu0  ;;  %v5452_v27 = vadd.f32 %v3449_v33, %v3196_v19 }
 0x3b4   : > { %v3199_v25 = vpop.f32.mrb[39].mxu0  ;;  %v5454_v7 = vadd.f32 %v3692_v41, %v3449_v33 }
 0x3b5   : > { %v5456_v28 = vadd.f32 %v3449_v33, %v3199_v25 }
 0x3b9   : > { %v3695_v20 = vpop.f32.mrb[40].mxu0 }
 0x3ba   : > { %v3212_v21 = vpop.f32.mrb[41].mxu0 }
 0x3bb   : > { %v3696_v63 = vpop.f32.mrb[42].mxu0 }
 0x3bc   : > { %v3215_v51 = vpop.f32.mrb[43].mxu0 }
 0x3c1   : > { %v3699_v32 = vpop.f32.mrb[44].mxu0 }
 0x3c2   : > { %v3228_v31 = vpop.f32.mrb[45].mxu0 }
 0x3c3   : > { %v3700_v1 = vpop.f32.mrb[46].mxu0 }
 0x3c4   : > { %v3231_v42 = vpop.f32.mrb[47].mxu0  ;;  %v3240_v50 = vadd.f32 %v3700_v1, %v3449_v33 }
 0x3c9   : > { %v3703_v52 = vpop.f32.mrb[48].mxu0 }
 0x3ca   : > { %v3244_v0 = vpop.f32.mrb[49].mxu0  ;;  %v5473_v19 = vadd.f32 %v3703_v52, %v3449_v33 }
 0x3cb   : > { %v3704_v58 = vpop.f32.mrb[50].mxu0  ;;  %v5475_v41 = vadd.f32 %v3449_v33, %v3244_v0 }
 0x3cc   : > { %v3247_v49 = vpop.f32.mrb[51].mxu0  ;;  %5818 = vst [vmem:[#allocation6_spill] sm:$0xff] %v5473_v19  ;;  %v5477_v25 = vadd.f32 %v3704_v58, %v3449_v33  ;;  %v5823_v58 = vld [vmem:[#allocation24_spill] sm:$0xff] }
 0x3cd   : > { %5819 = vst [vmem:[#allocation7_spill] sm:$0xff] %v5475_v41  ;;  %v5830_v41 = vld [vmem:[#allocation27_spill] sm:$0xff]  ;;  %v5831_v19 = vld [vmem:[#allocation28_spill] sm:$0xff] }
 0x3ce   : > { %5820 = vst [vmem:[#allocation8_spill] sm:$0xff] %v5477_v25  ;;  %v5829_v25 = vld [vmem:[#allocation26_spill] sm:$0xff] }
 0x463   : > { %v3041_v55 = vpop.f32.mrb[48].mxu1 }
 0x464   : > { %v3042_v26 = vadd.f32 %v3041_v55, %v2958_v34  ;;  %v3669_v2 = vpop.f32.mrb[49].mxu1  ;;  %v5432_v55 = vadd.f32 %v3449_v33, %v3151_v16  ;;  %v5442_v34 = vadd.f32 %v3687_v57, %v3449_v33  ;;  %v5458_v16 = vadd.f32 %v3695_v20, %v3449_v33 }
 0x465   : > { %v3044_v54 = vpop.f32.mrb[50].mxu1  ;;  %v5438_v2 = vadd.f32 %v3684_v47, %v3449_v33  ;;  %v5462_v47 = vadd.f32 %v3696_v63, %v3449_v33  ;;  %v5468_v57 = vadd.f32 %v3449_v33, %v3228_v31  ;;  %v5479_v20 = vadd.f32 %v3449_v33, %v3247_v49  ;;  %v5824_v49 = vld [vmem:[#allocation42_spill] sm:$0xff] }
 0x466   : > { %v3047_v24 = vadd.f32 3.0, %v3042_v26  ;;  %v3670_v6 = vpop.f32.mrb[51].mxu1  ;;  %v5434_v54 = vadd.f32 %v3683_v45, %v3449_v33  ;;  %v5440_v26 = vadd.f32 %v3449_v33, %v3167_v44  ;;  %5810 = vst [vmem:[#allocation34_spill] sm:$0xff] %v5458_v16  ;;  %v5466_v44 = vadd.f32 %v3699_v32, %v3449_v33  ;;  %v5835_v16 = vld [vmem:[#allocation33_spill] sm:$0xff] }
 0x467   : > { %v5436_v6 = vadd.f32 %v3449_v33, %v3164_v35  ;;  %v5460_v35 = vadd.f32 %v3449_v33, %v3212_v21  ;;  %5812 = vst [vmem:[#allocation37_spill] sm:$0xff] %v5462_v47  ;;  %5815 = vst [vmem:[#allocation41_spill] sm:$0xff] %v5468_v57  ;;  %v5833_v57 = vld [vmem:[#allocation31_spill] sm:$0xff]  ;;  %v5834_v47 = vld [vmem:[#allocation29_spill] sm:$0xff] }
 0x468   : > { %v3048_v46 = vmax.f32 %v3047_v24, 0.0  ;;  %v5450_v24 = vadd.f32 %v3691_v53, %v3449_v33  ;;  %5814 = vst [vmem:[#allocation39_spill] sm:$0xff] %v5466_v44  ;;  %v5471_v53 = vadd.f32 %v3449_v33, %v3231_v42  ;;  %5821 = vst [vmem:[#allocation12_spill] sm:$0xff] %v5479_v20  ;;  %v5828_v20 = vld [vmem:[#allocation44_spill] sm:$0xff]  ;;  %v5832_v44 = vld [vmem:[#allocation30_spill] sm:$0xff] }
 0x469   : > { %5811 = vst [vmem:[#allocation36_spill] sm:$0xff] %v5460_v35 }
 0x46a   : > { %v3049_v15 = vmin.f32 %v3048_v46, 6.0  ;;  %v5464_v46 = vadd.f32 %v3449_v33, %v3215_v51  ;;  %5817 = vst [vmem:[#allocation22_spill] sm:$0xff] %v5471_v53 }
 0x46c   : > { %v3050_v45 = vmul.f32 0.16666667, %v3049_v15  ;;  %5813 = vst [vmem:[#allocation38_spill] sm:$0xff] %v5464_v46  ;;  %v5825_v15 = vld [vmem:[#allocation25_spill] sm:$0xff] }
 0x46e   : > { %v3054_v10 = vrot.slane %v3050_v45, %v5816_v23  ;;  %v5826_v45 = vld [vmem:[#allocation40_spill] sm:$0xff]  ;;  %v5827_v23 = vld [vmem:[#allocation43_spill] sm:$0xff] }
 0x470   : > { %v3055_v21 = vmul.f32 %v3054_v10, %v5186_v56  ;;  %v3056_v63 = vmul.f32 %v3054_v10, %v5183_v12  ;;  %v3057_v51 = vmul.f32 %v3054_v10, %v5200_v9  ;;  %v3058_v32 = vmul.f32 %v3054_v10, %v5211_v11 }
 0x471   : > { %v3059_v31 = vmul.f32 %v3054_v10, %v5218_v39  ;;  %v3060_v1 = vmul.f32 %v3054_v10, %v5228_v17  ;;  %v3061_v42 = vmul.f32 %v3054_v10, %v5244_v37  ;;  %v3062_v52 = vmul.f32 %v3054_v10, %v5258_v38  ;;  %v5822_v37 = vld [vmem:[#allocation45_spill] sm:$0xff] }
 0x472   : > { %v3063_v33 = vmul.f32 %v3054_v10, %v5262_v8  ;;  %v3064_v56 = vmul.f32 %v3054_v10, %v5267_v22  ;;  %v3065_v12 = vmul.f32 %v3054_v10, %v5276_v4  ;;  %v3066_v0 = vmul.f32 %v3054_v10, %v5284_v60 }
 0x473   : > { %v3067_v9 = vmul.f32 %v3054_v10, %v5288_v59  ;;  %v3068_v11 = vmul.f32 %v3054_v10, %v5293_v5  ;;  %v3069_v39 = vmul.f32 %v3054_v10, %v5301_v40  ;;  %v3070_v17 = vmul.f32 %v3054_v10, %v5308_v3 }
 0x474   : > { %v3071_v38 = vmul.f32 %v3054_v10, %v5822_v37  ;;  %v3072_v8 = vmul.f32 %v3054_v10, %v5823_v58  ;;  %v3073_v22 = vmul.f32 %v3054_v10, %v5824_v49  ;;  %v3074_v4 = vmul.f32 %v3054_v10, %v5825_v15 }
 0x475   : > { %v3075_v60 = vmul.f32 %v3054_v10, %v5826_v45  ;;  %v3076_v59 = vmul.f32 %v3054_v10, %v5827_v23  ;;  %v3077_v5 = vmul.f32 %v3054_v10, %v5828_v20  ;;  %v3078_v40 = vmul.f32 %v3054_v10, %v5829_v25  ;;  %v5836_v45 = vld [vmem:[#allocation32_spill] sm:$0xff]  ;;  %v5837_v23 = vld [vmem:[#allocation35_spill] sm:$0xff] }
 0x476   : > { %v3079_v3 = vmul.f32 %v3054_v10, %v5830_v41  ;;  %v3080_v53 = vmul.f32 %v3054_v10, %v5831_v19  ;;  %v3081_v37 = vmul.f32 %v3054_v10, %v5832_v44  ;;  %v3082_v58 = vmul.f32 %v3054_v10, %v5833_v57 }
 0x477   : > { %v3083_v49 = vmul.f32 %v3054_v10, %v5834_v47  ;;  %v5514_v15 = vmul.f32 %v3054_v10, %v5835_v16  ;;  %v3085_v46 = vmul.f32 %v3054_v10, %v5836_v45  ;;  %v3086_v35 = vmul.f32 %v3054_v10, %v5837_v23  ;;  %v5839_v10 = vld [vmem:[#allocation38_spill] sm:$0xff] }
 0x478   : > { %v3286_v20 = vadd.f32 %v3240_v50, %v3082_v58  ;;  %v3259_v25 = vadd.f32 %v5420_v61, %v3055_v21  ;;  %v3260_v41 = vadd.f32 %v5424_v13, %v3056_v63  ;;  %v3261_v19 = vadd.f32 %v5418_v48, %v3057_v51  ;;  %v5840_v50 = vld [vmem:[#allocation34_spill] sm:$0xff]  ;;  %v5842_v21 = vld [vmem:[#allocation41_spill] sm:$0xff]  ;;  %v5843_v51 = vld [vmem:[#allocation39_spill] sm:$0xff] }
 0x479   : > { %v3262_v44 = vadd.f32 %v5422_v43, %v3058_v32  ;;  %v3263_v57 = vadd.f32 %v5428_v18, %v3059_v31  ;;  %v3264_v47 = vadd.f32 %v5432_v55, %v3060_v1  ;;  %v3265_v16 = vadd.f32 %v5426_v29, %v3061_v42  ;;  %v5844_v32 = vld [vmem:[#allocation22_spill] sm:$0xff]  ;;  %v5846_v42 = vld [vmem:[#allocation7_spill] sm:$0xff] }
 0x47a   : > { %3318 = vst [vmem:[%s5525_s16 + $0xd8] sm:$0xff] %v3286_v20  ;;  %v3266_v13 = vadd.f32 %v5430_v30, %v3062_v52  ;;  %v3267_v18 = vadd.f32 %v5436_v6, %v3063_v33  ;;  %v3268_v43 = vadd.f32 %v5440_v26, %v3064_v56  ;;  %v3269_v29 = vadd.f32 %v5434_v54, %v3065_v12  ;;  %v5845_v1 = vld [vmem:[#allocation6_spill] sm:$0xff]  ;;  %v5847_v33 = vld [vmem:[#allocation8_spill] sm:$0xff] }
 0x47b   : > { %3291 = vst [vmem:[%s5525_s16] sm:$0xff] %v3259_v25  ;;  %3292 = vst [vmem:[%s5525_s16 + $0x8] sm:$0xff] %v3260_v41  ;;  %v3270_v61 = vadd.f32 %v5438_v2, %v3066_v0  ;;  %v3271_v48 = vadd.f32 %v5444_v62, %v3067_v9  ;;  %v3272_v30 = vadd.f32 %v5448_v36, %v3068_v11  ;;  %v5838_v62 = vld [vmem:[#allocation36_spill] sm:$0xff] }
 0x47c   : > { %3293 = vst [vmem:[%s5525_s16 + $0x10] sm:$0xff] %v3261_v19  ;;  %v3273_v55 = vadd.f32 %v5442_v34, %v3069_v39  ;;  %3294 = vst [vmem:[%s5525_s16 + $0x18] sm:$0xff] %v3262_v44  ;;  %v3274_v54 = vadd.f32 %v5446_v14, %v3070_v17  ;;  %v3275_v6 = vadd.f32 %v5452_v27, %v3071_v38  ;;  %v5848_v12 = vld [vmem:[#allocation12_spill] sm:$0xff] }
 0x47d   : > { %3295 = vst [vmem:[%s5525_s16 + $0x20] sm:$0xff] %v3263_v57  ;;  %3296 = vst [vmem:[%s5525_s16 + $0x28] sm:$0xff] %v3264_v47  ;;  %v3276_v2 = vadd.f32 %v5456_v28, %v3072_v8  ;;  %v3277_v26 = vadd.f32 %v5450_v24, %v3073_v22  ;;  %v3278_v34 = vadd.f32 %v5454_v7, %v3074_v4  ;;  %v5841_v24 = vld [vmem:[#allocation37_spill] sm:$0xff] }
 0x47e   : > { %3297 = vst [vmem:[%s5525_s16 + $0x30] sm:$0xff] %v3265_v16  ;;  %3298 = vst [vmem:[%s5525_s16 + $0x38] sm:$0xff] %v3266_v13  ;;  %v3279_v36 = vadd.f32 %v5838_v62, %v3075_v60  ;;  %v3280_v14 = vadd.f32 %v5839_v10, %v3076_v59  ;;  %v3281_v27 = vadd.f32 %v5840_v50, %v3077_v5 }
 0x47f   : > { %3299 = vst [vmem:[%s5525_s16 + $0x40] sm:$0xff] %v3267_v18  ;;  %3300 = vst [vmem:[%s5525_s16 + $0x48] sm:$0xff] %v3268_v43  ;;  %v3282_v28 = vadd.f32 %v5841_v24, %v3078_v40  ;;  %v3283_v63 = vadd.f32 %v5842_v21, %v3079_v3  ;;  %v3285_v7 = vadd.f32 %v5843_v51, %v3081_v37 }
 0x480   : > { %3301 = vst [vmem:[%s5525_s16 + $0x50] sm:$0xff] %v3269_v29  ;;  %3302 = vst [vmem:[%s5525_s16 + $0x58] sm:$0xff] %v3270_v61  ;;  %v3284_v31 = vadd.f32 %v5844_v32, %v3080_v53  ;;  %v3289_v53 = vadd.f32 %v5845_v1, %v3085_v46  ;;  %v3287_v52 = vadd.f32 %v5846_v42, %v3083_v49 }
 0x481   : > { %3303 = vst [vmem:[%s5525_s16 + $0x60] sm:$0xff] %v3271_v48  ;;  %3304 = vst [vmem:[%s5525_s16 + $0x68] sm:$0xff] %v3272_v30  ;;  %v3290_v56 = vadd.f32 %v5847_v33, %v3086_v35  ;;  %v3288_v0 = vadd.f32 %v5848_v12, %v5514_v15 }
 0x482   : > { %3305 = vst [vmem:[%s5525_s16 + $0x70] sm:$0xff] %v3273_v55  ;;  %3306 = vst [vmem:[%s5525_s16 + $0x78] sm:$0xff] %v3274_v54 }
 0x483   : > { %3307 = vst [vmem:[%s5525_s16 + $0x80] sm:$0xff] %v3275_v6  ;;  %3308 = vst [vmem:[%s5525_s16 + $0x88] sm:$0xff] %v3276_v2 }
 0x484   : > { %3309 = vst [vmem:[%s5525_s16 + $0x90] sm:$0xff] %v3277_v26  ;;  %3310 = vst [vmem:[%s5525_s16 + $0x98] sm:$0xff] %v3278_v34 }
 0x485   : > { %3311 = vst [vmem:[%s5525_s16 + $0xa0] sm:$0xff] %v3279_v36  ;;  %3312 = vst [vmem:[%s5525_s16 + $0xa8] sm:$0xff] %v3280_v14 }
 0x486   : > { %3313 = vst [vmem:[%s5525_s16 + $0xb0] sm:$0xff] %v3281_v27  ;;  %3314 = vst [vmem:[%s5525_s16 + $0xb8] sm:$0xff] %v3282_v28 }
 0x487   : > { %3315 = vst [vmem:[%s5525_s16 + $0xc0] sm:$0xff] %v3283_v63  ;;  %3317 = vst [vmem:[%s5525_s16 + $0xd0] sm:$0xff] %v3285_v7 }
 0x488   : > { %3316 = vst [vmem:[%s5525_s16 + $0xc8] sm:$0xff] %v3284_v31  ;;  %3321 = vst [vmem:[%s5525_s16 + $0xf0] sm:$0xff] %v3289_v53 }
 0x489   : > { %3319 = vst [vmem:[%s5525_s16 + $0xe0] sm:$0xff] %v3287_v52  ;;  %3322 = vst [vmem:[%s5525_s16 + $0xf8] sm:$0xff] %v3290_v56 }
 0x48a   : > { %3320 = vst [vmem:[%s5525_s16 + $0xe8] sm:$0xff] %v3288_v0 }
 0x48b   : > { %3792 = shalt.err (!%p3789_p3)
}
 0x48c   : > { %s3793_s30 = scalar_lea.hbm %s5572_s23, 4096  ;;  %s3797_s20 = scalar_lea.hbm %s5649_s13, 8192 }
 0x48d   : > { %p3794_p4 = scmp.ne.s32.totalorder %s5572_s23, %s3793_s30  ;;  %p3798_p9 = scmp.lt.u32.totalorder %s5572_s23, %s5649_s13 }
 0x48e   : > { %p3799_p10 = scmp.lt.u32.totalorder %s3797_s20, %s3793_s30  ;;  %p3801_p12 = scmp.lt.u32.totalorder %s3793_s30, %s5572_s23 }
 0x48f   : > { %p3795_p7 = pnand %p3794_p4, %p3956_p5 }
 0x490   : > { %p3800_p11 = por %p3799_p10, %p3798_p9 }
 0x491   : > { %p3796_p8 = pneg %p3795_p7 }
 0x492   : > { %p3802_p13 = por %p3801_p12, %p3800_p11 }
 0x494   : > { %p3803_p0 = pnand %p3802_p13, %p3796_p8 }
 0x496   : > { %3806 = shalt.err (!%p3803_p0)
}
 0x497   : > { %s3846_s15 = smov 128   ;;  %s3847_s22 = smov 8  }
 0x498   : > { %3710 = dma.vmem_to_hbm [thread:$0]  (%p3956_p5), %s5574_s21, 4096, %s5572_s23, %s5595_s24, %s3846_s15, %s3846_s15, %s3847_s22  }
 0x499 PF: > { %p3716_p1 = scmp.ge.s32.totalorder %s3841_s28, 2  ;;  %s3352_s0 = sand.u32 1, %s3829_s25  }
 0x49a   : > { %s3353_s1 = scalar_lea.sflag [#allocation4], %s3352_s0 }
 0x49b   : > { %p3713_p2 = pnand %p3716_p1, %p3960_p6 }
 0x49d   : > { %3824 = dma.done.wait (!%p3713_p2), %s3353_s1, 4096  }
 0x49e   : > { %3826 = vsyncadd (!%p3713_p2), %s3353_s1, 4294963200  ;;  %p23_p3 = scmp.ge.s32.totalorder %s3943_s14, 4   ;;  %s5849_s25 = smov %s3833_s26 }
 0x49f   : > { %s5850_s26 = smov %s3837_s27  ;;  %s5851_s27 = smov %s3954_s17 }
 0x4a0   : > { %s5852_s28 = smov %s3943_s14  ;;  %25 = sbr.rel (!%p23_p3) target bundleno = 6 (0x6), region = 107 }
 0x4a7   :  { %3358 = vsyncpa [#allocation4], 1 }
 0x4a8   :  { %3360 = vsyncpa [#allocation4 + $0x1], 1 }

</bundles_post_ra>
